<compile_context>
chip_gen: v6e
topology: v6e:2x2x1
jax: 0.10.0
libtpu: 0.0.40
codegen_flags: <defaults>
</compile_context>

<pallas_src>
import math

import jax
import jax.numpy as jnp
from jax import lax
from jax.experimental import pallas as pl
from jax.experimental.pallas import tpu as pltpu

IMAGE_SIZE = (1, 28, 28)
LATENT_DIM = 96
LATENT_PAD = 128                       # 96 padded to one full lane tile
OUT_DIM = int(IMAGE_SIZE[0] * IMAGE_SIZE[1] * IMAGE_SIZE[2])   # 784
OUT_PAD = 896                          # 7 * 128, lane-dense head output
HIDDEN = (128, 256, 512, 1024)
PACK_W = 1024                          # lane width of the packed small params
BN_EPS = 1e-5


def _gelu_exact(x):
    # PyTorch nn.GELU() default: 0.5 * x * (1 + erf(x / sqrt(2)))
    return 0.5 * x * (1.0 + lax.erf(x * jnp.float32(1.0 / math.sqrt(2.0))))


def _bn_gelu(x_f32, gamma, beta):
    """Training-mode BatchNorm1d (biased variance) + exact GELU, bf16 out.

    Linear bias before BN is omitted upstream because BN's mean subtraction
    cancels it exactly: (x + b) - mean(x + b) = x - mean(x).
    Statistics and scale/shift math stay in f32; the returned activation is
    bf16, ready for the next MXU push.
    """
    mean = jnp.mean(x_f32, axis=0, keepdims=True)
    centered = x_f32 - mean
    var = jnp.mean(centered * centered, axis=0, keepdims=True)   # biased
    scale = gamma * lax.rsqrt(var + jnp.float32(BN_EPS))
    y = centered * scale + beta
    return _gelu_exact(y).astype(jnp.bfloat16)


def _mm(x_bf16, w_ref):
    # bf16 x bf16 MXU matmul with f32 accumulation.
    return jnp.dot(x_bf16, w_ref[...], preferred_element_type=jnp.float32)


def generator_kernel(z_ref, w1_ref, w2_ref, w3_ref, w4_hbm, w5_hbm, p_ref,
                     out_ref, w4_vmem, w5_vmem, sem):
    # Kick off the two big weight copies immediately; they overlap with the
    # layer 1-3 matmuls / BN / GELU below.
    cp4 = pltpu.make_async_copy(w4_hbm, w4_vmem, sem.at[0])
    cp5 = pltpu.make_async_copy(w5_hbm, w5_vmem, sem.at[1])
    cp4.start()
    cp5.start()

    x = z_ref[...]                                   # (B, 128) bf16

    # Blocks 1-3: Linear (bias dropped, cancelled by BN) + fused BN + GELU.
    # Small-parameter slices come out of the single packed (9, 1024) array.
    x = _bn_gelu(_mm(x, w1_ref), p_ref[0:1, :HIDDEN[0]], p_ref[1:2, :HIDDEN[0]])
    x = _bn_gelu(_mm(x, w2_ref), p_ref[2:3, :HIDDEN[1]], p_ref[3:4, :HIDDEN[1]])
    x = _bn_gelu(_mm(x, w3_ref), p_ref[4:5, :HIDDEN[2]], p_ref[5:6, :HIDDEN[2]])

    # Block 4 needs w4 in VMEM now.
    cp4.wait()
    x = _bn_gelu(_mm(x, w4_vmem), p_ref[6:7, :HIDDEN[3]], p_ref[7:8, :HIDDEN[3]])

    # Head: Linear(1024 -> 784, padded to 896) + Sigmoid (lane-dense store).
    cp5.wait()
    x = _mm(x, w5_vmem) + p_ref[8:9, :OUT_PAD]
    out_ref[...] = jax.nn.sigmoid(x)


def init_params(key):
    """Deterministic parameter init matching the module's shapes.

    Returns (w1, w2, w3, w4, w5, packed) where:
      * w_i are (in_dim, out_dim) bf16 so the kernel computes x @ W on the MXU;
        w1 is zero-row-padded to K=128, w5 zero-col-padded to N=896 (exact).
      * packed is a (9, 1024) f32 array holding, per row:
          0: gamma1  1: beta1   2: gamma2  3: beta2
          4: gamma3  5: beta3   6: gamma4  7: beta4   8: head bias b5
        each zero-padded on the lane axis to 1024.
    Linear biases b1..b4 are not materialized (cancelled by BatchNorm).
    """
    dims = (LATENT_DIM,) + HIDDEN + (OUT_DIM,)
    weights = []
    packed_rows = []
    for i in range(len(dims) - 1):
        fan_in, fan_out = dims[i], dims[i + 1]
        key, wk, bk = jax.random.split(key, 3)
        bound = 1.0 / math.sqrt(fan_in)
        w = jax.random.uniform(wk, (fan_in, fan_out), jnp.float32, -bound, bound)
        if i == 0:
            w = jnp.pad(w, ((0, LATENT_PAD - LATENT_DIM), (0, 0)))
        if i == len(dims) - 2:
            # Head layer: keep (padded) bias, no BN.
            b = jax.random.uniform(bk, (1, fan_out), jnp.float32, -bound, bound)
            w = jnp.pad(w, ((0, 0), (0, OUT_PAD - OUT_DIM)))
            b = jnp.pad(b, ((0, 0), (0, PACK_W - OUT_DIM)))
            packed_rows.append(b)
        else:
            gamma = jnp.pad(jnp.ones((1, fan_out), jnp.float32),
                            ((0, 0), (0, PACK_W - fan_out)))
            beta = jnp.zeros((1, PACK_W), jnp.float32)
            packed_rows.extend([gamma, beta])
        weights.append(w.astype(jnp.bfloat16))
    packed = jnp.concatenate(packed_rows, axis=0)          # (9, 1024) f32
    return tuple(weights) + (packed,)


def generator_forward(z, params):
    batch = z.shape[0]
    w1, w2, w3, w4, w5, packed = params
    # Zero-pad latent features 96 -> 128 (lane-dense K) and feed bf16.
    z_pad = jnp.pad(z.astype(jnp.bfloat16),
                    ((0, 0), (0, LATENT_PAD - LATENT_DIM)))
    flat = pl.pallas_call(
        generator_kernel,
        out_shape=jax.ShapeDtypeStruct((batch, OUT_PAD), jnp.float32),
        in_specs=[
            pl.BlockSpec(memory_space=pltpu.MemorySpace.VMEM),  # z
            pl.BlockSpec(memory_space=pltpu.MemorySpace.VMEM),  # w1
            pl.BlockSpec(memory_space=pltpu.MemorySpace.VMEM),  # w2
            pl.BlockSpec(memory_space=pltpu.MemorySpace.VMEM),  # w3
            pl.BlockSpec(memory_space=pl.ANY),                  # w4 (stays in HBM)
            pl.BlockSpec(memory_space=pl.ANY),                  # w5 (stays in HBM)
            pl.BlockSpec(memory_space=pltpu.MemorySpace.VMEM),  # packed small params
        ],
        out_specs=pl.BlockSpec(memory_space=pltpu.MemorySpace.VMEM),
        scratch_shapes=[
            pltpu.VMEM((HIDDEN[2], HIDDEN[3]), jnp.bfloat16),   # w4 landing buffer
            pltpu.VMEM((HIDDEN[3], OUT_PAD), jnp.bfloat16),     # w5 landing buffer
            pltpu.SemaphoreType.DMA((2,)),
        ],
        compiler_params=pltpu.CompilerParams(vmem_limit_bytes=8 << 20),
    )(z_pad, w1, w2, w3, w4, w5, packed)
    # Glue: drop the zero-weight padding columns, then NCHW reshape
    # (matches output.reshape(z.shape[0], 1, 28, 28) in PyTorch).
    return flat[:, :OUT_DIM].reshape(batch, *IMAGE_SIZE)


if __name__ == "__main__":
    key = jax.random.PRNGKey(0)
    pkey, zkey = jax.random.split(key)
    params = init_params(pkey)

    batch = 8
    z = jax.random.normal(zkey, (batch, LATENT_DIM), dtype=jnp.float32)

    image = generator_forward(z, params)
    jax.block_until_ready(image)

    assert image.shape == (batch, 1, 28, 28), image.shape
    assert bool(jnp.all(jnp.isfinite(image)))
    assert bool(jnp.all((image >= 0.0) & (image <= 1.0)))  # sigmoid range
    print("KERNEL_OK")
</pallas_src>

<mosaic_0001>
module attributes {stable_mosaic.version = 11 : i64} {
  func.func @generator_kernel(%arg0: memref<8x128xbf16, #tpu.memory_space<vmem>>, %arg1: memref<128x128xbf16, #tpu.memory_space<vmem>>, %arg2: memref<128x256xbf16, #tpu.memory_space<vmem>>, %arg3: memref<256x512xbf16, #tpu.memory_space<vmem>>, %arg4: memref<512x1024xbf16, #tpu.memory_space<any>>, %arg5: memref<1024x896xbf16, #tpu.memory_space<any>>, %arg6: memref<9x1024xf32, #tpu.memory_space<vmem>>, %arg7: memref<8x896xf32, #tpu.memory_space<vmem>>, %arg8: memref<512x1024xbf16, #tpu.memory_space<vmem>>, %arg9: memref<1024x896xbf16, #tpu.memory_space<vmem>>, %arg10: memref<2x!tpu.dma_semaphore, #tpu.memory_space<semaphore_mem>>) attributes {dimension_semantics = [], scalar_prefetch = 0 : i64, scratch_operands = 3 : i64, tpu.core_type = #tpu.core_type<tc>} {
    %c0_i32 = arith.constant 0 : i32
    %0 = tpu.memref_slice %arg10[%c0_i32] : memref<2x!tpu.dma_semaphore, #tpu.memory_space<semaphore_mem>> -> memref<1x!tpu.dma_semaphore, #tpu.memory_space<semaphore_mem>>
    %1 = tpu.memref_squeeze %0 : memref<1x!tpu.dma_semaphore, #tpu.memory_space<semaphore_mem>> -> memref<!tpu.dma_semaphore, #tpu.memory_space<semaphore_mem>>
    tpu.enqueue_dma source(%arg4 : memref<512x1024xbf16, #tpu.memory_space<any>>) target(%arg8 : memref<512x1024xbf16, #tpu.memory_space<vmem>>) target_semaphore(%1 : memref<!tpu.dma_semaphore, #tpu.memory_space<semaphore_mem>>)
    %c1_i32 = arith.constant 1 : i32
    %2 = tpu.memref_slice %arg10[%c1_i32] : memref<2x!tpu.dma_semaphore, #tpu.memory_space<semaphore_mem>> -> memref<1x!tpu.dma_semaphore, #tpu.memory_space<semaphore_mem>>
    %3 = tpu.memref_squeeze %2 : memref<1x!tpu.dma_semaphore, #tpu.memory_space<semaphore_mem>> -> memref<!tpu.dma_semaphore, #tpu.memory_space<semaphore_mem>>
    tpu.enqueue_dma source(%arg5 : memref<1024x896xbf16, #tpu.memory_space<any>>) target(%arg9 : memref<1024x896xbf16, #tpu.memory_space<vmem>>) target_semaphore(%3 : memref<!tpu.dma_semaphore, #tpu.memory_space<semaphore_mem>>)
    %c0 = arith.constant 0 : index
    %c0_0 = arith.constant 0 : index
    %4 = vector.load %arg0[%c0, %c0_0] : memref<8x128xbf16, #tpu.memory_space<vmem>>, vector<8x128xbf16>
    %c0_1 = arith.constant 0 : index
    %c0_2 = arith.constant 0 : index
    %5 = vector.load %arg1[%c0_1, %c0_2] : memref<128x128xbf16, #tpu.memory_space<vmem>>, vector<128x128xbf16>
    %cst = arith.constant dense<0.000000e+00> : vector<8x128xf32>
    %6 = tpu.matmul %4, %5, %cst {dimension_numbers = #tpu.dot_dimension_numbers<[1], [0], [0], [1], [0, 0, 1, 1], [], []>} : vector<8x128xbf16>, vector<128x128xbf16>, vector<8x128xf32> -> vector<8x128xf32>
    %c0_3 = arith.constant 0 : index
    %c0_4 = arith.constant 0 : index
    %7 = vector.load %arg6[%c0_3, %c0_4] : memref<9x1024xf32, #tpu.memory_space<vmem>>, vector<1x128xf32>
    %c1 = arith.constant 1 : index
    %c0_5 = arith.constant 0 : index
    %8 = vector.load %arg6[%c1, %c0_5] : memref<9x1024xf32, #tpu.memory_space<vmem>>, vector<1x128xf32>
    %cst_6 = arith.constant dense<0.000000e+00> : vector<128xf32>
    %9 = vector.multi_reduction <add>, %6, %cst_6 [0] : vector<8x128xf32> to vector<128xf32>
    %10 = vector.shape_cast %9 : vector<128xf32> to vector<1x128xf32>
    %cst_7 = arith.constant 8.000000e+00 : f32
    %11 = vector.broadcast %cst_7 : f32 to vector<1x128xf32>
    %12 = arith.divf %10, %11 : vector<1x128xf32>
    %13 = vector.broadcast %12 : vector<1x128xf32> to vector<8x128xf32>
    %14 = arith.subf %6, %13 : vector<8x128xf32>
    %15 = arith.mulf %14, %14 : vector<8x128xf32>
    %cst_8 = arith.constant dense<0.000000e+00> : vector<128xf32>
    %16 = vector.multi_reduction <add>, %15, %cst_8 [0] : vector<8x128xf32> to vector<128xf32>
    %17 = vector.shape_cast %16 : vector<128xf32> to vector<1x128xf32>
    %cst_9 = arith.constant 8.000000e+00 : f32
    %18 = vector.broadcast %cst_9 : f32 to vector<1x128xf32>
    %19 = arith.divf %17, %18 : vector<1x128xf32>
    %cst_10 = arith.constant 9.99999974E-6 : f32
    %20 = vector.broadcast %cst_10 : f32 to vector<1x128xf32>
    %21 = arith.addf %19, %20 : vector<1x128xf32>
    %22 = math.rsqrt %21 : vector<1x128xf32>
    %23 = arith.mulf %7, %22 : vector<1x128xf32>
    %24 = vector.broadcast %23 : vector<1x128xf32> to vector<8x128xf32>
    %25 = arith.mulf %14, %24 : vector<8x128xf32>
    %26 = vector.broadcast %8 : vector<1x128xf32> to vector<8x128xf32>
    %27 = arith.addf %25, %26 : vector<8x128xf32>
    %cst_11 = arith.constant 5.000000e-01 : f32
    %28 = vector.broadcast %cst_11 : f32 to vector<8x128xf32>
    %29 = arith.mulf %28, %27 : vector<8x128xf32>
    %cst_12 = arith.constant 0.707106769 : f32
    %30 = vector.broadcast %cst_12 : f32 to vector<8x128xf32>
    %31 = arith.mulf %27, %30 : vector<8x128xf32>
    %32 = math.erf %31 : vector<8x128xf32>
    %cst_13 = arith.constant 1.000000e+00 : f32
    %33 = vector.broadcast %cst_13 : f32 to vector<8x128xf32>
    %34 = arith.addf %33, %32 : vector<8x128xf32>
    %35 = arith.mulf %29, %34 : vector<8x128xf32>
    %36 = arith.truncf %35 : vector<8x128xf32> to vector<8x128xbf16>
    %c0_14 = arith.constant 0 : index
    %c0_15 = arith.constant 0 : index
    %37 = vector.load %arg2[%c0_14, %c0_15] : memref<128x256xbf16, #tpu.memory_space<vmem>>, vector<128x256xbf16>
    %cst_16 = arith.constant dense<0.000000e+00> : vector<8x256xf32>
    %38 = tpu.matmul %36, %37, %cst_16 {dimension_numbers = #tpu.dot_dimension_numbers<[1], [0], [0], [1], [0, 0, 1, 1], [], []>} : vector<8x128xbf16>, vector<128x256xbf16>, vector<8x256xf32> -> vector<8x256xf32>
    %c2 = arith.constant 2 : index
    %c0_17 = arith.constant 0 : index
    %39 = vector.load %arg6[%c2, %c0_17] : memref<9x1024xf32, #tpu.memory_space<vmem>>, vector<1x256xf32>
    %c3 = arith.constant 3 : index
    %c0_18 = arith.constant 0 : index
    %40 = vector.load %arg6[%c3, %c0_18] : memref<9x1024xf32, #tpu.memory_space<vmem>>, vector<1x256xf32>
    %cst_19 = arith.constant dense<0.000000e+00> : vector<256xf32>
    %41 = vector.multi_reduction <add>, %38, %cst_19 [0] : vector<8x256xf32> to vector<256xf32>
    %42 = vector.shape_cast %41 : vector<256xf32> to vector<1x256xf32>
    %cst_20 = arith.constant 8.000000e+00 : f32
    %43 = vector.broadcast %cst_20 : f32 to vector<1x256xf32>
    %44 = arith.divf %42, %43 : vector<1x256xf32>
    %45 = vector.broadcast %44 : vector<1x256xf32> to vector<8x256xf32>
    %46 = arith.subf %38, %45 : vector<8x256xf32>
    %47 = arith.mulf %46, %46 : vector<8x256xf32>
    %cst_21 = arith.constant dense<0.000000e+00> : vector<256xf32>
    %48 = vector.multi_reduction <add>, %47, %cst_21 [0] : vector<8x256xf32> to vector<256xf32>
    %49 = vector.shape_cast %48 : vector<256xf32> to vector<1x256xf32>
    %cst_22 = arith.constant 8.000000e+00 : f32
    %50 = vector.broadcast %cst_22 : f32 to vector<1x256xf32>
    %51 = arith.divf %49, %50 : vector<1x256xf32>
    %cst_23 = arith.constant 9.99999974E-6 : f32
    %52 = vector.broadcast %cst_23 : f32 to vector<1x256xf32>
    %53 = arith.addf %51, %52 : vector<1x256xf32>
    %54 = math.rsqrt %53 : vector<1x256xf32>
    %55 = arith.mulf %39, %54 : vector<1x256xf32>
    %56 = vector.broadcast %55 : vector<1x256xf32> to vector<8x256xf32>
    %57 = arith.mulf %46, %56 : vector<8x256xf32>
    %58 = vector.broadcast %40 : vector<1x256xf32> to vector<8x256xf32>
    %59 = arith.addf %57, %58 : vector<8x256xf32>
    %cst_24 = arith.constant 5.000000e-01 : f32
    %60 = vector.broadcast %cst_24 : f32 to vector<8x256xf32>
    %61 = arith.mulf %60, %59 : vector<8x256xf32>
    %cst_25 = arith.constant 0.707106769 : f32
    %62 = vector.broadcast %cst_25 : f32 to vector<8x256xf32>
    %63 = arith.mulf %59, %62 : vector<8x256xf32>
    %64 = math.erf %63 : vector<8x256xf32>
    %cst_26 = arith.constant 1.000000e+00 : f32
    %65 = vector.broadcast %cst_26 : f32 to vector<8x256xf32>
    %66 = arith.addf %65, %64 : vector<8x256xf32>
    %67 = arith.mulf %61, %66 : vector<8x256xf32>
    %68 = arith.truncf %67 : vector<8x256xf32> to vector<8x256xbf16>
    %c0_27 = arith.constant 0 : index
    %c0_28 = arith.constant 0 : index
    %69 = vector.load %arg3[%c0_27, %c0_28] : memref<256x512xbf16, #tpu.memory_space<vmem>>, vector<256x512xbf16>
    %cst_29 = arith.constant dense<0.000000e+00> : vector<8x512xf32>
    %70 = tpu.matmul %68, %69, %cst_29 {dimension_numbers = #tpu.dot_dimension_numbers<[1], [0], [0], [1], [0, 0, 1, 1], [], []>} : vector<8x256xbf16>, vector<256x512xbf16>, vector<8x512xf32> -> vector<8x512xf32>
    %c4 = arith.constant 4 : index
    %c0_30 = arith.constant 0 : index
    %71 = vector.load %arg6[%c4, %c0_30] : memref<9x1024xf32, #tpu.memory_space<vmem>>, vector<1x512xf32>
    %c5 = arith.constant 5 : index
    %c0_31 = arith.constant 0 : index
    %72 = vector.load %arg6[%c5, %c0_31] : memref<9x1024xf32, #tpu.memory_space<vmem>>, vector<1x512xf32>
    %cst_32 = arith.constant dense<0.000000e+00> : vector<512xf32>
    %73 = vector.multi_reduction <add>, %70, %cst_32 [0] : vector<8x512xf32> to vector<512xf32>
    %74 = vector.shape_cast %73 : vector<512xf32> to vector<1x512xf32>
    %cst_33 = arith.constant 8.000000e+00 : f32
    %75 = vector.broadcast %cst_33 : f32 to vector<1x512xf32>
    %76 = arith.divf %74, %75 : vector<1x512xf32>
    %77 = vector.broadcast %76 : vector<1x512xf32> to vector<8x512xf32>
    %78 = arith.subf %70, %77 : vector<8x512xf32>
    %79 = arith.mulf %78, %78 : vector<8x512xf32>
    %cst_34 = arith.constant dense<0.000000e+00> : vector<512xf32>
    %80 = vector.multi_reduction <add>, %79, %cst_34 [0] : vector<8x512xf32> to vector<512xf32>
    %81 = vector.shape_cast %80 : vector<512xf32> to vector<1x512xf32>
    %cst_35 = arith.constant 8.000000e+00 : f32
    %82 = vector.broadcast %cst_35 : f32 to vector<1x512xf32>
    %83 = arith.divf %81, %82 : vector<1x512xf32>
    %cst_36 = arith.constant 9.99999974E-6 : f32
    %84 = vector.broadcast %cst_36 : f32 to vector<1x512xf32>
    %85 = arith.addf %83, %84 : vector<1x512xf32>
    %86 = math.rsqrt %85 : vector<1x512xf32>
    %87 = arith.mulf %71, %86 : vector<1x512xf32>
    %88 = vector.broadcast %87 : vector<1x512xf32> to vector<8x512xf32>
    %89 = arith.mulf %78, %88 : vector<8x512xf32>
    %90 = vector.broadcast %72 : vector<1x512xf32> to vector<8x512xf32>
    %91 = arith.addf %89, %90 : vector<8x512xf32>
    %cst_37 = arith.constant 5.000000e-01 : f32
    %92 = vector.broadcast %cst_37 : f32 to vector<8x512xf32>
    %93 = arith.mulf %92, %91 : vector<8x512xf32>
    %cst_38 = arith.constant 0.707106769 : f32
    %94 = vector.broadcast %cst_38 : f32 to vector<8x512xf32>
    %95 = arith.mulf %91, %94 : vector<8x512xf32>
    %96 = math.erf %95 : vector<8x512xf32>
    %cst_39 = arith.constant 1.000000e+00 : f32
    %97 = vector.broadcast %cst_39 : f32 to vector<8x512xf32>
    %98 = arith.addf %97, %96 : vector<8x512xf32>
    %99 = arith.mulf %93, %98 : vector<8x512xf32>
    %100 = arith.truncf %99 : vector<8x512xf32> to vector<8x512xbf16>
    %c0_i32_40 = arith.constant 0 : i32
    %101 = tpu.memref_slice %arg10[%c0_i32_40] : memref<2x!tpu.dma_semaphore, #tpu.memory_space<semaphore_mem>> -> memref<1x!tpu.dma_semaphore, #tpu.memory_space<semaphore_mem>>
    %102 = tpu.memref_squeeze %101 : memref<1x!tpu.dma_semaphore, #tpu.memory_space<semaphore_mem>> -> memref<!tpu.dma_semaphore, #tpu.memory_space<semaphore_mem>>
    tpu.wait_dma2 semaphore(%102 : memref<!tpu.dma_semaphore, #tpu.memory_space<semaphore_mem>>) src(%arg4 : memref<512x1024xbf16, #tpu.memory_space<any>>) dst(%arg8 : memref<512x1024xbf16, #tpu.memory_space<vmem>>)
    %c0_41 = arith.constant 0 : index
    %c0_42 = arith.constant 0 : index
    %103 = vector.load %arg8[%c0_41, %c0_42] : memref<512x1024xbf16, #tpu.memory_space<vmem>>, vector<512x1024xbf16>
    %cst_43 = arith.constant dense<0.000000e+00> : vector<8x1024xf32>
    %104 = tpu.matmul %100, %103, %cst_43 {dimension_numbers = #tpu.dot_dimension_numbers<[1], [0], [0], [1], [0, 0, 1, 1], [], []>} : vector<8x512xbf16>, vector<512x1024xbf16>, vector<8x1024xf32> -> vector<8x1024xf32>
    %c6 = arith.constant 6 : index
    %c0_44 = arith.constant 0 : index
    %105 = vector.load %arg6[%c6, %c0_44] : memref<9x1024xf32, #tpu.memory_space<vmem>>, vector<1x1024xf32>
    %c7 = arith.constant 7 : index
    %c0_45 = arith.constant 0 : index
    %106 = vector.load %arg6[%c7, %c0_45] : memref<9x1024xf32, #tpu.memory_space<vmem>>, vector<1x1024xf32>
    %cst_46 = arith.constant dense<0.000000e+00> : vector<1024xf32>
    %107 = vector.multi_reduction <add>, %104, %cst_46 [0] : vector<8x1024xf32> to vector<1024xf32>
    %108 = vector.shape_cast %107 : vector<1024xf32> to vector<1x1024xf32>
    %cst_47 = arith.constant 8.000000e+00 : f32
    %109 = vector.broadcast %cst_47 : f32 to vector<1x1024xf32>
    %110 = arith.divf %108, %109 : vector<1x1024xf32>
    %111 = vector.broadcast %110 : vector<1x1024xf32> to vector<8x1024xf32>
    %112 = arith.subf %104, %111 : vector<8x1024xf32>
    %113 = arith.mulf %112, %112 : vector<8x1024xf32>
    %cst_48 = arith.constant dense<0.000000e+00> : vector<1024xf32>
    %114 = vector.multi_reduction <add>, %113, %cst_48 [0] : vector<8x1024xf32> to vector<1024xf32>
    %115 = vector.shape_cast %114 : vector<1024xf32> to vector<1x1024xf32>
    %cst_49 = arith.constant 8.000000e+00 : f32
    %116 = vector.broadcast %cst_49 : f32 to vector<1x1024xf32>
    %117 = arith.divf %115, %116 : vector<1x1024xf32>
    %cst_50 = arith.constant 9.99999974E-6 : f32
    %118 = vector.broadcast %cst_50 : f32 to vector<1x1024xf32>
    %119 = arith.addf %117, %118 : vector<1x1024xf32>
    %120 = math.rsqrt %119 : vector<1x1024xf32>
    %121 = arith.mulf %105, %120 : vector<1x1024xf32>
    %122 = vector.broadcast %121 : vector<1x1024xf32> to vector<8x1024xf32>
    %123 = arith.mulf %112, %122 : vector<8x1024xf32>
    %124 = vector.broadcast %106 : vector<1x1024xf32> to vector<8x1024xf32>
    %125 = arith.addf %123, %124 : vector<8x1024xf32>
    %cst_51 = arith.constant 5.000000e-01 : f32
    %126 = vector.broadcast %cst_51 : f32 to vector<8x1024xf32>
    %127 = arith.mulf %126, %125 : vector<8x1024xf32>
    %cst_52 = arith.constant 0.707106769 : f32
    %128 = vector.broadcast %cst_52 : f32 to vector<8x1024xf32>
    %129 = arith.mulf %125, %128 : vector<8x1024xf32>
    %130 = math.erf %129 : vector<8x1024xf32>
    %cst_53 = arith.constant 1.000000e+00 : f32
    %131 = vector.broadcast %cst_53 : f32 to vector<8x1024xf32>
    %132 = arith.addf %131, %130 : vector<8x1024xf32>
    %133 = arith.mulf %127, %132 : vector<8x1024xf32>
    %134 = arith.truncf %133 : vector<8x1024xf32> to vector<8x1024xbf16>
    %c1_i32_54 = arith.constant 1 : i32
    %135 = tpu.memref_slice %arg10[%c1_i32_54] : memref<2x!tpu.dma_semaphore, #tpu.memory_space<semaphore_mem>> -> memref<1x!tpu.dma_semaphore, #tpu.memory_space<semaphore_mem>>
    %136 = tpu.memref_squeeze %135 : memref<1x!tpu.dma_semaphore, #tpu.memory_space<semaphore_mem>> -> memref<!tpu.dma_semaphore, #tpu.memory_space<semaphore_mem>>
    tpu.wait_dma2 semaphore(%136 : memref<!tpu.dma_semaphore, #tpu.memory_space<semaphore_mem>>) src(%arg5 : memref<1024x896xbf16, #tpu.memory_space<any>>) dst(%arg9 : memref<1024x896xbf16, #tpu.memory_space<vmem>>)
    %c0_55 = arith.constant 0 : index
    %c0_56 = arith.constant 0 : index
    %137 = vector.load %arg9[%c0_55, %c0_56] : memref<1024x896xbf16, #tpu.memory_space<vmem>>, vector<1024x896xbf16>
    %cst_57 = arith.constant dense<0.000000e+00> : vector<8x896xf32>
    %138 = tpu.matmul %134, %137, %cst_57 {dimension_numbers = #tpu.dot_dimension_numbers<[1], [0], [0], [1], [0, 0, 1, 1], [], []>} : vector<8x1024xbf16>, vector<1024x896xbf16>, vector<8x896xf32> -> vector<8x896xf32>
    %c8 = arith.constant 8 : index
    %c0_58 = arith.constant 0 : index
    %139 = vector.load %arg6[%c8, %c0_58] : memref<9x1024xf32, #tpu.memory_space<vmem>>, vector<1x896xf32>
    %140 = vector.broadcast %139 : vector<1x896xf32> to vector<8x896xf32>
    %141 = arith.addf %138, %140 : vector<8x896xf32>
    %142 = arith.negf %141 : vector<8x896xf32>
    %143 = math.exp %142 : vector<8x896xf32>
    %cst_59 = arith.constant 1.000000e+00 : f32
    %144 = vector.broadcast %cst_59 : f32 to vector<8x896xf32>
    %145 = arith.addf %144, %143 : vector<8x896xf32>
    %146 = arith.divf %144, %145 : vector<8x896xf32>
    %c0_60 = arith.constant 0 : index
    %c0_61 = arith.constant 0 : index
    %147 = vector.load %arg7[%c0_60, %c0_61] : memref<8x896xf32, #tpu.memory_space<vmem>>, vector<8x896xf32>
    tpu.vector_store %arg7[%c0_60, %c0_61], %146 {strides = array<i32>} : memref<8x896xf32, #tpu.memory_space<vmem>>, vector<8x896xf32>,
    return
  }
}

</mosaic_0001>

<bundles_post_ra>
// kernel: tpu_custom_call.1
= control target key start
LH: loop header
LB: loop body
LE: loop exit
PB: predicated region body
PF: predicated region fallthrough
CT: control target
= control target key end

     0   :  { %12 = vsyncpa [#allocation6], 0  ;;  %s9240_s0 = inlined_call_operand.hbm [shape: bf16[8,128], index: 0, kind: input, shape index: {}]   ;;  %s9241_s1 = inlined_call_operand.hbm [shape: bf16[128,128], index: 1, kind: input, shape index: {}]   ;;  %s9242_s2 = inlined_call_operand.hbm [shape: bf16[128,256], index: 2, kind: input, shape index: {}]   ;;  %s9243_s3 = inlined_call_operand.hbm [shape: bf16[256,512], index: 3, kind: input, shape index: {}]   ;;  %s9244_s4 = inlined_call_operand.hbm [shape: bf16[512,1024], index: 4, kind: input, shape index: {}]   ;;  %s9245_s5 = inlined_call_operand.hbm [shape: bf16[1024,896], index: 5, kind: input, shape index: {}]   ;;  %s9246_s6 = inlined_call_operand.hbm [shape: f32[9,1024], index: 6, kind: input, shape index: {}]   ;;  %s9247_s7 = inlined_call_operand.hbm [shape: f32[8,896], index: 7, kind: output, shape index: {}]  }
   0x1   :  { %13 = vsyncpa [#allocation9], 0 }
   0x2   :  { %14 = vsyncpa [#allocation12], 0 }
   0x3   :  { %15 = vsyncpa [#allocation7], 0  ;;  %s8909_s24 = smov [#allocation8]  }
   0x4   :  { %s31_s25 = sshll.u32 %s8909_s24, 4  ;;  %s32_s25 = int_to_ptr.vmem [resolvable:$true] %s31_s25 }
   0x5   :  { %s8745_s26 = scalar_lea.vmem %s32_s25, 1024  ;;  %p8750_p1 = scmp.lt.s32.totalorder %s32_s25, %s32_s25 }
   0x6   :  { %p8746_p0 = scmp.ne.s32.totalorder %s32_s25, %s8745_s26  ;;  %p8751_p2 = scmp.lt.s32.totalorder %s8745_s26, %s8745_s26 }
   0x8   :  { %p8752_p3 = por %p8751_p2, %p8750_p1 }
   0xa   :  { %p8753_p4 = pnand %p8752_p3, %p8746_p0 }
   0xc   :  { %8756 = shalt.err (!%p8753_p4)
}
   0xd   :  { %s8910_s27 = smov 64   ;;  %s8911_s28 = smov 4  }
   0xe   :  { %37 = dma.hbm_to_vmem [thread:$0]  %s9241_s1, 1024, %s32_s25, [#allocation9], %s8910_s27, %s8910_s27, %s8911_s28  }
   0xf   :  { %s8912_s8 = smov [#allocation11]  }
  0x10   :  { %s55_s9 = sshll.u32 %s8912_s8, 4  ;;  %s56_s9 = int_to_ptr.vmem [resolvable:$true] %s55_s9 }
  0x11   :  { %s8765_s10 = scalar_lea.vmem %s56_s9, 8192  ;;  %p8770_p6 = scmp.lt.s32.totalorder %s56_s9, %s56_s9 }
  0x12   :  { %p8766_p5 = scmp.ne.s32.totalorder %s56_s9, %s8765_s10  ;;  %p8771_p7 = scmp.lt.s32.totalorder %s8765_s10, %s8765_s10 }
  0x14   :  { %p8772_p8 = por %p8771_p7, %p8770_p6 }
  0x16   :  { %p8773_p9 = pnand %p8772_p8, %p8766_p5 }
  0x18   :  { %8776 = shalt.err (!%p8773_p9)
}
  0x19   :  { %s8913_s11 = smov 256   ;;  %s8914_s12 = smov 16  }
  0x1a   :  { %61 = dma.hbm_to_vmem [thread:$0]  %s9243_s3, 8192, %s56_s9, [#allocation12], %s8913_s11, %s8913_s11, %s8914_s12  }
  0x1b   :  { %s8915_s15 = smov [#allocation5]   ;;  %s8916_s17 = smov [#allocation10]  }
  0x1c   :  { %s22_s16 = sshll.u32 %s8915_s15, 4  ;;  %s43_s1 = sshll.u32 %s8916_s17, 4  ;;  %s23_s16 = int_to_ptr.vmem [resolvable:$true] %s22_s16  ;;  %s44_s1 = int_to_ptr.vmem [resolvable:$true] %s43_s1 }
  0x1d   :  { %s8785_s18 = scalar_lea.vmem %s23_s16, 64  ;;  %p8790_p11 = scmp.lt.s32.totalorder %s23_s16, %s23_s16 }
  0x1e   :  { %p8786_p10 = scmp.ne.s32.totalorder %s23_s16, %s8785_s18  ;;  %p8791_p12 = scmp.lt.s32.totalorder %s8785_s18, %s8785_s18 }
  0x20   :  { %p8792_p13 = por %p8791_p12, %p8790_p11 }
  0x22   :  { %p8793_p0 = pnand %p8792_p13, %p8786_p10 }
  0x24   :  { %8796 = shalt.err (!%p8793_p0)
}
  0x25   :  { %25 = dma.hbm_to_vmem [thread:$0]  %s9240_s0, 64, %s23_s16, [#allocation6]  }
  0x26   :  { %s8805_s21 = scalar_lea.vmem %s44_s1, 2048  ;;  %p8810_p2 = scmp.lt.s32.totalorder %s44_s1, %s44_s1 }
  0x27   :  { %p8806_p1 = scmp.ne.s32.totalorder %s44_s1, %s8805_s21  ;;  %p8811_p3 = scmp.lt.s32.totalorder %s8805_s21, %s8805_s21 }
  0x29   :  { %p8812_p4 = por %p8811_p3, %p8810_p2 }
  0x2b   :  { %p8813_p5 = pnand %p8812_p4, %p8806_p1 }
  0x2d   :  { %8816 = shalt.err (!%p8813_p5)
}
  0x2e   :  { %s8917_s3 = smov 128   ;;  %s8918_s22 = smov 8  }
  0x2f   :  { %49 = dma.hbm_to_vmem [thread:$0]  %s9242_s2, 2048, %s44_s1, [#allocation9], %s8917_s3, %s8917_s3, %s8918_s22  }
  0x30   :  { %s8919_s25 = smov [#allocation13]  }
  0x31   :  { %s67_s26 = sshll.u32 %s8919_s25, 4  ;;  %s68_s26 = int_to_ptr.vmem [resolvable:$true] %s67_s26 }
  0x32   :  { %s8825_s28 = scalar_lea.vmem %s68_s26, 2048  ;;  %p8830_p7 = scmp.lt.s32.totalorder %s68_s26, %s68_s26 }
  0x33   :  { %p8826_p6 = scmp.ne.s32.totalorder %s68_s26, %s8825_s28  ;;  %p8831_p8 = scmp.lt.s32.totalorder %s8825_s28, %s8825_s28 }
  0x35   :  { %p8832_p9 = por %p8831_p8, %p8830_p7 }
  0x37   :  { %p8833_p10 = pnand %p8832_p9, %p8826_p6 }
  0x39   :  { %8836 = shalt.err (!%p8833_p10)
}
  0x3a   :  { %s8920_s0 = smov 1024  }
  0x3b   :  { %73 = dma.hbm_to_vmem [thread:$0]  %s9246_s6, 2048, %s68_s26, [#allocation12], %s8920_s0, %s8920_s0, %s8910_s27  }
  0x3c   :  { %8897 = dma.done.wait [#allocation6], 64  }
  0x3d   :  { %8898 = vsyncadd [#allocation6], 4294967232 }
  0x3e   :  { %8899 = dma.done.wait [#allocation9], 3072  }
  0x3f   :  { %8900 = vsyncadd [#allocation9], 4294964224 }
  0x40   :  { %8901 = dma.done.wait [#allocation12], 10240  }
  0x41   :  { %8902 = vsyncadd [#allocation12], 4294957056  ;;  %v8921_v0 = vmov 0.0   ;;  %vm8922_vm0 = vmmov 0   ;;  %v7881_v1 = vld [vmem:[#allocation8 + $0x38] sm:$0xff]   ;;  %v7882_v2 = vld [vmem:[#allocation8 + $0x30] sm:$0xff]  }
  0x42   :  { %7842 = vmatprep.subr.bf16.mxu0 %v8921_v0  ;;  %7858 = vmatprep.mubr.msk.bf16.mxu0 %vm8922_vm0, %v8921_v0  ;;  %v7883_v3 = vld [vmem:[#allocation8 + $0x28] sm:$0xff]   ;;  %v7884_v4 = vld [vmem:[#allocation8 + $0x20] sm:$0xff]   ;;  %v7885_v5 = vld [vmem:[#allocation8 + $0x18] sm:$0xff]   ;;  %v8923_v21 = vmov 0   ;;  %s8925_s2 = smov [#allocation2]   ;;  %s8926_s27 = smov [#allocation3]  }
  0x43   :  { %7843 = vmatpush3.bf16.msra.mxu0 %v7881_v1  ;;  %v7886_v6 = vld [vmem:[#allocation8 + $0x10] sm:$0xff]   ;;  %v7887_v7 = vld [vmem:[#allocation8 + $0x8] sm:$0xff]   ;;  %v7888_v8 = vld [vmem:[#allocation8] sm:$0xff]   ;;  %376 = vmatprep.mubr.bf16.mxu1 %v8923_v21  ;;  %s97_s6 = sshll.u32 %s8925_s2, 4  ;;  %s109_s8 = sshll.u32 %s8926_s27, 4  ;;  %s98_s6 = int_to_ptr.vmem [resolvable:$true] %s97_s6  ;;  %s110_s8 = int_to_ptr.vmem [resolvable:$true] %s109_s8 }
  0x44   :  { %7844 = vmatprep.subr.bf16.mxu0 %v8921_v0  ;;  %v113_v9 = vld [vmem:[#allocation5] sm:$0xf]  ;;  %v7891_v11 = vld [vmem:[#allocation10 + $0x70] ss:$8 sps:$4 sm:$0xff]   ;;  %v7892_v12 = vld [vmem:[#allocation10 + $0x64] ss:$8 sps:$4 sm:$0xff]   ;;  %p8850_p12 = scmp.lt.s32.totalorder %s98_s6, %s98_s6 }
  0x45   :  { %v7889_v10 = vld [vmem:[#allocation10 + $0x74] ss:$8 sps:$4 sm:$0xff]   ;;  %v7894_v13 = vld [vmem:[#allocation10 + $0x60] ss:$8 sps:$4 sm:$0xff]   ;;  %v7897_v15 = vld [vmem:[#allocation10 + $0x50] ss:$8 sps:$4 sm:$0xff]  }
  0x46   :  { %344 = vmatprep.subr.bf16.mxu1 %v7889_v10  ;;  %v7895_v14 = vld [vmem:[#allocation10 + $0x54] ss:$8 sps:$4 sm:$0xff]   ;;  %v7898_v16 = vld [vmem:[#allocation10 + $0x44] ss:$8 sps:$4 sm:$0xff]   ;;  %v7900_v17 = vld [vmem:[#allocation10 + $0x40] ss:$8 sps:$4 sm:$0xff]  }
  0x47   :  { %7845 = vmatpush3.bf16.msra.mxu0 %v7882_v2  ;;  %345 = vmatpush1.bf16.msra.mxu1 %v7891_v11  ;;  %v7901_v18 = vld [vmem:[#allocation10 + $0x34] ss:$8 sps:$4 sm:$0xff]   ;;  %v7903_v19 = vld [vmem:[#allocation10 + $0x30] ss:$8 sps:$4 sm:$0xff]   ;;  %v7904_v20 = vld [vmem:[#allocation10 + $0x24] ss:$8 sps:$4 sm:$0xff]  }
  0x48   :  { %7846 = vmatprep.subr.bf16.mxu0 %v8921_v0  ;;  %346 = vmatprep.subr.bf16.mxu1 %v7892_v12  ;;  %v7906_v22 = vld [vmem:[#allocation10 + $0x20] ss:$8 sps:$4 sm:$0xff]   ;;  %v7907_v23 = vld [vmem:[#allocation10 + $0x14] ss:$8 sps:$4 sm:$0xff]   ;;  %v7909_v24 = vld [vmem:[#allocation10 + $0x10] ss:$8 sps:$4 sm:$0xff]  }
  0x49   :  { %v7910_v25 = vld [vmem:[#allocation10 + $0x4] ss:$8 sps:$4 sm:$0xff]   ;;  %v7912_v26 = vld [vmem:[#allocation10] ss:$8 sps:$4 sm:$0xff]   ;;  %s8845_s9 = scalar_lea.vmem %s98_s6, 32768 }
  0x4a   :  { %v218_v48 = vld [vmem:[#allocation13] ss:$0 sm:$0xff]  ;;  %v219_v51 = vld [vmem:[#allocation13 + $0x1] ss:$0 sm:$0xff]  ;;  %v7915_v60 = vld [vmem:[#allocation11 + $0xe4] ss:$16 sps:$4 sm:$0xff]   ;;  %p8846_p11 = scmp.ne.s32.totalorder %s98_s6, %s8845_s9  ;;  %p8851_p13 = scmp.lt.s32.totalorder %s8845_s9, %s8845_s9 }
  0x4b   :  { %7847 = vmatpush3.bf16.msra.mxu0 %v7883_v3  ;;  %347 = vmatpush1.bf16.msra.mxu1 %v7894_v13  ;;  %v7918_v61 = vld [vmem:[#allocation11 + $0xec] ss:$16 sps:$4 sm:$0xff]   ;;  %v7913_v62 = vld [vmem:[#allocation11 + $0xe0] ss:$16 sps:$4 sm:$0xff]   ;;  %v7916_v63 = vld [vmem:[#allocation11 + $0xe8] ss:$16 sps:$4 sm:$0xff]  }
  0x4c   :  { %7848 = vmatprep.subr.bf16.mxu0 %v8921_v0  ;;  %348 = vmatprep.subr.bf16.mxu1 %v7895_v14  ;;  %v7924_v1 = vld [vmem:[#allocation11 + $0xcc] ss:$16 sps:$4 sm:$0xff]   ;;  %v7919_v2 = vld [vmem:[#allocation11 + $0xc0] ss:$16 sps:$4 sm:$0xff]   ;;  %v7922_v3 = vld [vmem:[#allocation11 + $0xc8] ss:$16 sps:$4 sm:$0xff]   ;;  %p8852_p0 = por %p8851_p13, %p8850_p12 }
  0x4d   :  { %v7931_v10 = vld [vmem:[#allocation11 + $0x80] ss:$16 sps:$4 sm:$0xff]   ;;  %v7934_v11 = vld [vmem:[#allocation11 + $0x88] ss:$16 sps:$4 sm:$0xff]   ;;  %v7939_v12 = vld [vmem:[#allocation11 + $0x64] ss:$16 sps:$4 sm:$0xff]  }
  0x4e   :  { %v7942_v13 = vld [vmem:[#allocation11 + $0x6c] ss:$16 sps:$4 sm:$0xff]   ;;  %v7937_v14 = vld [vmem:[#allocation11 + $0x60] ss:$16 sps:$4 sm:$0xff]   ;;  %p8853_p1 = pnand %p8852_p0, %p8846_p11 }
  0x4f   :  { %7849 = vmatpush3.bf16.msra.mxu0 %v7884_v4  ;;  %349 = vmatpush1.bf16.msra.mxu1 %v7897_v15  ;;  %v7927_v4 = vld [vmem:[#allocation11 + $0xa4] ss:$16 sps:$4 sm:$0xff]   ;;  %v7940_v15 = vld [vmem:[#allocation11 + $0x68] ss:$16 sps:$4 sm:$0xff]   ;;  %v7954_v21 = vld [vmem:[#allocation11 + $0x2c] ss:$16 sps:$4 sm:$0xff]  }
  0x50   :  { %7850 = vmatprep.subr.bf16.mxu0 %v8921_v0  ;;  %350 = vmatprep.subr.bf16.mxu1 %v7898_v16  ;;  %v7945_v16 = vld [vmem:[#allocation11 + $0x44] ss:$16 sps:$4 sm:$0xff]  }
  0x53   :  { %7851 = vmatpush3.bf16.msra.mxu0 %v7885_v5  ;;  %351 = vmatpush1.bf16.msra.mxu1 %v7900_v17  ;;  %v7930_v5 = vld [vmem:[#allocation11 + $0xac] ss:$16 sps:$4 sm:$0xff]  }
  0x54   :  { %7852 = vmatprep.subr.bf16.mxu0 %v8921_v0  ;;  %352 = vmatprep.subr.bf16.mxu1 %v7901_v18  ;;  %v7948_v17 = vld [vmem:[#allocation11 + $0x4c] ss:$16 sps:$4 sm:$0xff]   ;;  %v7943_v18 = vld [vmem:[#allocation11 + $0x40] ss:$16 sps:$4 sm:$0xff]  }
  0x57   :  { %7853 = vmatpush3.bf16.msra.mxu0 %v7886_v6  ;;  %353 = vmatpush1.bf16.msra.mxu1 %v7903_v19  ;;  %v7925_v6 = vld [vmem:[#allocation11 + $0xa0] ss:$16 sps:$4 sm:$0xff]   ;;  %v7946_v19 = vld [vmem:[#allocation11 + $0x48] ss:$16 sps:$4 sm:$0xff]  }
  0x58   :  { %7854 = vmatprep.subr.bf16.mxu0 %v8921_v0  ;;  %354 = vmatprep.subr.bf16.mxu1 %v7904_v20  ;;  %v7951_v20 = vld [vmem:[#allocation11 + $0x24] ss:$16 sps:$4 sm:$0xff]  }
  0x5b   :  { %7855 = vmatpush3.bf16.msra.mxu0 %v7887_v7  ;;  %355 = vmatpush1.bf16.msra.mxu1 %v7906_v22  ;;  %v7928_v7 = vld [vmem:[#allocation11 + $0xa8] ss:$16 sps:$4 sm:$0xff]   ;;  %v7949_v22 = vld [vmem:[#allocation11 + $0x20] ss:$16 sps:$4 sm:$0xff]  }
  0x5c   :  { %7856 = vmatprep.subr.bf16.mxu0 %v8921_v0  ;;  %356 = vmatprep.subr.bf16.mxu1 %v7907_v23  ;;  %v7921_v0 = vld [vmem:[#allocation11 + $0xc4] ss:$16 sps:$4 sm:$0xff]   ;;  %v7952_v23 = vld [vmem:[#allocation11 + $0x28] ss:$16 sps:$4 sm:$0xff]  }
  0x5f   :  { %7857 = vmatpush3.bf16.msra.mxu0 %v7888_v8  ;;  %357 = vmatpush1.bf16.msra.mxu1 %v7909_v24  ;;  %v7933_v8 = vld [vmem:[#allocation11 + $0x84] ss:$16 sps:$4 sm:$0xff]  }
  0x60   :  { %358 = vmatprep.subr.bf16.mxu1 %v7910_v25  ;;  %866 = vmatprep.subr.bf16.mxu0 %v7915_v60  ;;  %v7957_v24 = vld [vmem:[#allocation11 + $0x4] ss:$16 sps:$4 sm:$0xff]   ;;  %v7960_v25 = vld [vmem:[#allocation11 + $0xc] ss:$16 sps:$4 sm:$0xff]  }
  0x62   :  { %7859 = vmatmul.mubr.bf16.vlgmr.msra.gmra.mxu0 %v113_v9  ;;  %v7936_v9 = vld [vmem:[#allocation11 + $0x8c] ss:$16 sps:$4 sm:$0xff]  }
  0x63   :  { %359 = vmatpush1.bf16.msra.mxu1 %v7912_v26  ;;  %867 = vmatpush1.bf16.msra.mxu0 %v7913_v62  ;;  %v7955_v26 = vld [vmem:[#allocation11] ss:$16 sps:$4 sm:$0xff]  }
  0x64   :  { %907 = vmatprep.subr.bf16.mxu1 %v7918_v61  ;;  %868 = vmatprep.subr.bf16.mxu0 %v7921_v0 }
  0x67   :  { %869 = vmatpush1.bf16.msra.mxu0 %v7919_v2 }
  0x68   :  { %870 = vmatprep.subr.bf16.mxu0 %v7927_v4 }
  0x6b   :  { %871 = vmatpush1.bf16.msra.mxu0 %v7925_v6 }
  0x6c   :  { %872 = vmatprep.subr.bf16.mxu0 %v7933_v8 }
  0x6f   :  { %873 = vmatpush1.bf16.msra.mxu0 %v7931_v10 }
  0x70   :  { %874 = vmatprep.subr.bf16.mxu0 %v7939_v12 }
  0x73   :  { %875 = vmatpush1.bf16.msra.mxu0 %v7937_v14 }
  0x74   :  { %876 = vmatprep.subr.bf16.mxu0 %v7945_v16 }
  0x77   :  { %877 = vmatpush1.bf16.msra.mxu0 %v7943_v18 }
  0x78   :  { %878 = vmatprep.subr.bf16.mxu0 %v7951_v20 }
  0x7b   :  { %879 = vmatpush1.bf16.msra.mxu0 %v7949_v22 }
  0x7c   :  { %880 = vmatprep.subr.bf16.mxu0 %v7957_v24 }
  0x7f   :  { %881 = vmatpush1.bf16.msra.mxu0 %v7955_v26 }
 0x122   :  { %v212_v27 = vpop.f32.mrf.mxu0 }
 0x123   :  { %v220_v28 = vrot.slane %v212_v27, 4 }
 0x124   :  { %v7860_v29 = vpop.f32.mrf.mxu0 }
 0x125   :  { %v221_v30 = vadd.f32 %v220_v28, %v212_v27  ;;  %v7963_v28 = vld [vmem:[#allocation11 + $0x1e4] ss:$16 sps:$4 sm:$0xff]   ;;  %v7966_v29 = vld [vmem:[#allocation11 + $0x1ec] ss:$16 sps:$4 sm:$0xff]  }
 0x126   :  { %v215_v31 = vpop.f32.mrf.mxu0  ;;  %882 = vmatprep.subr.bf16.mxu0 %v7963_v28 }
 0x127   :  { %v222_v32 = vrot.slane %v221_v30, 2  ;;  %v7964_v31 = vld [vmem:[#allocation11 + $0x1e8] ss:$16 sps:$4 sm:$0xff]  }
 0x128   :  { %v7861_v33 = vpop.f32.mrf.mxu0 }
 0x129   :  { %v223_v34 = vadd.f32 %v222_v32, %v221_v30  ;;  %v7961_v30 = vld [vmem:[#allocation11 + $0x1e0] ss:$16 sps:$4 sm:$0xff]   ;;  %v7969_v32 = vld [vmem:[#allocation11 + $0x1c4] ss:$16 sps:$4 sm:$0xff]   ;;  %v7972_v33 = vld [vmem:[#allocation11 + $0x1cc] ss:$16 sps:$4 sm:$0xff]  }
 0x12a   :  { %883 = vmatpush2.bf16.msra.mxu0 %v7961_v30 }
 0x12b   :  { %v224_v35 = vrot.slane %v223_v34, 1  ;;  %884 = vmatprep.subr.bf16.mxu0 %v7969_v32 }
 0x12d   :  { %v225_v36 = vadd.f32 %v224_v35, %v223_v34  ;;  %v7967_v34 = vld [vmem:[#allocation11 + $0x1c0] ss:$16 sps:$4 sm:$0xff]   ;;  %v7970_v35 = vld [vmem:[#allocation11 + $0x1c8] ss:$16 sps:$4 sm:$0xff]  }
 0x12e   :  { %885 = vmatpush2.bf16.msra.mxu0 %v7967_v34  ;;  %v8924_v34 = vmov 1966171168  }
 0x12f   :  { %v227_v37 = vmul.f32 0.125, %v225_v36  ;;  %v7975_v36 = vld [vmem:[#allocation11 + $0x1a4] ss:$16 sps:$4 sm:$0xff]  }
 0x130   :  { %886 = vmatprep.subr.bf16.mxu0 %v7975_v36  ;;  %v431_v36 = vlaneseq }
 0x131   :  { %v228_v38 = vsub.f32 %v212_v27, %v227_v37  ;;  %v7958_v27 = vld [vmem:[#allocation11 + $0x8] ss:$16 sps:$4 sm:$0xff]   ;;  %v7978_v37 = vld [vmem:[#allocation11 + $0x1ac] ss:$16 sps:$4 sm:$0xff]  }
 0x133   :  { %v229_v39 = vmul.f32 %v228_v38, %v228_v38 }
 0x135   :  { %v230_v40 = vrot.slane %v229_v39, 4 }
 0x137   :  { %v231_v41 = vadd.f32 %v230_v40, %v229_v39  ;;  %v7976_v39 = vld [vmem:[#allocation11 + $0x1a8] ss:$16 sps:$4 sm:$0xff]   ;;  %v7981_v40 = vld [vmem:[#allocation11 + $0x184] ss:$16 sps:$4 sm:$0xff]  }
 0x139   :  { %v232_v42 = vrot.slane %v231_v41, 2 }
 0x13b   :  { %v233_v43 = vadd.f32 %v232_v42, %v231_v41  ;;  %v7979_v41 = vld [vmem:[#allocation11 + $0x180] ss:$16 sps:$4 sm:$0xff]   ;;  %v7982_v42 = vld [vmem:[#allocation11 + $0x188] ss:$16 sps:$4 sm:$0xff]  }
 0x13d   :  { %v234_v44 = vrot.slane %v233_v43, 1 }
 0x13f   :  { %v235_v45 = vadd.f32 %v234_v44, %v233_v43  ;;  %v7984_v43 = vld [vmem:[#allocation11 + $0x18c] ss:$16 sps:$4 sm:$0xff]   ;;  %v7987_v44 = vld [vmem:[#allocation11 + $0x164] ss:$16 sps:$4 sm:$0xff]  }
 0x141   :  { %v236_v46 = vmul.f32 0.125, %v235_v45  ;;  %v7990_v45 = vld [vmem:[#allocation11 + $0x16c] ss:$16 sps:$4 sm:$0xff]  }
 0x143   :  { %v237_v47 = vadd.f32 1e-05, %v236_v46  ;;  %v7985_v46 = vld [vmem:[#allocation11 + $0x160] ss:$16 sps:$4 sm:$0xff]  }
 0x145   :  { %8009 = vrsqrt.f32 %v237_v47  ;;  %v7988_v47 = vld [vmem:[#allocation11 + $0x168] ss:$16 sps:$4 sm:$0xff]  }
 0x152   :  { %v8010_v49 = vpop.eup %8009 }
 0x153   :  { %v239_v50 = vmul.f32 %v8010_v49, %v218_v48  ;;  %v7993_v48 = vld [vmem:[#allocation11 + $0x144] ss:$16 sps:$4 sm:$0xff]   ;;  %v7996_v49 = vld [vmem:[#allocation11 + $0x14c] ss:$16 sps:$4 sm:$0xff]  }
 0x155   :  { %v240_v52 = vmul.f32 %v239_v50, %v228_v38  ;;  %v7973_v38 = vld [vmem:[#allocation11 + $0x1a0] ss:$16 sps:$4 sm:$0xff]  }
 0x156   :  { %887 = vmatpush2.bf16.msra.mxu0 %v7973_v38  ;;  %v7991_v50 = vld [vmem:[#allocation11 + $0x140] ss:$16 sps:$4 sm:$0xff]   ;;  %v8986_v38 = vshrl.u32 %v431_v36, 7 }
 0x157   :  { %v241_v53 = vadd.f32 %v240_v52, %v219_v51  ;;  %888 = vmatprep.subr.bf16.mxu0 %v7981_v40  ;;  %v7994_v51 = vld [vmem:[#allocation11 + $0x148] ss:$16 sps:$4 sm:$0xff]   ;;  %v7999_v52 = vld [vmem:[#allocation11 + $0x124] ss:$16 sps:$4 sm:$0xff]  }
 0x159   :  { %v243_v54 = vmul.f32 0.70710677, %v241_v53  ;;  %v242_v56 = vmul.f32 0.5, %v241_v53  ;;  %v8002_v53 = vld [vmem:[#allocation11 + $0x12c] ss:$16 sps:$4 sm:$0xff]  }
 0x15a   :  { %889 = vmatpush2.bf16.msra.mxu0 %v7979_v41 }
 0x15b   :  { %8011 = verf.f32 %v243_v54  ;;  %890 = vmatprep.subr.bf16.mxu0 %v7987_v44  ;;  %v7997_v54 = vld [vmem:[#allocation11 + $0x120] ss:$16 sps:$4 sm:$0xff]  }
 0x15c   :  { %v386_v44 = vld [vmem:[#allocation13 + $0x2] ss:$8 sm:$0x3] }
 0x15e   :  { %891 = vmatpush2.bf16.msra.mxu0 %v7985_v46  ;;  %v8994_v46 = vsub.s32 0, %v8986_v38 }
 0x15f   :  { %892 = vmatprep.subr.bf16.mxu0 %v7993_v48  ;;  %v388_v48 = vld [vmem:[#allocation13 + $0x3] ss:$8 sm:$0x3] }
 0x162   :  { %893 = vmatpush2.bf16.msra.mxu0 %v7991_v50 }
 0x163   :  { %894 = vmatprep.subr.bf16.mxu0 %v7999_v52  ;;  %v461_v52 = vrot.slane %v388_v48, %v8994_v46 }
 0x166   :  { %895 = vmatpush2.bf16.msra.mxu0 %v7997_v54 }
 0x168   :  { %v8012_v55 = vpop.eup %8011 }
 0x169   :  { %v245_v57 = vadd.f32 1.0, %v8012_v55  ;;  %v8000_v55 = vld [vmem:[#allocation11 + $0x128] ss:$16 sps:$4 sm:$0xff]  }
 0x16b   :  { %v246_v58 = vmul.f32 %v245_v57, %v242_v56  ;;  %v8005_v56 = vld [vmem:[#allocation11 + $0x104] ss:$16 sps:$4 sm:$0xff]   ;;  %v8008_v57 = vld [vmem:[#allocation11 + $0x10c] ss:$16 sps:$4 sm:$0xff]  }
 0x16c   :  { %896 = vmatprep.subr.bf16.mxu0 %v8005_v56 }
 0x16d   :  { %v247_v59 = vpack.c.bf16 %v246_v58, %v246_v58  ;;  %v8003_v58 = vld [vmem:[#allocation11 + $0x100] ss:$16 sps:$4 sm:$0xff]  }
 0x16e   :  { %897 = vmatpush2.bf16.msra.mxu0 %v8003_v58 }
 0x16f   :  { %377 = vmatmul.mubr.bf16.vlgmr.msra.gmra.mxu1 %v247_v59  ;;  %v8006_v59 = vld [vmem:[#allocation11 + $0x108] ss:$16 sps:$4 sm:$0xff]  }
 0x170   :  { %908 = vmatpush1.bf16.msra.mxu1 %v7916_v63 }
 0x171   :  { %909 = vmatprep.subr.bf16.mxu1 %v7924_v1 }
 0x174   :  { %910 = vmatpush1.bf16.msra.mxu1 %v7922_v3 }
 0x175   :  { %911 = vmatprep.subr.bf16.mxu1 %v7930_v5 }
 0x178   :  { %912 = vmatpush1.bf16.msra.mxu1 %v7928_v7 }
 0x179   :  { %913 = vmatprep.subr.bf16.mxu1 %v7936_v9 }
 0x17c   :  { %914 = vmatpush1.bf16.msra.mxu1 %v7934_v11 }
 0x17d   :  { %915 = vmatprep.subr.bf16.mxu1 %v7942_v13 }
 0x180   :  { %916 = vmatpush1.bf16.msra.mxu1 %v7940_v15 }
 0x181   :  { %917 = vmatprep.subr.bf16.mxu1 %v7948_v17 }
 0x184   :  { %918 = vmatpush1.bf16.msra.mxu1 %v7946_v19 }
 0x185   :  { %919 = vmatprep.subr.bf16.mxu1 %v7954_v21 }
 0x188   :  { %920 = vmatpush1.bf16.msra.mxu1 %v7952_v23 }
 0x189   :  { %921 = vmatprep.subr.bf16.mxu1 %v7960_v25 }
 0x18c   :  { %922 = vmatpush1.bf16.msra.mxu1 %v7958_v27 }
 0x18d   :  { %923 = vmatprep.subr.bf16.mxu1 %v7966_v29 }
 0x190   :  { %924 = vmatpush2.bf16.msra.mxu1 %v7964_v31 }
 0x191   :  { %925 = vmatprep.subr.bf16.mxu1 %v7972_v33 }
 0x194   :  { %926 = vmatpush2.bf16.msra.mxu1 %v7970_v35  ;;  %v429_v35 = vunpack.c.l.s4 %v8924_v34 }
 0x195   :  { %927 = vmatprep.subr.bf16.mxu1 %v7978_v37 }
 0x196   :  { %v430_v37 = vunpack.c.0.s8 %v429_v35 }
 0x198   :  { %928 = vmatpush2.bf16.msra.mxu1 %v7976_v39  ;;  %v8989_v40 = vsub.s32 %v430_v37, %v8986_v38 }
 0x199   :  { %929 = vmatprep.subr.bf16.mxu1 %v7984_v43 }
 0x19c   :  { %930 = vmatpush2.bf16.msra.mxu1 %v7982_v42 }
 0x19d   :  { %931 = vmatprep.subr.bf16.mxu1 %v7990_v45 }
 0x1a0   :  { %932 = vmatpush2.bf16.msra.mxu1 %v7988_v47  ;;  %v8997_v47 = vsub.s32 1, %v8986_v38 }
 0x1a1   :  { %933 = vmatprep.subr.bf16.mxu1 %v7996_v49 }
 0x1a4   :  { %934 = vmatpush2.bf16.msra.mxu1 %v7994_v51 }
 0x1a5   :  { %935 = vmatprep.subr.bf16.mxu1 %v8002_v53  ;;  %v465_v53 = vrot.slane %v388_v48, %v8997_v47 }
 0x1a8   :  { %936 = vmatpush2.bf16.msra.mxu1 %v8000_v55 }
 0x1a9   :  { %937 = vmatprep.subr.bf16.mxu1 %v8008_v57 }
 0x1ac   :  { %938 = vmatpush2.bf16.msra.mxu1 %v8006_v59 }
 0x22f   :  { %v378_v60 = vpop.f32.mrf.mxu1 }
 0x230   :  { %v389_v61 = vrot.slane %v378_v60, 4 }
 0x231   :  { %v380_v62 = vpop.f32.mrf.mxu1 }
 0x232   :  { %v390_v63 = vadd.f32 %v389_v61, %v378_v60  ;;  %v395_v0 = vrot.slane %v380_v62, 4 }
 0x233   :  { %v382_v1 = vpop.f32.mrf.mxu1 }
 0x234   :  { %v391_v2 = vrot.slane %v390_v63, 2  ;;  %v396_v3 = vadd.f32 %v395_v0, %v380_v62 }
 0x235   :  { %v383_v4 = vpop.f32.mrf.mxu1 }
 0x236   :  { %v392_v5 = vadd.f32 %v391_v2, %v390_v63  ;;  %v397_v6 = vrot.slane %v396_v3, 2 }
 0x238   :  { %v393_v7 = vrot.slane %v392_v5, 1  ;;  %v398_v8 = vadd.f32 %v397_v6, %v396_v3 }
 0x23a   :  { %v394_v9 = vadd.f32 %v393_v7, %v392_v5  ;;  %v399_v10 = vrot.slane %v398_v8, 1 }
 0x23c   :  { %v401_v11 = vmul.f32 0.125, %v394_v9  ;;  %v400_v12 = vadd.f32 %v399_v10, %v398_v8 }
 0x23e   :  { %v403_v13 = vsub.f32 %v378_v60, %v401_v11  ;;  %v402_v14 = vmul.f32 0.125, %v400_v12 }
 0x240   :  { %v405_v15 = vmul.f32 %v403_v13, %v403_v13  ;;  %v404_v16 = vsub.f32 %v380_v62, %v402_v14 }
 0x242   :  { %v407_v17 = vrot.slane %v405_v15, 4  ;;  %v406_v18 = vmul.f32 %v404_v16, %v404_v16 }
 0x244   :  { %v408_v19 = vadd.f32 %v407_v17, %v405_v15  ;;  %v413_v20 = vrot.slane %v406_v18, 4 }
 0x246   :  { %v409_v21 = vrot.slane %v408_v19, 2  ;;  %v414_v22 = vadd.f32 %v413_v20, %v406_v18 }
 0x248   :  { %v410_v23 = vadd.f32 %v409_v21, %v408_v19  ;;  %v415_v24 = vrot.slane %v414_v22, 2 }
 0x24a   :  { %v411_v25 = vrot.slane %v410_v23, 1  ;;  %v416_v26 = vadd.f32 %v415_v24, %v414_v22 }
 0x24c   :  { %v412_v27 = vadd.f32 %v411_v25, %v410_v23  ;;  %v417_v28 = vrot.slane %v416_v26, 1 }
 0x24e   :  { %v419_v29 = vmul.f32 0.125, %v412_v27  ;;  %v418_v30 = vadd.f32 %v417_v28, %v416_v26 }
 0x250   :  { %v421_v31 = vadd.f32 1e-05, %v419_v29  ;;  %v420_v32 = vmul.f32 0.125, %v418_v30 }
 0x252   :  { %v422_v33 = vadd.f32 1e-05, %v420_v32  ;;  %8013 = vrsqrt.f32 %v421_v31 }
 0x254   :  { %8015 = vrsqrt.f32 %v422_v33 }
 0x25f   :  { %v8014_v39 = vpop.eup %8013 }
 0x261   :  { %v8016_v41 = vpop.eup %8015 }
 0x262   :  { %v427_v42 = vcombine.low %v8014_v39, %v8016_v41 }
 0x264   :  { %v434_v43 = vrot.slane %v427_v42, %v8989_v40 }
 0x266   :  { %v441_v45 = vrot.slane %v434_v43, %v8989_v40 }
 0x268   :  { %v443_v49 = vmul.f32 %v441_v45, %v386_v44 }
 0x26a   :  { %v448_v50 = vrot.slane %v443_v49, %v8994_v46  ;;  %v452_v51 = vrot.slane %v443_v49, %v8997_v47 }
 0x26c   :  { %v455_v54 = vmul.f32 %v448_v50, %v403_v13  ;;  %v456_v55 = vmul.f32 %v452_v51, %v404_v16 }
 0x26e   :  { %v469_v56 = vadd.f32 %v465_v53, %v456_v55  ;;  %v468_v57 = vadd.f32 %v461_v52, %v455_v54 }
 0x270   :  { %v473_v58 = vmul.f32 0.70710677, %v469_v56  ;;  %v472_v59 = vmul.f32 0.70710677, %v468_v57  ;;  %v471_v62 = vmul.f32 0.5, %v469_v56  ;;  %v470_v0 = vmul.f32 0.5, %v468_v57 }
 0x272   :  { %8017 = verf.f32 %v473_v58 }
 0x273   :  { %8019 = verf.f32 %v472_v59 }
 0x27f   :  { %v8018_v60 = vpop.eup %8017 }
 0x280   :  { %v8020_v61 = vpop.eup %8019  ;;  %v477_v63 = vadd.f32 1.0, %v8018_v60 }
 0x281   :  { %v476_v1 = vadd.f32 1.0, %v8020_v61 }
 0x282   :  { %v479_v2 = vmul.f32 %v477_v63, %v471_v62 }
 0x283   :  { %v478_v3 = vmul.f32 %v476_v1, %v470_v0 }
 0x284   :  { %v481_v4 = vpack.c.bf16 %v479_v2, %v479_v2 }
 0x285   :  { %v480_v5 = vpack.c.bf16 %v478_v3, %v478_v3 }
 0x286   :  { %898 = vmatprep.mubr.bf16.mxu0 %v481_v4  ;;  %939 = vmatprep.mubr.bf16.mxu1 %v481_v4 }
 0x287   :  { %899 = vmatmul.mubr.bf16.vlgmr.msra.gmra.mxu0 %v480_v5  ;;  %940 = vmatmul.mubr.bf16.vlgmr.msra.gmra.mxu1 %v480_v5 }
 0x288   :  { %8856 = shalt.err (!%p8853_p1)  }
 0x289   :  { %100 = dma.hbm_to_vmem [thread:$0]  %s9244_s4, 32768, %s98_s6, [#allocation4] }
 0x28a   :  { %s8865_s12 = scalar_lea.vmem %s110_s8, 57344  ;;  %p8870_p3 = scmp.lt.s32.totalorder %s110_s8, %s110_s8 }
 0x28b   :  { %p8866_p2 = scmp.ne.s32.totalorder %s110_s8, %s8865_s12  ;;  %p8871_p4 = scmp.lt.s32.totalorder %s8865_s12, %s8865_s12 }
 0x28d   :  { %p8872_p5 = por %p8871_p4, %p8870_p3 }
 0x28f   :  { %p8873_p6 = pnand %p8872_p5, %p8866_p2 }
 0x291   :  { %8876 = shalt.err (!%p8873_p6)  }
 0x292   :  { %112 = dma.hbm_to_vmem [thread:$0]  %s9245_s5, 57344, %s110_s8, [#allocation4 + $0x1] }
 0x347   :  { %v900_v6 = vpop.f32.mrf.mxu0  ;;  %v941_v7 = vpop.f32.mrf.mxu1 }
 0x348   :  { %v952_v8 = vrot.slane %v900_v6, 4  ;;  %v964_v9 = vrot.slane %v941_v7, 4 }
 0x349   :  { %v902_v10 = vpop.f32.mrf.mxu0  ;;  %v943_v11 = vpop.f32.mrf.mxu1 }
 0x34a   :  { %v953_v12 = vadd.f32 %v952_v8, %v900_v6  ;;  %v965_v13 = vadd.f32 %v964_v9, %v941_v7  ;;  %v958_v14 = vrot.slane %v902_v10, 4  ;;  %v970_v15 = vrot.slane %v943_v11, 4 }
 0x34b   :  { %v904_v16 = vpop.f32.mrf.mxu0  ;;  %v945_v17 = vpop.f32.mrf.mxu1 }
 0x34c   :  { %v954_v18 = vrot.slane %v953_v12, 2  ;;  %v966_v19 = vrot.slane %v965_v13, 2  ;;  %v959_v20 = vadd.f32 %v958_v14, %v902_v10  ;;  %v971_v21 = vadd.f32 %v970_v15, %v943_v11 }
 0x34d   :  { %v905_v22 = vpop.f32.mrf.mxu0  ;;  %v946_v23 = vpop.f32.mrf.mxu1 }
 0x34e   :  { %v955_v24 = vadd.f32 %v954_v18, %v953_v12  ;;  %v967_v25 = vadd.f32 %v966_v19, %v965_v13  ;;  %v960_v26 = vrot.slane %v959_v20, 2  ;;  %v972_v27 = vrot.slane %v971_v21, 2 }
 0x350   :  { %v956_v28 = vrot.slane %v955_v24, 1  ;;  %v968_v29 = vrot.slane %v967_v25, 1  ;;  %v961_v30 = vadd.f32 %v960_v26, %v959_v20  ;;  %v973_v31 = vadd.f32 %v972_v27, %v971_v21 }
 0x352   :  { %v957_v32 = vadd.f32 %v956_v28, %v955_v24  ;;  %v969_v33 = vadd.f32 %v968_v29, %v967_v25  ;;  %v962_v34 = vrot.slane %v961_v30, 1  ;;  %v974_v35 = vrot.slane %v973_v31, 1 }
 0x354   :  { %v976_v36 = vmul.f32 0.125, %v957_v32  ;;  %v978_v37 = vmul.f32 0.125, %v969_v33  ;;  %v963_v39 = vadd.f32 %v962_v34, %v961_v30  ;;  %v975_v41 = vadd.f32 %v974_v35, %v973_v31  ;;  %v949_v31 = vld [vmem:[#allocation13 + $0x4] ss:$8 sm:$0xf] }
 0x355   :  { %v951_v32 = vld [vmem:[#allocation13 + $0x5] ss:$8 sm:$0xf]  ;;  %v9029_v34 = vsub.s32 2, %v8986_v38  ;;  %v9032_v35 = vsub.s32 3, %v8986_v38 }
 0x356   :  { %v9009_v42 = vsub.f32 %v900_v6, %v976_v36  ;;  %v9011_v43 = vsub.f32 %v941_v7, %v978_v37  ;;  %v977_v44 = vmul.f32 0.125, %v963_v39  ;;  %v979_v45 = vmul.f32 0.125, %v975_v41 }
 0x357   :  { %v1083_v37 = vrot.slane %v951_v32, %v8994_v46  ;;  %v1087_v39 = vrot.slane %v951_v32, %v8997_v47  ;;  %v1091_v41 = vrot.slane %v951_v32, %v9029_v34 }
 0x358   :  { %v984_v48 = vmul.f32 %v9009_v42, %v9009_v42  ;;  %v986_v49 = vmul.f32 %v9011_v43, %v9011_v43  ;;  %v9017_v50 = vsub.f32 %v902_v10, %v977_v44  ;;  %v9019_v51 = vsub.f32 %v943_v11, %v979_v45 }
 0x359   :  { %v1095_v44 = vrot.slane %v951_v32, %v9032_v35 }
 0x35a   :  { %v988_v52 = vrot.slane %v984_v48, 4  ;;  %v1000_v53 = vrot.slane %v986_v49, 4  ;;  %v985_v54 = vmul.f32 %v9017_v50, %v9017_v50  ;;  %v987_v55 = vmul.f32 %v9019_v51, %v9019_v51 }
 0x35c   :  { %v989_v56 = vadd.f32 %v988_v52, %v984_v48  ;;  %v1001_v57 = vadd.f32 %v1000_v53, %v986_v49  ;;  %v994_v58 = vrot.slane %v985_v54, 4  ;;  %v1006_v59 = vrot.slane %v987_v55, 4 }
 0x35e   :  { %v990_v60 = vrot.slane %v989_v56, 2  ;;  %v1002_v61 = vrot.slane %v1001_v57, 2  ;;  %v995_v62 = vadd.f32 %v994_v58, %v985_v54  ;;  %v1007_v63 = vadd.f32 %v1006_v59, %v987_v55 }
 0x360   :  { %v991_v0 = vadd.f32 %v990_v60, %v989_v56  ;;  %v1003_v1 = vadd.f32 %v1002_v61, %v1001_v57  ;;  %v996_v2 = vrot.slane %v995_v62, 2  ;;  %v1008_v3 = vrot.slane %v1007_v63, 2 }
 0x362   :  { %v992_v4 = vrot.slane %v991_v0, 1  ;;  %v1004_v5 = vrot.slane %v1003_v1, 1  ;;  %v997_v6 = vadd.f32 %v996_v2, %v995_v62  ;;  %v1009_v7 = vadd.f32 %v1008_v3, %v1007_v63 }
 0x364   :  { %v993_v8 = vadd.f32 %v992_v4, %v991_v0  ;;  %v1005_v9 = vadd.f32 %v1004_v5, %v1003_v1  ;;  %v998_v10 = vrot.slane %v997_v6, 1  ;;  %v1010_v11 = vrot.slane %v1009_v7, 1 }
 0x366   :  { %v1012_v12 = vmul.f32 0.125, %v993_v8  ;;  %v1014_v13 = vmul.f32 0.125, %v1005_v9  ;;  %v999_v14 = vadd.f32 %v998_v10, %v997_v6  ;;  %v1011_v15 = vadd.f32 %v1010_v11, %v1009_v7 }
 0x368   :  { %v1016_v16 = vadd.f32 1e-05, %v1012_v12  ;;  %v1018_v17 = vadd.f32 1e-05, %v1014_v13  ;;  %v1013_v18 = vmul.f32 0.125, %v999_v14  ;;  %v1015_v19 = vmul.f32 0.125, %v1011_v15 }
 0x36a   :  { %8021 = vrsqrt.f32 %v1016_v16  ;;  %v1017_v20 = vadd.f32 1e-05, %v1013_v18  ;;  %v1019_v21 = vadd.f32 1e-05, %v1015_v19 }
 0x36b   :  { %8023 = vrsqrt.f32 %v1018_v17 }
 0x36c   :  { %8025 = vrsqrt.f32 %v1017_v20 }
 0x36d   :  { %8027 = vrsqrt.f32 %v1019_v21 }
 0x377   :  { %v8022_v22 = vpop.eup %8021 }
 0x378   :  { %v8024_v23 = vpop.eup %8023 }
 0x379   :  { %v8026_v24 = vpop.eup %8025 }
 0x37a   :  { %v8028_v25 = vpop.eup %8027  ;;  %v1028_v26 = vcombine.low %v8022_v22, %v8026_v24 }
 0x37b   :  { %v1029_v27 = vcombine.low %v8024_v23, %v8028_v25 }
 0x37c   :  { %v1036_v28 = vrot.slane %v1028_v26, %v8989_v40 }
 0x37d   :  { %v1043_v29 = vrot.slane %v1029_v27, %v8989_v40 }
 0x37f   :  { %v1044_v30 = vcombine.low %v1036_v28, %v1043_v29 }
 0x381   :  { %v1051_v33 = vrot.slane %v1044_v30, %v8989_v40 }
 0x383   :  { %v1053_v36 = vmul.f32 %v1051_v33, %v949_v31 }
 0x385   :  { %v1058_v45 = vrot.slane %v1053_v36, %v8994_v46  ;;  %v1062_v48 = vrot.slane %v1053_v36, %v8997_v47  ;;  %v1066_v49 = vrot.slane %v1053_v36, %v9029_v34  ;;  %v1070_v52 = vrot.slane %v1053_v36, %v9032_v35 }
 0x387   :  { %v1075_v53 = vmul.f32 %v1058_v45, %v9009_v42  ;;  %v1076_v54 = vmul.f32 %v1062_v48, %v9017_v50  ;;  %v1077_v55 = vmul.f32 %v1066_v49, %v9011_v43  ;;  %v1078_v56 = vmul.f32 %v1070_v52, %v9019_v51 }
 0x389   :  { %v1100_v57 = vadd.f32 %v1083_v37, %v1075_v53  ;;  %v1101_v58 = vadd.f32 %v1087_v39, %v1076_v54  ;;  %v1102_v59 = vadd.f32 %v1091_v41, %v1077_v55  ;;  %v1103_v60 = vadd.f32 %v1095_v44, %v1078_v56 }
 0x38b   :  { %v1108_v61 = vmul.f32 0.70710677, %v1100_v57  ;;  %v1109_v62 = vmul.f32 0.70710677, %v1101_v58  ;;  %v1110_v63 = vmul.f32 0.70710677, %v1102_v59 }
 0x38c   :  { %v1111_v0 = vmul.f32 0.70710677, %v1103_v60  ;;  %v1104_v2 = vmul.f32 0.5, %v1100_v57  ;;  %v1105_v43 = vmul.f32 0.5, %v1101_v58  ;;  %v1106_v5 = vmul.f32 0.5, %v1102_v59 }
 0x38d   :  { %8029 = verf.f32 %v1108_v61  ;;  %v1107_v8 = vmul.f32 0.5, %v1103_v60 }
 0x38e   :  { %8031 = verf.f32 %v1109_v62 }
 0x38f   :  { %8033 = verf.f32 %v1110_v63 }
 0x390   :  { %8035 = verf.f32 %v1111_v0 }
 0x39a   :  { %v8030_v1 = vpop.eup %8029 }
 0x39b   :  { %v8032_v42 = vpop.eup %8031  ;;  %v1116_v50 = vadd.f32 1.0, %v8030_v1 }
 0x39c   :  { %v8034_v3 = vpop.eup %8033  ;;  %v1117_v4 = vadd.f32 1.0, %v8032_v42 }
 0x39d   :  { %v8036_v51 = vpop.eup %8035  ;;  %v1118_v6 = vadd.f32 1.0, %v8034_v3  ;;  %v1120_v7 = vmul.f32 %v1116_v50, %v1104_v2 }
 0x39e   :  { %v1119_v9 = vadd.f32 1.0, %v8036_v51  ;;  %v1121_v10 = vmul.f32 %v1117_v4, %v1105_v43 }
 0x39f   :  { %v1122_v11 = vmul.f32 %v1118_v6, %v1106_v5  ;;  %v9046_v12 = vpack.c.bf16 %v1120_v7, %v1120_v7 }
 0x3a0   :  { %v1123_v13 = vmul.f32 %v1119_v9, %v1107_v8  ;;  %v9048_v14 = vpack.c.bf16 %v1121_v10, %v1121_v10 }
 0x3a1   :  { %v9050_v15 = vpack.c.bf16 %v1122_v11, %v1122_v11 }
 0x3a2   :  { %v9052_v16 = vpack.c.bf16 %v1123_v13, %v1123_v13 }
 0x3a3   :  { %8903 = dma.done.wait [#allocation4], 32768 }
 0x3a4   :  { %8904 = vsyncadd [#allocation4], 4294934528  ;;  %2700 = vmatprep.mubr.bf16.mxu0 %v9048_v14  ;;  %2741 = vmatprep.mubr.bf16.mxu1 %v9052_v16  ;;  %v1188_v17 = vld [vmem:[#allocation2 + $0x1c0] sm:$0xff] }
 0x3a5   :  { %v1192_v18 = vld [vmem:[#allocation2 + $0x1e0] sm:$0xff] }
 0x3a6   :  { %v1316_v19 = vld [vmem:[#allocation2 + $0x5c0] sm:$0xff]  ;;  %v7089_v20 = vcombine.high %v1188_v17, %v1192_v18  ;;  %v7088_v22 = vcombine.low %v1188_v17, %v1192_v18 }
 0x3a7   :  { %v1320_v21 = vld [vmem:[#allocation2 + $0x5e0] sm:$0xff] }
 0x3a8   :  { %v1180_v23 = vld [vmem:[#allocation2 + $0x180] sm:$0xff]  ;;  %v7217_v25 = vcombine.high %v1316_v19, %v1320_v21  ;;  %v7216_v26 = vcombine.low %v1316_v19, %v1320_v21  ;;  %2668 = vmatprep.subr.bf16.mxu0 %v7089_v20 }
 0x3a9   :  { %v1184_v24 = vld [vmem:[#allocation2 + $0x1a0] sm:$0xff]  ;;  %2669 = vmatpush1.bf16.msra.mxu0 %v7088_v22 }
 0x3aa   :  { %v7081_v27 = vcombine.high %v1180_v23, %v1184_v24  ;;  %v1308_v28 = vld [vmem:[#allocation2 + $0x580] sm:$0xff]  ;;  %2709 = vmatprep.subr.bf16.mxu1 %v7217_v25  ;;  %v7080_v37 = vcombine.low %v1180_v23, %v1184_v24 }
 0x3ab   :  { %v1312_v29 = vld [vmem:[#allocation2 + $0x5a0] sm:$0xff]  ;;  %2710 = vmatpush1.bf16.msra.mxu1 %v7216_v26 }
 0x3ac   :  { %v1172_v30 = vld [vmem:[#allocation2 + $0x140] sm:$0xff]  ;;  %v7209_v31 = vcombine.high %v1308_v28, %v1312_v29  ;;  %2670 = vmatprep.subr.bf16.mxu0 %v7081_v27  ;;  %v7208_v39 = vcombine.low %v1308_v28, %v1312_v29 }
 0x3ad   :  { %v1176_v32 = vld [vmem:[#allocation2 + $0x160] sm:$0xff]  ;;  %2671 = vmatpush1.bf16.msra.mxu0 %v7080_v37 }
 0x3ae   :  { %v1300_v33 = vld [vmem:[#allocation2 + $0x540] sm:$0xff]  ;;  %v7073_v41 = vcombine.high %v1172_v30, %v1176_v32  ;;  %2711 = vmatprep.subr.bf16.mxu1 %v7209_v31  ;;  %v7072_v53 = vcombine.low %v1172_v30, %v1176_v32 }
 0x3af   :  { %v1304_v36 = vld [vmem:[#allocation2 + $0x560] sm:$0xff]  ;;  %2712 = vmatpush1.bf16.msra.mxu1 %v7208_v39 }
 0x3b0   :  { %v7201_v44 = vcombine.high %v1300_v33, %v1304_v36  ;;  %v1164_v45 = vld [vmem:[#allocation2 + $0x100] sm:$0xff]  ;;  %2672 = vmatprep.subr.bf16.mxu0 %v7073_v41  ;;  %v7200_v54 = vcombine.low %v1300_v33, %v1304_v36 }
 0x3b1   :  { %v1168_v48 = vld [vmem:[#allocation2 + $0x120] sm:$0xff]  ;;  %2673 = vmatpush1.bf16.msra.mxu0 %v7072_v53 }
 0x3b2   :  { %v1292_v49 = vld [vmem:[#allocation2 + $0x500] sm:$0xff]  ;;  %v7065_v55 = vcombine.high %v1164_v45, %v1168_v48  ;;  %2713 = vmatprep.subr.bf16.mxu1 %v7201_v44  ;;  %v7064_v61 = vcombine.low %v1164_v45, %v1168_v48 }
 0x3b3   :  { %v1296_v52 = vld [vmem:[#allocation2 + $0x520] sm:$0xff]  ;;  %2714 = vmatpush1.bf16.msra.mxu1 %v7200_v54 }
 0x3b4   :  { %v7193_v56 = vcombine.high %v1292_v49, %v1296_v52  ;;  %v1156_v57 = vld [vmem:[#allocation2 + $0xc0] sm:$0xff]  ;;  %2674 = vmatprep.subr.bf16.mxu0 %v7065_v55  ;;  %v7192_v62 = vcombine.low %v1292_v49, %v1296_v52 }
 0x3b5   :  { %v1160_v58 = vld [vmem:[#allocation2 + $0xe0] sm:$0xff]  ;;  %2675 = vmatpush1.bf16.msra.mxu0 %v7064_v61 }
 0x3b6   :  { %v1284_v59 = vld [vmem:[#allocation2 + $0x4c0] sm:$0xff]  ;;  %v7057_v63 = vcombine.high %v1156_v57, %v1160_v58  ;;  %2715 = vmatprep.subr.bf16.mxu1 %v7193_v56  ;;  %v7056_v3 = vcombine.low %v1156_v57, %v1160_v58 }
 0x3b7   :  { %v1288_v60 = vld [vmem:[#allocation2 + $0x4e0] sm:$0xff]  ;;  %2716 = vmatpush1.bf16.msra.mxu1 %v7192_v62 }
 0x3b8   :  { %v7185_v0 = vcombine.high %v1284_v59, %v1288_v60  ;;  %v1148_v1 = vld [vmem:[#allocation2 + $0x80] sm:$0xff]  ;;  %2676 = vmatprep.subr.bf16.mxu0 %v7057_v63  ;;  %v7184_v43 = vcombine.low %v1284_v59, %v1288_v60 }
 0x3b9   :  { %v1152_v42 = vld [vmem:[#allocation2 + $0xa0] sm:$0xff]  ;;  %2677 = vmatpush1.bf16.msra.mxu0 %v7056_v3 }
 0x3ba   :  { %v1276_v2 = vld [vmem:[#allocation2 + $0x480] sm:$0xff]  ;;  %v7049_v4 = vcombine.high %v1148_v1, %v1152_v42  ;;  %2717 = vmatprep.subr.bf16.mxu1 %v7185_v0  ;;  %v7048_v9 = vcombine.low %v1148_v1, %v1152_v42 }
 0x3bb   :  { %v1280_v50 = vld [vmem:[#allocation2 + $0x4a0] sm:$0xff]  ;;  %2718 = vmatpush1.bf16.msra.mxu1 %v7184_v43 }
 0x3bc   :  { %v7177_v51 = vcombine.high %v1276_v2, %v1280_v50  ;;  %v1140_v5 = vld [vmem:[#allocation2 + $0x40] sm:$0xff]  ;;  %2678 = vmatprep.subr.bf16.mxu0 %v7049_v4  ;;  %v7176_v10 = vcombine.low %v1276_v2, %v1280_v50 }
 0x3bd   :  { %v1144_v6 = vld [vmem:[#allocation2 + $0x60] sm:$0xff]  ;;  %2679 = vmatpush1.bf16.msra.mxu0 %v7048_v9 }
 0x3be   :  { %v1268_v7 = vld [vmem:[#allocation2 + $0x440] sm:$0xff]  ;;  %v7041_v11 = vcombine.high %v1140_v5, %v1144_v6  ;;  %2719 = vmatprep.subr.bf16.mxu1 %v7177_v51  ;;  %v7040_v21 = vcombine.low %v1140_v5, %v1144_v6 }
 0x3bf   :  { %v1272_v8 = vld [vmem:[#allocation2 + $0x460] sm:$0xff]  ;;  %2720 = vmatpush1.bf16.msra.mxu1 %v7176_v10 }
 0x3c0   :  { %v7169_v13 = vcombine.high %v1268_v7, %v1272_v8  ;;  %v1132_v17 = vld [vmem:[#allocation2] sm:$0xff]  ;;  %2680 = vmatprep.subr.bf16.mxu0 %v7041_v11  ;;  %v7168_v22 = vcombine.low %v1268_v7, %v1272_v8 }
 0x3c1   :  { %v1136_v18 = vld [vmem:[#allocation2 + $0x20] sm:$0xff]  ;;  %2681 = vmatpush1.bf16.msra.mxu0 %v7040_v21 }
 0x3c2   :  { %v1260_v19 = vld [vmem:[#allocation2 + $0x400] sm:$0xff]  ;;  %v7033_v23 = vcombine.high %v1132_v17, %v1136_v18  ;;  %2721 = vmatprep.subr.bf16.mxu1 %v7169_v13  ;;  %v7032_v29 = vcombine.low %v1132_v17, %v1136_v18 }
 0x3c3   :  { %v1264_v20 = vld [vmem:[#allocation2 + $0x420] sm:$0xff]  ;;  %2722 = vmatpush1.bf16.msra.mxu1 %v7168_v22 }
 0x3c4   :  { %v7161_v24 = vcombine.high %v1260_v19, %v1264_v20  ;;  %v1252_v25 = vld [vmem:[#allocation2 + $0x3c0] sm:$0xff]  ;;  %2682 = vmatprep.subr.bf16.mxu0 %v7033_v23  ;;  %v7160_v30 = vcombine.low %v1260_v19, %v1264_v20 }
 0x3c5   :  { %v1256_v26 = vld [vmem:[#allocation2 + $0x3e0] sm:$0xff]  ;;  %2683 = vmatpush1.bf16.msra.mxu0 %v7032_v29 }
 0x3c6   :  { %v1380_v27 = vld [vmem:[#allocation2 + $0x7c0] sm:$0xff]  ;;  %v7153_v31 = vcombine.high %v1252_v25, %v1256_v26  ;;  %2723 = vmatprep.subr.bf16.mxu1 %v7161_v24  ;;  %v7152_v41 = vcombine.low %v1252_v25, %v1256_v26 }
 0x3c7   :  { %v1384_v28 = vld [vmem:[#allocation2 + $0x7e0] sm:$0xff]  ;;  %2724 = vmatpush1.bf16.msra.mxu1 %v7160_v30 }
 0x3c8   :  { %v7281_v32 = vcombine.high %v1380_v27, %v1384_v28  ;;  %v1244_v33 = vld [vmem:[#allocation2 + $0x380] sm:$0xff]  ;;  %2684 = vmatprep.subr.bf16.mxu0 %v7153_v31  ;;  %v7280_v44 = vcombine.low %v1380_v27, %v1384_v28 }
 0x3c9   :  { %v1248_v36 = vld [vmem:[#allocation2 + $0x3a0] sm:$0xff]  ;;  %2685 = vmatpush2.bf16.msra.mxu0 %v7152_v41  ;;  %v1317_v41 = vld [vmem:[#allocation2 + $0x5c8] sm:$0xff] }
 0x3ca   :  { %v1372_v37 = vld [vmem:[#allocation2 + $0x780] sm:$0xff]  ;;  %v7145_v45 = vcombine.high %v1244_v33, %v1248_v36  ;;  %2725 = vmatprep.subr.bf16.mxu1 %v7281_v32  ;;  %v7144_v55 = vcombine.low %v1244_v33, %v1248_v36 }
 0x3cb   :  { %v1376_v39 = vld [vmem:[#allocation2 + $0x7a0] sm:$0xff]  ;;  %2726 = vmatpush2.bf16.msra.mxu1 %v7280_v44  ;;  %v1321_v44 = vld [vmem:[#allocation2 + $0x5e8] sm:$0xff] }
 0x3cc   :  { %v7273_v48 = vcombine.high %v1372_v37, %v1376_v39  ;;  %v1236_v49 = vld [vmem:[#allocation2 + $0x340] sm:$0xff]  ;;  %2686 = vmatprep.subr.bf16.mxu0 %v7145_v45  ;;  %v7272_v56 = vcombine.low %v1372_v37, %v1376_v39  ;;  %v1189_v37 = vld [vmem:[#allocation2 + $0x1c8] sm:$0xff] }
 0x3cd   :  { %v1240_v52 = vld [vmem:[#allocation2 + $0x360] sm:$0xff]  ;;  %2687 = vmatpush2.bf16.msra.mxu0 %v7144_v55  ;;  %v1193_v39 = vld [vmem:[#allocation2 + $0x1e8] sm:$0xff] }
 0x3ce   :  { %v1364_v53 = vld [vmem:[#allocation2 + $0x740] sm:$0xff]  ;;  %v7137_v57 = vcombine.high %v1236_v49, %v1240_v52  ;;  %2727 = vmatprep.subr.bf16.mxu1 %v7273_v48  ;;  %v7136_v63 = vcombine.low %v1236_v49, %v1240_v52  ;;  %v7091_v49 = vcombine.high %v1189_v37, %v1193_v39  ;;  %v7219_v52 = vcombine.high %v1317_v41, %v1321_v44  ;;  %v1309_v55 = vld [vmem:[#allocation2 + $0x588] sm:$0xff] }
 0x3cf   :  { %v1368_v54 = vld [vmem:[#allocation2 + $0x760] sm:$0xff]  ;;  %2728 = vmatpush2.bf16.msra.mxu1 %v7272_v56  ;;  %v1313_v56 = vld [vmem:[#allocation2 + $0x5a8] sm:$0xff] }
 0x3d0   :  { %v7265_v58 = vcombine.high %v1364_v53, %v1368_v54  ;;  %v1228_v59 = vld [vmem:[#allocation2 + $0x300] sm:$0xff]  ;;  %2688 = vmatprep.subr.bf16.mxu0 %v7137_v57  ;;  %v7264_v0 = vcombine.low %v1364_v53, %v1368_v54  ;;  %v1181_v53 = vld [vmem:[#allocation2 + $0x188] sm:$0xff]  ;;  %v7090_v57 = vcombine.low %v1189_v37, %v1193_v39 }
 0x3d1   :  { %v1232_v60 = vld [vmem:[#allocation2 + $0x320] sm:$0xff]  ;;  %2689 = vmatpush2.bf16.msra.mxu0 %v7136_v63  ;;  %v1185_v54 = vld [vmem:[#allocation2 + $0x1a8] sm:$0xff] }
 0x3d2   :  { %v1356_v61 = vld [vmem:[#allocation2 + $0x700] sm:$0xff]  ;;  %v7129_v1 = vcombine.high %v1228_v59, %v1232_v60  ;;  %2729 = vmatprep.subr.bf16.mxu1 %v7265_v58  ;;  %v7128_v4 = vcombine.low %v1228_v59, %v1232_v60  ;;  %v7218_v58 = vcombine.low %v1317_v41, %v1321_v44  ;;  %v7083_v59 = vcombine.high %v1181_v53, %v1185_v54  ;;  %v1301_v63 = vld [vmem:[#allocation2 + $0x548] sm:$0xff] }
 0x3d3   :  { %v1360_v62 = vld [vmem:[#allocation2 + $0x720] sm:$0xff]  ;;  %2730 = vmatpush2.bf16.msra.mxu1 %v7264_v0  ;;  %v7211_v60 = vcombine.high %v1309_v55, %v1313_v56  ;;  %v1305_v0 = vld [vmem:[#allocation2 + $0x568] sm:$0xff] }
 0x3d4   :  { %v7257_v42 = vcombine.high %v1356_v61, %v1360_v62  ;;  %v1220_v2 = vld [vmem:[#allocation2 + $0x2c0] sm:$0xff]  ;;  %2690 = vmatprep.subr.bf16.mxu0 %v7129_v1  ;;  %v7256_v51 = vcombine.low %v1356_v61, %v1360_v62  ;;  %v1173_v61 = vld [vmem:[#allocation2 + $0x148] sm:$0xff]  ;;  %v7082_v1 = vcombine.low %v1181_v53, %v1185_v54 }
 0x3d5   :  { %v1224_v50 = vld [vmem:[#allocation2 + $0x2e0] sm:$0xff]  ;;  %2691 = vmatpush2.bf16.msra.mxu0 %v7128_v4  ;;  %v1177_v62 = vld [vmem:[#allocation2 + $0x168] sm:$0xff] }
 0x3d6   :  { %v1348_v3 = vld [vmem:[#allocation2 + $0x6c0] sm:$0xff]  ;;  %v7121_v5 = vcombine.high %v1220_v2, %v1224_v50  ;;  %2731 = vmatprep.subr.bf16.mxu1 %v7257_v42  ;;  %v7120_v11 = vcombine.low %v1220_v2, %v1224_v50  ;;  %v7210_v42 = vcombine.low %v1309_v55, %v1313_v56  ;;  %v7075_v2 = vcombine.high %v1173_v61, %v1177_v62  ;;  %v1293_v4 = vld [vmem:[#allocation2 + $0x508] sm:$0xff] }
 0x3d7   :  { %v1352_v43 = vld [vmem:[#allocation2 + $0x6e0] sm:$0xff]  ;;  %2732 = vmatpush2.bf16.msra.mxu1 %v7256_v51  ;;  %v7203_v50 = vcombine.high %v1301_v63, %v1305_v0  ;;  %v1297_v51 = vld [vmem:[#allocation2 + $0x528] sm:$0xff] }
 0x3d8   :  { %v7249_v6 = vcombine.high %v1348_v3, %v1352_v43  ;;  %v1212_v7 = vld [vmem:[#allocation2 + $0x280] sm:$0xff]  ;;  %2692 = vmatprep.subr.bf16.mxu0 %v7121_v5  ;;  %v7248_v13 = vcombine.low %v1348_v3, %v1352_v43  ;;  %v1165_v3 = vld [vmem:[#allocation2 + $0x108] sm:$0xff]  ;;  %v7074_v5 = vcombine.low %v1173_v61, %v1177_v62 }
 0x3d9   :  { %v1216_v8 = vld [vmem:[#allocation2 + $0x2a0] sm:$0xff]  ;;  %2693 = vmatpush2.bf16.msra.mxu0 %v7120_v11  ;;  %v1169_v43 = vld [vmem:[#allocation2 + $0x128] sm:$0xff] }
 0x3da   :  { %v1340_v9 = vld [vmem:[#allocation2 + $0x680] sm:$0xff]  ;;  %v7113_v17 = vcombine.high %v1212_v7, %v1216_v8  ;;  %2733 = vmatprep.subr.bf16.mxu1 %v7249_v6  ;;  %v7112_v23 = vcombine.low %v1212_v7, %v1216_v8  ;;  %v7202_v6 = vcombine.low %v1301_v63, %v1305_v0  ;;  %v7067_v7 = vcombine.high %v1165_v3, %v1169_v43  ;;  %v1285_v11 = vld [vmem:[#allocation2 + $0x4c8] sm:$0xff] }
 0x3db   :  { %v1344_v10 = vld [vmem:[#allocation2 + $0x6a0] sm:$0xff]  ;;  %2734 = vmatpush2.bf16.msra.mxu1 %v7248_v13  ;;  %v7195_v8 = vcombine.high %v1293_v4, %v1297_v51  ;;  %v1289_v13 = vld [vmem:[#allocation2 + $0x4e8] sm:$0xff] }
 0x3dc   :  { %v7241_v18 = vcombine.high %v1340_v9, %v1344_v10  ;;  %v1204_v19 = vld [vmem:[#allocation2 + $0x240] sm:$0xff]  ;;  %2694 = vmatprep.subr.bf16.mxu0 %v7113_v17  ;;  %v7240_v24 = vcombine.low %v1340_v9, %v1344_v10  ;;  %v1157_v9 = vld [vmem:[#allocation2 + $0xc8] sm:$0xff]  ;;  %v7066_v17 = vcombine.low %v1165_v3, %v1169_v43 }
 0x3dd   :  { %v1208_v20 = vld [vmem:[#allocation2 + $0x260] sm:$0xff]  ;;  %2695 = vmatpush2.bf16.msra.mxu0 %v7112_v23  ;;  %v1161_v10 = vld [vmem:[#allocation2 + $0xe8] sm:$0xff] }
 0x3de   :  { %v1332_v21 = vld [vmem:[#allocation2 + $0x640] sm:$0xff]  ;;  %v7105_v25 = vcombine.high %v1204_v19, %v1208_v20  ;;  %2735 = vmatprep.subr.bf16.mxu1 %v7241_v18  ;;  %v7104_v31 = vcombine.low %v1204_v19, %v1208_v20  ;;  %v7194_v18 = vcombine.low %v1293_v4, %v1297_v51  ;;  %v7059_v19 = vcombine.high %v1157_v9, %v1161_v10  ;;  %v1277_v23 = vld [vmem:[#allocation2 + $0x488] sm:$0xff] }
 0x3df   :  { %v1336_v22 = vld [vmem:[#allocation2 + $0x660] sm:$0xff]  ;;  %2736 = vmatpush2.bf16.msra.mxu1 %v7240_v24  ;;  %v7187_v20 = vcombine.high %v1285_v11, %v1289_v13  ;;  %v1281_v24 = vld [vmem:[#allocation2 + $0x4a8] sm:$0xff] }
 0x3e0   :  { %v7233_v26 = vcombine.high %v1332_v21, %v1336_v22  ;;  %v1196_v27 = vld [vmem:[#allocation2 + $0x200] sm:$0xff]  ;;  %2696 = vmatprep.subr.bf16.mxu0 %v7105_v25  ;;  %v7232_v32 = vcombine.low %v1332_v21, %v1336_v22  ;;  %v1149_v21 = vld [vmem:[#allocation2 + $0x88] sm:$0xff]  ;;  %v7058_v25 = vcombine.low %v1157_v9, %v1161_v10 }
 0x3e1   :  { %v1200_v28 = vld [vmem:[#allocation2 + $0x220] sm:$0xff]  ;;  %2697 = vmatpush2.bf16.msra.mxu0 %v7104_v31  ;;  %v1153_v22 = vld [vmem:[#allocation2 + $0xa8] sm:$0xff] }
 0x3e2   :  { %v1324_v29 = vld [vmem:[#allocation2 + $0x600] sm:$0xff]  ;;  %v7097_v33 = vcombine.high %v1196_v27, %v1200_v28  ;;  %2737 = vmatprep.subr.bf16.mxu1 %v7233_v26  ;;  %v7096_v45 = vcombine.low %v1196_v27, %v1200_v28  ;;  %v7186_v26 = vcombine.low %v1285_v11, %v1289_v13  ;;  %v7051_v27 = vcombine.high %v1149_v21, %v1153_v22  ;;  %v1269_v31 = vld [vmem:[#allocation2 + $0x448] sm:$0xff] }
 0x3e3   :  { %v1328_v30 = vld [vmem:[#allocation2 + $0x620] sm:$0xff]  ;;  %2738 = vmatpush2.bf16.msra.mxu1 %v7232_v32  ;;  %v7179_v28 = vcombine.high %v1277_v23, %v1281_v24  ;;  %v1273_v32 = vld [vmem:[#allocation2 + $0x468] sm:$0xff] }
 0x3e4   :  { %v7225_v36 = vcombine.high %v1324_v29, %v1328_v30  ;;  %2698 = vmatprep.subr.bf16.mxu0 %v7097_v33  ;;  %v7224_v48 = vcombine.low %v1324_v29, %v1328_v30  ;;  %v1141_v29 = vld [vmem:[#allocation2 + $0x48] sm:$0xff]  ;;  %v7050_v33 = vcombine.low %v1149_v21, %v1153_v22  ;;  %v7171_v39 = vcombine.high %v1269_v31, %v1273_v32 }
 0x3e5   :  { %2699 = vmatpush2.bf16.msra.mxu0 %v7096_v45  ;;  %v1145_v30 = vld [vmem:[#allocation2 + $0x68] sm:$0xff] }
 0x3e6   :  { %2739 = vmatprep.subr.bf16.mxu1 %v7225_v36  ;;  %2750 = vmatprep.subr.bf16.mxu0 %v7091_v49  ;;  %v7178_v36 = vcombine.low %v1277_v23, %v1281_v24  ;;  %v7043_v37 = vcombine.high %v1141_v29, %v1145_v30  ;;  %v1133_v41 = vld [vmem:[#allocation2 + $0x8] sm:$0xff]  ;;  %v7042_v49 = vcombine.low %v1141_v29, %v1145_v30 }
 0x3e7   :  { %2740 = vmatpush2.bf16.msra.mxu1 %v7224_v48  ;;  %v1137_v44 = vld [vmem:[#allocation2 + $0x28] sm:$0xff] }
 0x3e8   :  { %2791 = vmatprep.subr.bf16.mxu1 %v7219_v52  ;;  %2701 = vmatmul.mubr.bf16.vlgmr.msra.gmra.mxu0 %v9046_v12  ;;  %v1261_v45 = vld [vmem:[#allocation2 + $0x408] sm:$0xff]  ;;  %v7170_v52 = vcombine.low %v1269_v31, %v1273_v32  ;;  %v7035_v53 = vcombine.high %v1133_v41, %v1137_v44 }
 0x3e9   :  { %2751 = vmatpush1.bf16.msra.mxu0 %v7090_v57  ;;  %2782 = vmatprep.mubr.bf16.mxu0 %v9048_v14  ;;  %v1265_v48 = vld [vmem:[#allocation2 + $0x428] sm:$0xff] }
 0x3ea   :  { %2742 = vmatmul.mubr.bf16.vlgmr.msra.gmra.mxu1 %v9050_v15  ;;  %2752 = vmatprep.subr.bf16.mxu0 %v7083_v59  ;;  %v7163_v54 = vcombine.high %v1261_v45, %v1265_v48  ;;  %v1253_v55 = vld [vmem:[#allocation2 + $0x3c8] sm:$0xff]  ;;  %v7034_v59 = vcombine.low %v1133_v41, %v1137_v44 }
 0x3eb   :  { %2792 = vmatpush1.bf16.msra.mxu1 %v7218_v58  ;;  %2823 = vmatprep.mubr.bf16.mxu1 %v9052_v16  ;;  %v1257_v56 = vld [vmem:[#allocation2 + $0x3e8] sm:$0xff] }
 0x3ec   :  { %2793 = vmatprep.subr.bf16.mxu1 %v7211_v60  ;;  %v1381_v57 = vld [vmem:[#allocation2 + $0x7c8] sm:$0xff]  ;;  %v7162_v60 = vcombine.low %v1261_v45, %v1265_v48  ;;  %v7155_v61 = vcombine.high %v1253_v55, %v1257_v56 }
 0x3ed   :  { %2753 = vmatpush1.bf16.msra.mxu0 %v7082_v1  ;;  %v1385_v58 = vld [vmem:[#allocation2 + $0x7e8] sm:$0xff] }
 0x3ee   :  { %2754 = vmatprep.subr.bf16.mxu0 %v7075_v2  ;;  %v7283_v62 = vcombine.high %v1381_v57, %v1385_v58  ;;  %v1245_v63 = vld [vmem:[#allocation2 + $0x388] sm:$0xff]  ;;  %v7154_v2 = vcombine.low %v1253_v55, %v1257_v56 }
 0x3ef   :  { %2794 = vmatpush1.bf16.msra.mxu1 %v7210_v42  ;;  %v1249_v0 = vld [vmem:[#allocation2 + $0x3a8] sm:$0xff] }
 0x3f0   :  { %2795 = vmatprep.subr.bf16.mxu1 %v7203_v50  ;;  %v1373_v1 = vld [vmem:[#allocation2 + $0x788] sm:$0xff]  ;;  %v7282_v50 = vcombine.low %v1381_v57, %v1385_v58  ;;  %v7147_v3 = vcombine.high %v1245_v63, %v1249_v0 }
 0x3f1   :  { %2755 = vmatpush1.bf16.msra.mxu0 %v7074_v5  ;;  %v1377_v42 = vld [vmem:[#allocation2 + $0x7a8] sm:$0xff] }
 0x3f2   :  { %2756 = vmatprep.subr.bf16.mxu0 %v7067_v7  ;;  %v7275_v43 = vcombine.high %v1373_v1, %v1377_v42  ;;  %v1237_v4 = vld [vmem:[#allocation2 + $0x348] sm:$0xff]  ;;  %v7146_v7 = vcombine.low %v1245_v63, %v1249_v0 }
 0x3f3   :  { %2796 = vmatpush1.bf16.msra.mxu1 %v7202_v6  ;;  %v1241_v51 = vld [vmem:[#allocation2 + $0x368] sm:$0xff] }
 0x3f4   :  { %2797 = vmatprep.subr.bf16.mxu1 %v7195_v8  ;;  %v1365_v5 = vld [vmem:[#allocation2 + $0x748] sm:$0xff]  ;;  %v7274_v8 = vcombine.low %v1373_v1, %v1377_v42  ;;  %v7139_v9 = vcombine.high %v1237_v4, %v1241_v51  ;;  %v1190_v1 = vld [vmem:[#allocation2 + $0x1d0] sm:$0xff] }
 0x3f5   :  { %2757 = vmatpush1.bf16.msra.mxu0 %v7066_v17  ;;  %v1369_v6 = vld [vmem:[#allocation2 + $0x768] sm:$0xff]  ;;  %v1194_v42 = vld [vmem:[#allocation2 + $0x1f0] sm:$0xff] }
 0x3f6   :  { %2758 = vmatprep.subr.bf16.mxu0 %v7059_v19  ;;  %v7267_v10 = vcombine.high %v1365_v5, %v1369_v6  ;;  %v1229_v11 = vld [vmem:[#allocation2 + $0x308] sm:$0xff]  ;;  %v7138_v19 = vcombine.low %v1237_v4, %v1241_v51  ;;  %v7093_v4 = vcombine.high %v1190_v1, %v1194_v42 }
 0x3f7   :  { %2798 = vmatpush1.bf16.msra.mxu1 %v7194_v18  ;;  %v1233_v13 = vld [vmem:[#allocation2 + $0x328] sm:$0xff] }
 0x3f8   :  { %2799 = vmatprep.subr.bf16.mxu1 %v7187_v20  ;;  %v1357_v17 = vld [vmem:[#allocation2 + $0x708] sm:$0xff]  ;;  %v7266_v20 = vcombine.low %v1365_v5, %v1369_v6  ;;  %v7131_v21 = vcombine.high %v1229_v11, %v1233_v13  ;;  %v1182_v5 = vld [vmem:[#allocation2 + $0x190] sm:$0xff] }
 0x3f9   :  { %2759 = vmatpush1.bf16.msra.mxu0 %v7058_v25  ;;  %v1361_v18 = vld [vmem:[#allocation2 + $0x728] sm:$0xff]  ;;  %v1186_v6 = vld [vmem:[#allocation2 + $0x1b0] sm:$0xff] }
 0x3fa   :  { %2760 = vmatprep.subr.bf16.mxu0 %v7051_v27  ;;  %v7259_v22 = vcombine.high %v1357_v17, %v1361_v18  ;;  %v1221_v23 = vld [vmem:[#allocation2 + $0x2c8] sm:$0xff]  ;;  %v7130_v27 = vcombine.low %v1229_v11, %v1233_v13  ;;  %v7085_v11 = vcombine.high %v1182_v5, %v1186_v6 }
 0x3fb   :  { %2800 = vmatpush1.bf16.msra.mxu1 %v7186_v26  ;;  %v1225_v24 = vld [vmem:[#allocation2 + $0x2e8] sm:$0xff] }
 0x3fc   :  { %2801 = vmatprep.subr.bf16.mxu1 %v7179_v28  ;;  %v1349_v25 = vld [vmem:[#allocation2 + $0x6c8] sm:$0xff]  ;;  %v7258_v28 = vcombine.low %v1357_v17, %v1361_v18  ;;  %v7123_v29 = vcombine.high %v1221_v23, %v1225_v24  ;;  %v1174_v17 = vld [vmem:[#allocation2 + $0x150] sm:$0xff] }
 0x3fd   :  { %2761 = vmatpush1.bf16.msra.mxu0 %v7050_v33  ;;  %v1353_v26 = vld [vmem:[#allocation2 + $0x6e8] sm:$0xff]  ;;  %v1178_v18 = vld [vmem:[#allocation2 + $0x170] sm:$0xff] }
 0x3fe   :  { %2762 = vmatprep.subr.bf16.mxu0 %v7043_v37  ;;  %v7251_v30 = vcombine.high %v1349_v25, %v1353_v26  ;;  %v1213_v31 = vld [vmem:[#allocation2 + $0x288] sm:$0xff]  ;;  %v7122_v37 = vcombine.low %v1221_v23, %v1225_v24  ;;  %v7077_v23 = vcombine.high %v1174_v17, %v1178_v18 }
 0x3ff   :  { %2802 = vmatpush1.bf16.msra.mxu1 %v7178_v36  ;;  %v1217_v32 = vld [vmem:[#allocation2 + $0x2a8] sm:$0xff] }
 0x400   :  { %2803 = vmatprep.subr.bf16.mxu1 %v7171_v39  ;;  %v1341_v33 = vld [vmem:[#allocation2 + $0x688] sm:$0xff]  ;;  %v7250_v39 = vcombine.low %v1349_v25, %v1353_v26  ;;  %v7115_v41 = vcombine.high %v1213_v31, %v1217_v32  ;;  %v1166_v25 = vld [vmem:[#allocation2 + $0x110] sm:$0xff] }
 0x401   :  { %2763 = vmatpush1.bf16.msra.mxu0 %v7042_v49  ;;  %v1345_v36 = vld [vmem:[#allocation2 + $0x6a8] sm:$0xff]  ;;  %v1170_v26 = vld [vmem:[#allocation2 + $0x130] sm:$0xff] }
 0x402   :  { %2764 = vmatprep.subr.bf16.mxu0 %v7035_v53  ;;  %v7243_v44 = vcombine.high %v1341_v33, %v1345_v36  ;;  %v1205_v45 = vld [vmem:[#allocation2 + $0x248] sm:$0xff]  ;;  %v7114_v53 = vcombine.low %v1213_v31, %v1217_v32  ;;  %v7069_v31 = vcombine.high %v1166_v25, %v1170_v26 }
 0x403   :  { %2804 = vmatpush1.bf16.msra.mxu1 %v7170_v52  ;;  %v1209_v48 = vld [vmem:[#allocation2 + $0x268] sm:$0xff] }
 0x404   :  { %2805 = vmatprep.subr.bf16.mxu1 %v7163_v54  ;;  %v1333_v49 = vld [vmem:[#allocation2 + $0x648] sm:$0xff]  ;;  %v7242_v54 = vcombine.low %v1341_v33, %v1345_v36  ;;  %v7107_v55 = vcombine.high %v1205_v45, %v1209_v48  ;;  %v1158_v33 = vld [vmem:[#allocation2 + $0xd0] sm:$0xff] }
 0x405   :  { %2765 = vmatpush1.bf16.msra.mxu0 %v7034_v59  ;;  %v1337_v52 = vld [vmem:[#allocation2 + $0x668] sm:$0xff]  ;;  %v1162_v36 = vld [vmem:[#allocation2 + $0xf0] sm:$0xff] }
 0x406   :  { %2766 = vmatprep.subr.bf16.mxu0 %v7155_v61  ;;  %v7235_v56 = vcombine.high %v1333_v49, %v1337_v52  ;;  %v1197_v57 = vld [vmem:[#allocation2 + $0x208] sm:$0xff]  ;;  %v7106_v61 = vcombine.low %v1205_v45, %v1209_v48  ;;  %v7061_v45 = vcombine.high %v1158_v33, %v1162_v36 }
 0x407   :  { %2806 = vmatpush1.bf16.msra.mxu1 %v7162_v60  ;;  %v1201_v58 = vld [vmem:[#allocation2 + $0x228] sm:$0xff] }
 0x408   :  { %2807 = vmatprep.subr.bf16.mxu1 %v7283_v62  ;;  %v1325_v59 = vld [vmem:[#allocation2 + $0x608] sm:$0xff]  ;;  %v7234_v62 = vcombine.low %v1333_v49, %v1337_v52  ;;  %v7099_v63 = vcombine.high %v1197_v57, %v1201_v58  ;;  %v1150_v49 = vld [vmem:[#allocation2 + $0x90] sm:$0xff] }
 0x409   :  { %2767 = vmatpush2.bf16.msra.mxu0 %v7154_v2  ;;  %v1329_v60 = vld [vmem:[#allocation2 + $0x628] sm:$0xff]  ;;  %v1318_v2 = vld [vmem:[#allocation2 + $0x5d0] sm:$0xff] }
 0x40a   :  { %2768 = vmatprep.subr.bf16.mxu0 %v7147_v3  ;;  %v7227_v0 = vcombine.high %v1325_v59, %v1329_v60  ;;  %v7098_v3 = vcombine.low %v1197_v57, %v1201_v58  ;;  %v1154_v52 = vld [vmem:[#allocation2 + $0xb0] sm:$0xff] }
 0x40b   :  { %2808 = vmatpush2.bf16.msra.mxu1 %v7282_v50  ;;  %v1322_v50 = vld [vmem:[#allocation2 + $0x5f0] sm:$0xff]  ;;  %v7053_v57 = vcombine.high %v1150_v49, %v1154_v52 }
 0x40c   :  { %2809 = vmatprep.subr.bf16.mxu1 %v7275_v43  ;;  %v7226_v43 = vcombine.low %v1325_v59, %v1329_v60  ;;  %v7221_v51 = vcombine.high %v1318_v2, %v1322_v50  ;;  %v1142_v59 = vld [vmem:[#allocation2 + $0x50] sm:$0xff] }
 0x40d   :  { %2769 = vmatpush2.bf16.msra.mxu0 %v7146_v7  ;;  %v1310_v7 = vld [vmem:[#allocation2 + $0x590] sm:$0xff] }
 0x40e   :  { %2770 = vmatprep.subr.bf16.mxu0 %v7139_v9  ;;  %v7092_v9 = vcombine.low %v1190_v1, %v1194_v42  ;;  %v1146_v60 = vld [vmem:[#allocation2 + $0x70] sm:$0xff] }
 0x40f   :  { %2810 = vmatpush2.bf16.msra.mxu1 %v7274_v8  ;;  %v1314_v8 = vld [vmem:[#allocation2 + $0x5b0] sm:$0xff]  ;;  %v7045_v1 = vcombine.high %v1142_v59, %v1146_v60 }
 0x410   :  { %2811 = vmatprep.subr.bf16.mxu1 %v7267_v10  ;;  %v7220_v10 = vcombine.low %v1318_v2, %v1322_v50  ;;  %v7213_v13 = vcombine.high %v1310_v7, %v1314_v8  ;;  %v1134_v2 = vld [vmem:[#allocation2 + $0x10] sm:$0xff] }
 0x411   :  { %2771 = vmatpush2.bf16.msra.mxu0 %v7138_v19  ;;  %v1302_v19 = vld [vmem:[#allocation2 + $0x550] sm:$0xff] }
 0x412   :  { %2772 = vmatprep.subr.bf16.mxu0 %v7131_v21  ;;  %v7084_v21 = vcombine.low %v1182_v5, %v1186_v6  ;;  %v1138_v50 = vld [vmem:[#allocation2 + $0x30] sm:$0xff] }
 0x413   :  { %2812 = vmatpush2.bf16.msra.mxu1 %v7266_v20  ;;  %v1306_v20 = vld [vmem:[#allocation2 + $0x570] sm:$0xff]  ;;  %v7037_v5 = vcombine.high %v1134_v2, %v1138_v50 }
 0x414   :  { %2813 = vmatprep.subr.bf16.mxu1 %v7259_v22  ;;  %v7212_v22 = vcombine.low %v1310_v7, %v1314_v8  ;;  %v7205_v24 = vcombine.high %v1302_v19, %v1306_v20  ;;  %v1254_v7 = vld [vmem:[#allocation2 + $0x3d0] sm:$0xff] }
 0x415   :  { %2773 = vmatpush2.bf16.msra.mxu0 %v7130_v27  ;;  %v1294_v27 = vld [vmem:[#allocation2 + $0x510] sm:$0xff] }
 0x416   :  { %2774 = vmatprep.subr.bf16.mxu0 %v7123_v29  ;;  %v7076_v29 = vcombine.low %v1174_v17, %v1178_v18  ;;  %v1258_v8 = vld [vmem:[#allocation2 + $0x3f0] sm:$0xff] }
 0x417   :  { %2814 = vmatpush2.bf16.msra.mxu1 %v7258_v28  ;;  %v1298_v28 = vld [vmem:[#allocation2 + $0x530] sm:$0xff]  ;;  %v7157_v17 = vcombine.high %v1254_v7, %v1258_v8 }
 0x418   :  { %2815 = vmatprep.subr.bf16.mxu1 %v7251_v30  ;;  %v7204_v30 = vcombine.low %v1302_v19, %v1306_v20  ;;  %v7197_v32 = vcombine.high %v1294_v27, %v1298_v28  ;;  %v1246_v19 = vld [vmem:[#allocation2 + $0x390] sm:$0xff] }
 0x419   :  { %2775 = vmatpush2.bf16.msra.mxu0 %v7122_v37  ;;  %v1286_v37 = vld [vmem:[#allocation2 + $0x4d0] sm:$0xff] }
 0x41a   :  { %2776 = vmatprep.subr.bf16.mxu0 %v7115_v41  ;;  %v7068_v41 = vcombine.low %v1166_v25, %v1170_v26  ;;  %v1250_v20 = vld [vmem:[#allocation2 + $0x3b0] sm:$0xff] }
 0x41b   :  { %2816 = vmatpush2.bf16.msra.mxu1 %v7250_v39  ;;  %v1290_v39 = vld [vmem:[#allocation2 + $0x4f0] sm:$0xff]  ;;  %v7149_v25 = vcombine.high %v1246_v19, %v1250_v20 }
 0x41c   :  { %2817 = vmatprep.subr.bf16.mxu1 %v7243_v44  ;;  %v7196_v44 = vcombine.low %v1294_v27, %v1298_v28  ;;  %v7189_v48 = vcombine.high %v1286_v37, %v1290_v39  ;;  %v1238_v27 = vld [vmem:[#allocation2 + $0x350] sm:$0xff] }
 0x41d   :  { %2777 = vmatpush2.bf16.msra.mxu0 %v7114_v53  ;;  %v1278_v53 = vld [vmem:[#allocation2 + $0x490] sm:$0xff] }
 0x41e   :  { %2778 = vmatprep.subr.bf16.mxu0 %v7107_v55  ;;  %v7060_v55 = vcombine.low %v1158_v33, %v1162_v36  ;;  %v1242_v28 = vld [vmem:[#allocation2 + $0x370] sm:$0xff] }
 0x41f   :  { %2818 = vmatpush2.bf16.msra.mxu1 %v7242_v54  ;;  %v1282_v54 = vld [vmem:[#allocation2 + $0x4b0] sm:$0xff]  ;;  %v7141_v33 = vcombine.high %v1238_v27, %v1242_v28 }
 0x420   :  { %2819 = vmatprep.subr.bf16.mxu1 %v7235_v56  ;;  %v7188_v56 = vcombine.low %v1286_v37, %v1290_v39  ;;  %v7181_v58 = vcombine.high %v1278_v53, %v1282_v54  ;;  %v1230_v37 = vld [vmem:[#allocation2 + $0x310] sm:$0xff] }
 0x421   :  { %2779 = vmatpush2.bf16.msra.mxu0 %v7106_v61  ;;  %v1270_v61 = vld [vmem:[#allocation2 + $0x450] sm:$0xff] }
 0x422   :  { %2780 = vmatprep.subr.bf16.mxu0 %v7099_v63  ;;  %v7052_v63 = vcombine.low %v1150_v49, %v1154_v52  ;;  %v1234_v39 = vld [vmem:[#allocation2 + $0x330] sm:$0xff] }
 0x423   :  { %2820 = vmatpush2.bf16.msra.mxu1 %v7234_v62  ;;  %v1274_v62 = vld [vmem:[#allocation2 + $0x470] sm:$0xff]  ;;  %v7133_v49 = vcombine.high %v1230_v37, %v1234_v39 }
 0x424   :  { %2821 = vmatprep.subr.bf16.mxu1 %v7227_v0  ;;  %v7180_v0 = vcombine.low %v1278_v53, %v1282_v54  ;;  %v7173_v42 = vcombine.high %v1270_v61, %v1274_v62  ;;  %v1222_v53 = vld [vmem:[#allocation2 + $0x2d0] sm:$0xff] }
 0x425   :  { %2781 = vmatpush2.bf16.msra.mxu0 %v7098_v3  ;;  %v1262_v3 = vld [vmem:[#allocation2 + $0x410] sm:$0xff] }
 0x426   :  { %2832 = vmatprep.subr.bf16.mxu0 %v7093_v4  ;;  %v7044_v4 = vcombine.low %v1142_v59, %v1146_v60  ;;  %v1226_v54 = vld [vmem:[#allocation2 + $0x2f0] sm:$0xff] }
 0x427   :  { %2822 = vmatpush2.bf16.msra.mxu1 %v7226_v43  ;;  %v1266_v43 = vld [vmem:[#allocation2 + $0x430] sm:$0xff]  ;;  %v7125_v59 = vcombine.high %v1222_v53, %v1226_v54 }
 0x428   :  { %2873 = vmatprep.subr.bf16.mxu1 %v7221_v51  ;;  %2783 = vmatmul.mubr.bf16.vlgmr.msra.gmra.mxu0 %v9046_v12  ;;  %v7172_v51 = vcombine.low %v1270_v61, %v1274_v62  ;;  %v7165_v6 = vcombine.high %v1262_v3, %v1266_v43  ;;  %v1214_v61 = vld [vmem:[#allocation2 + $0x290] sm:$0xff] }
 0x429   :  { %2833 = vmatpush1.bf16.msra.mxu0 %v7092_v9  ;;  %2864 = vmatprep.mubr.bf16.mxu0 %v9048_v14  ;;  %v1382_v9 = vld [vmem:[#allocation2 + $0x7d0] sm:$0xff] }
 0x42a   :  { %2824 = vmatmul.mubr.bf16.vlgmr.msra.gmra.mxu1 %v9050_v15  ;;  %2834 = vmatprep.subr.bf16.mxu0 %v7085_v11  ;;  %v7036_v11 = vcombine.low %v1134_v2, %v1138_v50  ;;  %v1218_v62 = vld [vmem:[#allocation2 + $0x2b0] sm:$0xff] }
 0x42b   :  { %2874 = vmatpush1.bf16.msra.mxu1 %v7220_v10  ;;  %2905 = vmatprep.mubr.bf16.mxu1 %v9052_v16  ;;  %v1386_v10 = vld [vmem:[#allocation2 + $0x7f0] sm:$0xff]  ;;  %v7117_v2 = vcombine.high %v1214_v61, %v1218_v62 }
 0x42c   :  { %2875 = vmatprep.subr.bf16.mxu1 %v7213_v13  ;;  %v7164_v13 = vcombine.low %v1262_v3, %v1266_v43  ;;  %v7285_v18 = vcombine.high %v1382_v9, %v1386_v10  ;;  %v1206_v3 = vld [vmem:[#allocation2 + $0x250] sm:$0xff] }
 0x42d   :  { %2835 = vmatpush1.bf16.msra.mxu0 %v7084_v21  ;;  %v1374_v21 = vld [vmem:[#allocation2 + $0x790] sm:$0xff] }
 0x42e   :  { %2836 = vmatprep.subr.bf16.mxu0 %v7077_v23  ;;  %v7156_v23 = vcombine.low %v1254_v7, %v1258_v8  ;;  %v1210_v43 = vld [vmem:[#allocation2 + $0x270] sm:$0xff] }
 0x42f   :  { %2876 = vmatpush1.bf16.msra.mxu1 %v7212_v22  ;;  %v1378_v22 = vld [vmem:[#allocation2 + $0x7b0] sm:$0xff]  ;;  %v7109_v7 = vcombine.high %v1206_v3, %v1210_v43 }
 0x430   :  { %2877 = vmatprep.subr.bf16.mxu1 %v7205_v24  ;;  %v7284_v24 = vcombine.low %v1382_v9, %v1386_v10  ;;  %v7277_v26 = vcombine.high %v1374_v21, %v1378_v22  ;;  %v1198_v9 = vld [vmem:[#allocation2 + $0x210] sm:$0xff] }
 0x431   :  { %2837 = vmatpush1.bf16.msra.mxu0 %v7076_v29  ;;  %v1366_v29 = vld [vmem:[#allocation2 + $0x750] sm:$0xff] }
 0x432   :  { %2838 = vmatprep.subr.bf16.mxu0 %v7069_v31  ;;  %v7148_v31 = vcombine.low %v1246_v19, %v1250_v20  ;;  %v1202_v10 = vld [vmem:[#allocation2 + $0x230] sm:$0xff] }
 0x433   :  { %2878 = vmatpush1.bf16.msra.mxu1 %v7204_v30  ;;  %v1370_v30 = vld [vmem:[#allocation2 + $0x770] sm:$0xff]  ;;  %v7101_v19 = vcombine.high %v1198_v9, %v1202_v10 }
 0x434   :  { %2879 = vmatprep.subr.bf16.mxu1 %v7197_v32  ;;  %v7276_v32 = vcombine.low %v1374_v21, %v1378_v22  ;;  %v7269_v36 = vcombine.high %v1366_v29, %v1370_v30  ;;  %v1191_v21 = vld [vmem:[#allocation2 + $0x1d8] sm:$0xff] }
 0x435   :  { %2839 = vmatpush1.bf16.msra.mxu0 %v7068_v41  ;;  %v1358_v41 = vld [vmem:[#allocation2 + $0x710] sm:$0xff]  ;;  %v1195_v22 = vld [vmem:[#allocation2 + $0x1f8] sm:$0xff] }
 0x436   :  { %2840 = vmatprep.subr.bf16.mxu0 %v7061_v45  ;;  %v7140_v45 = vcombine.low %v1238_v27, %v1242_v28  ;;  %v7095_v27 = vcombine.high %v1191_v21, %v1195_v22 }
 0x437   :  { %2880 = vmatpush1.bf16.msra.mxu1 %v7196_v44  ;;  %v1362_v44 = vld [vmem:[#allocation2 + $0x730] sm:$0xff] }
 0x438   :  { %2881 = vmatprep.subr.bf16.mxu1 %v7189_v48  ;;  %v7268_v48 = vcombine.low %v1366_v29, %v1370_v30  ;;  %v7261_v52 = vcombine.high %v1358_v41, %v1362_v44  ;;  %v1183_v29 = vld [vmem:[#allocation2 + $0x198] sm:$0xff] }
 0x439   :  { %2841 = vmatpush1.bf16.msra.mxu0 %v7060_v55  ;;  %v1350_v55 = vld [vmem:[#allocation2 + $0x6d0] sm:$0xff]  ;;  %v1187_v30 = vld [vmem:[#allocation2 + $0x1b8] sm:$0xff] }
 0x43a   :  { %2842 = vmatprep.subr.bf16.mxu0 %v7053_v57  ;;  %v7132_v57 = vcombine.low %v1230_v37, %v1234_v39  ;;  %v7087_v37 = vcombine.high %v1183_v29, %v1187_v30 }
 0x43b   :  { %2882 = vmatpush1.bf16.msra.mxu1 %v7188_v56  ;;  %v1354_v56 = vld [vmem:[#allocation2 + $0x6f0] sm:$0xff] }
 0x43c   :  { %2883 = vmatprep.subr.bf16.mxu1 %v7181_v58  ;;  %v7260_v58 = vcombine.low %v1358_v41, %v1362_v44  ;;  %v7253_v60 = vcombine.high %v1350_v55, %v1354_v56  ;;  %v1175_v41 = vld [vmem:[#allocation2 + $0x158] sm:$0xff] }
 0x43d   :  { %2843 = vmatpush1.bf16.msra.mxu0 %v7052_v63  ;;  %v1342_v63 = vld [vmem:[#allocation2 + $0x690] sm:$0xff]  ;;  %v1179_v44 = vld [vmem:[#allocation2 + $0x178] sm:$0xff] }
 0x43e   :  { %2844 = vmatprep.subr.bf16.mxu0 %v7045_v1  ;;  %v7124_v1 = vcombine.low %v1222_v53, %v1226_v54  ;;  %v7079_v53 = vcombine.high %v1175_v41, %v1179_v44 }
 0x43f   :  { %2884 = vmatpush1.bf16.msra.mxu1 %v7180_v0  ;;  %v1346_v0 = vld [vmem:[#allocation2 + $0x6b0] sm:$0xff] }
 0x440   :  { %2885 = vmatprep.subr.bf16.mxu1 %v7173_v42  ;;  %v7252_v42 = vcombine.low %v1350_v55, %v1354_v56  ;;  %v7245_v50 = vcombine.high %v1342_v63, %v1346_v0  ;;  %v1167_v55 = vld [vmem:[#allocation2 + $0x118] sm:$0xff] }
 0x441   :  { %2845 = vmatpush1.bf16.msra.mxu0 %v7044_v4  ;;  %v1334_v4 = vld [vmem:[#allocation2 + $0x650] sm:$0xff]  ;;  %v1171_v56 = vld [vmem:[#allocation2 + $0x138] sm:$0xff] }
 0x442   :  { %2846 = vmatprep.subr.bf16.mxu0 %v7037_v5  ;;  %v7116_v5 = vcombine.low %v1214_v61, %v1218_v62  ;;  %v7071_v61 = vcombine.high %v1167_v55, %v1171_v56 }
 0x443   :  { %2886 = vmatpush1.bf16.msra.mxu1 %v7172_v51  ;;  %v1338_v51 = vld [vmem:[#allocation2 + $0x670] sm:$0xff] }
 0x444   :  { %2887 = vmatprep.subr.bf16.mxu1 %v7165_v6  ;;  %v7244_v6 = vcombine.low %v1342_v63, %v1346_v0  ;;  %v7237_v8 = vcombine.high %v1334_v4, %v1338_v51  ;;  %v1159_v63 = vld [vmem:[#allocation2 + $0xd8] sm:$0xff] }
 0x445   :  { %2847 = vmatpush1.bf16.msra.mxu0 %v7036_v11  ;;  %v1326_v11 = vld [vmem:[#allocation2 + $0x610] sm:$0xff]  ;;  %v1163_v0 = vld [vmem:[#allocation2 + $0xf8] sm:$0xff] }
 0x446   :  { %2848 = vmatprep.subr.bf16.mxu0 %v7157_v17  ;;  %v7108_v17 = vcombine.low %v1206_v3, %v1210_v43  ;;  %v1151_v3 = vld [vmem:[#allocation2 + $0x98] sm:$0xff] }
 0x447   :  { %2888 = vmatpush1.bf16.msra.mxu1 %v7164_v13  ;;  %v1330_v13 = vld [vmem:[#allocation2 + $0x630] sm:$0xff]  ;;  %v1155_v43 = vld [vmem:[#allocation2 + $0xb8] sm:$0xff] }
 0x448   :  { %2889 = vmatprep.subr.bf16.mxu1 %v7285_v18  ;;  %v7236_v18 = vcombine.low %v1334_v4, %v1338_v51  ;;  %v7229_v20 = vcombine.high %v1326_v11, %v1330_v13  ;;  %v1279_v4 = vld [vmem:[#allocation2 + $0x498] sm:$0xff] }
 0x449   :  { %2849 = vmatpush2.bf16.msra.mxu0 %v7156_v23  ;;  %v1319_v23 = vld [vmem:[#allocation2 + $0x5d8] sm:$0xff] }
 0x44a   :  { %2850 = vmatprep.subr.bf16.mxu0 %v7149_v25  ;;  %v7100_v25 = vcombine.low %v1198_v9, %v1202_v10  ;;  %v1283_v51 = vld [vmem:[#allocation2 + $0x4b8] sm:$0xff] }
 0x44b   :  { %2890 = vmatpush2.bf16.msra.mxu1 %v7284_v24  ;;  %v1323_v24 = vld [vmem:[#allocation2 + $0x5f8] sm:$0xff] }
 0x44c   :  { %2891 = vmatprep.subr.bf16.mxu1 %v7277_v26  ;;  %v7228_v26 = vcombine.low %v1326_v11, %v1330_v13  ;;  %v7223_v28 = vcombine.high %v1319_v23, %v1323_v24  ;;  %v1143_v9 = vld [vmem:[#allocation2 + $0x58] sm:$0xff] }
 0x44d   :  { %2851 = vmatpush2.bf16.msra.mxu0 %v7148_v31  ;;  %v1311_v31 = vld [vmem:[#allocation2 + $0x598] sm:$0xff] }
 0x44e   :  { %2852 = vmatprep.subr.bf16.mxu0 %v7141_v33  ;;  %v7094_v33 = vcombine.low %v1191_v21, %v1195_v22  ;;  %v1147_v10 = vld [vmem:[#allocation2 + $0x78] sm:$0xff] }
 0x44f   :  { %2892 = vmatpush2.bf16.msra.mxu1 %v7276_v32  ;;  %v1315_v32 = vld [vmem:[#allocation2 + $0x5b8] sm:$0xff] }
 0x450   :  { %2893 = vmatprep.subr.bf16.mxu1 %v7269_v36  ;;  %v7222_v36 = vcombine.low %v1319_v23, %v1323_v24  ;;  %v7215_v39 = vcombine.high %v1311_v31, %v1315_v32  ;;  %v1271_v11 = vld [vmem:[#allocation2 + $0x458] sm:$0xff] }
 0x451   :  { %2853 = vmatpush2.bf16.msra.mxu0 %v7140_v45  ;;  %v1303_v45 = vld [vmem:[#allocation2 + $0x558] sm:$0xff] }
 0x452   :  { %2854 = vmatprep.subr.bf16.mxu0 %v7133_v49  ;;  %v7086_v49 = vcombine.low %v1183_v29, %v1187_v30  ;;  %v1275_v13 = vld [vmem:[#allocation2 + $0x478] sm:$0xff] }
 0x453   :  { %2894 = vmatpush2.bf16.msra.mxu1 %v7268_v48  ;;  %v1307_v48 = vld [vmem:[#allocation2 + $0x578] sm:$0xff] }
 0x454   :  { %2895 = vmatprep.subr.bf16.mxu1 %v7261_v52  ;;  %v7214_v52 = vcombine.low %v1311_v31, %v1315_v32  ;;  %v7207_v54 = vcombine.high %v1303_v45, %v1307_v48  ;;  %v1135_v21 = vld [vmem:[#allocation2 + $0x18] sm:$0xff] }
 0x455   :  { %2855 = vmatpush2.bf16.msra.mxu0 %v7132_v57  ;;  %v1295_v57 = vld [vmem:[#allocation2 + $0x518] sm:$0xff] }
 0x456   :  { %2856 = vmatprep.subr.bf16.mxu0 %v7125_v59  ;;  %v7078_v59 = vcombine.low %v1175_v41, %v1179_v44  ;;  %v1139_v22 = vld [vmem:[#allocation2 + $0x38] sm:$0xff] }
 0x457   :  { %2896 = vmatpush2.bf16.msra.mxu1 %v7260_v58  ;;  %v1299_v58 = vld [vmem:[#allocation2 + $0x538] sm:$0xff] }
 0x458   :  { %2897 = vmatprep.subr.bf16.mxu1 %v7253_v60  ;;  %v7206_v60 = vcombine.low %v1303_v45, %v1307_v48  ;;  %v7199_v62 = vcombine.high %v1295_v57, %v1299_v58  ;;  %v1263_v23 = vld [vmem:[#allocation2 + $0x418] sm:$0xff] }
 0x459   :  { %2857 = vmatpush2.bf16.msra.mxu0 %v7124_v1  ;;  %v1287_v1 = vld [vmem:[#allocation2 + $0x4d8] sm:$0xff] }
 0x45a   :  { %2858 = vmatprep.subr.bf16.mxu0 %v7117_v2  ;;  %v7070_v2 = vcombine.low %v1167_v55, %v1171_v56  ;;  %v1267_v24 = vld [vmem:[#allocation2 + $0x438] sm:$0xff] }
 0x45b   :  { %2898 = vmatpush2.bf16.msra.mxu1 %v7252_v42  ;;  %v1291_v42 = vld [vmem:[#allocation2 + $0x4f8] sm:$0xff] }
 0x45c   :  { %2899 = vmatprep.subr.bf16.mxu1 %v7245_v50  ;;  %v7063_v50 = vcombine.high %v1159_v63, %v1163_v0  ;;  %v1255_v29 = vld [vmem:[#allocation2 + $0x3d8] sm:$0xff] }
 0x45d   :  { %2859 = vmatpush2.bf16.msra.mxu0 %v7116_v5  ;;  %v7062_v5 = vcombine.low %v1159_v63, %v1163_v0  ;;  %v1259_v30 = vld [vmem:[#allocation2 + $0x3f8] sm:$0xff] }
 0x45e   :  { %2860 = vmatprep.subr.bf16.mxu0 %v7109_v7  ;;  %v7055_v7 = vcombine.high %v1151_v3, %v1155_v43  ;;  %v1383_v31 = vld [vmem:[#allocation2 + $0x7d8] sm:$0xff] }
 0x45f   :  { %2900 = vmatpush2.bf16.msra.mxu1 %v7244_v6  ;;  %v7190_v6 = vcombine.low %v1287_v1, %v1291_v42  ;;  %v1387_v32 = vld [vmem:[#allocation2 + $0x7f8] sm:$0xff] }
 0x460   :  { %2901 = vmatprep.subr.bf16.mxu1 %v7237_v8  ;;  %v7183_v8 = vcombine.high %v1279_v4, %v1283_v51  ;;  %v1247_v41 = vld [vmem:[#allocation2 + $0x398] sm:$0xff] }
 0x461   :  { %2861 = vmatpush2.bf16.msra.mxu0 %v7108_v17  ;;  %v7054_v17 = vcombine.low %v1151_v3, %v1155_v43  ;;  %v1251_v44 = vld [vmem:[#allocation2 + $0x3b8] sm:$0xff] }
 0x462   :  { %2862 = vmatprep.subr.bf16.mxu0 %v7101_v19  ;;  %v7047_v19 = vcombine.high %v1143_v9, %v1147_v10  ;;  %v1375_v45 = vld [vmem:[#allocation2 + $0x798] sm:$0xff] }
 0x463   :  { %2902 = vmatpush2.bf16.msra.mxu1 %v7236_v18  ;;  %v7182_v18 = vcombine.low %v1279_v4, %v1283_v51  ;;  %v1379_v48 = vld [vmem:[#allocation2 + $0x7b8] sm:$0xff] }
 0x464   :  { %2903 = vmatprep.subr.bf16.mxu1 %v7229_v20  ;;  %v7175_v20 = vcombine.high %v1271_v11, %v1275_v13  ;;  %v1239_v55 = vld [vmem:[#allocation2 + $0x358] sm:$0xff] }
 0x465   :  { %2863 = vmatpush2.bf16.msra.mxu0 %v7100_v25  ;;  %v7046_v25 = vcombine.low %v1143_v9, %v1147_v10  ;;  %v1243_v56 = vld [vmem:[#allocation2 + $0x378] sm:$0xff] }
 0x466   :  { %2914 = vmatprep.subr.bf16.mxu0 %v7095_v27  ;;  %v7039_v27 = vcombine.high %v1135_v21, %v1139_v22  ;;  %v1231_v63 = vld [vmem:[#allocation2 + $0x318] sm:$0xff] }
 0x467   :  { %2904 = vmatpush2.bf16.msra.mxu1 %v7228_v26  ;;  %v7174_v26 = vcombine.low %v1271_v11, %v1275_v13  ;;  %v1235_v0 = vld [vmem:[#allocation2 + $0x338] sm:$0xff] }
 0x468   :  { %2955 = vmatprep.subr.bf16.mxu1 %v7223_v28  ;;  %2865 = vmatmul.mubr.bf16.vlgmr.msra.gmra.mxu0 %v9046_v12  ;;  %v7167_v28 = vcombine.high %v1263_v23, %v1267_v24  ;;  %v1223_v3 = vld [vmem:[#allocation2 + $0x2d8] sm:$0xff] }
 0x469   :  { %2915 = vmatpush1.bf16.msra.mxu0 %v7094_v33  ;;  %2946 = vmatprep.mubr.bf16.mxu0 %v9048_v14  ;;  %v7198_v14 = vcombine.low %v1295_v57, %v1299_v58  ;;  %v7038_v33 = vcombine.low %v1135_v21, %v1139_v22  ;;  %v1367_v57 = vld [vmem:[#allocation2 + $0x758] sm:$0xff] }
 0x46a   :  { %2906 = vmatmul.mubr.bf16.vlgmr.msra.gmra.mxu1 %v9050_v15  ;;  %2916 = vmatprep.subr.bf16.mxu0 %v7087_v37  ;;  %v7159_v37 = vcombine.high %v1255_v29, %v1259_v30  ;;  %v1371_v58 = vld [vmem:[#allocation2 + $0x778] sm:$0xff] }
 0x46b   :  { %2956 = vmatpush1.bf16.msra.mxu1 %v7222_v36  ;;  %2987 = vmatprep.mubr.bf16.mxu1 %v9052_v16  ;;  %v7191_v16 = vcombine.high %v1287_v1, %v1291_v42  ;;  %v7166_v36 = vcombine.low %v1263_v23, %v1267_v24  ;;  %v1359_v1 = vld [vmem:[#allocation2 + $0x718] sm:$0xff] }
 0x46c   :  { %2957 = vmatprep.subr.bf16.mxu1 %v7215_v39  ;;  %v7287_v39 = vcombine.high %v1383_v31, %v1387_v32  ;;  %v1363_v42 = vld [vmem:[#allocation2 + $0x738] sm:$0xff] }
 0x46d   :  { %2917 = vmatpush1.bf16.msra.mxu0 %v7086_v49  ;;  %v7158_v49 = vcombine.low %v1255_v29, %v1259_v30  ;;  %v1227_v43 = vld [vmem:[#allocation2 + $0x2f8] sm:$0xff] }
 0x46e   :  { %2918 = vmatprep.subr.bf16.mxu0 %v7079_v53  ;;  %v7151_v53 = vcombine.high %v1247_v41, %v1251_v44  ;;  %v1351_v4 = vld [vmem:[#allocation2 + $0x6d8] sm:$0xff] }
 0x46f   :  { %2958 = vmatpush1.bf16.msra.mxu1 %v7214_v52  ;;  %v7286_v52 = vcombine.low %v1383_v31, %v1387_v32  ;;  %v1355_v51 = vld [vmem:[#allocation2 + $0x6f8] sm:$0xff] }
 0x470   :  { %2959 = vmatprep.subr.bf16.mxu1 %v7207_v54  ;;  %v7279_v54 = vcombine.high %v1375_v45, %v1379_v48  ;;  %v1215_v9 = vld [vmem:[#allocation2 + $0x298] sm:$0xff] }
 0x471   :  { %2919 = vmatpush1.bf16.msra.mxu0 %v7078_v59  ;;  %v7150_v59 = vcombine.low %v1247_v41, %v1251_v44  ;;  %v1219_v10 = vld [vmem:[#allocation2 + $0x2b8] sm:$0xff] }
 0x472   :  { %2920 = vmatprep.subr.bf16.mxu0 %v7071_v61  ;;  %v7143_v61 = vcombine.high %v1239_v55, %v1243_v56  ;;  %v1343_v11 = vld [vmem:[#allocation2 + $0x698] sm:$0xff] }
 0x473   :  { %2960 = vmatpush1.bf16.msra.mxu1 %v7206_v60  ;;  %v7278_v60 = vcombine.low %v1375_v45, %v1379_v48  ;;  %v1347_v13 = vld [vmem:[#allocation2 + $0x6b8] sm:$0xff] }
 0x474   :  { %2961 = vmatprep.subr.bf16.mxu1 %v7199_v62  ;;  %v7271_v62 = vcombine.high %v1367_v57, %v1371_v58  ;;  %v1207_v21 = vld [vmem:[#allocation2 + $0x258] sm:$0xff] }
 0x475   :  { %2921 = vmatpush1.bf16.msra.mxu0 %v7070_v2  ;;  %v7142_v2 = vcombine.low %v1239_v55, %v1243_v56  ;;  %v1211_v22 = vld [vmem:[#allocation2 + $0x278] sm:$0xff] }
 0x476   :  { %2922 = vmatprep.subr.bf16.mxu0 %v7063_v50  ;;  %v7135_v50 = vcombine.high %v1231_v63, %v1235_v0  ;;  %v1335_v23 = vld [vmem:[#allocation2 + $0x658] sm:$0xff] }
 0x477   :  { %2962 = vmatpush1.bf16.msra.mxu1 %v7198_v14  ;;  %v7270_v14 = vcombine.low %v1367_v57, %v1371_v58  ;;  %v1339_v24 = vld [vmem:[#allocation2 + $0x678] sm:$0xff] }
 0x478   :  { %2963 = vmatprep.subr.bf16.mxu1 %v7191_v16  ;;  %v7263_v16 = vcombine.high %v1359_v1, %v1363_v42  ;;  %v1199_v29 = vld [vmem:[#allocation2 + $0x218] sm:$0xff] }
 0x479   :  { %2923 = vmatpush1.bf16.msra.mxu0 %v7062_v5  ;;  %v7134_v5 = vcombine.low %v1231_v63, %v1235_v0  ;;  %v1203_v30 = vld [vmem:[#allocation2 + $0x238] sm:$0xff] }
 0x47a   :  { %2924 = vmatprep.subr.bf16.mxu0 %v7055_v7  ;;  %v7127_v7 = vcombine.high %v1223_v3, %v1227_v43  ;;  %v1327_v31 = vld [vmem:[#allocation2 + $0x618] sm:$0xff]  ;;  %v7102_v41 = vcombine.low %v1199_v29, %v1203_v30 }
 0x47b   :  { %2964 = vmatpush1.bf16.msra.mxu1 %v7190_v6  ;;  %v7262_v6 = vcombine.low %v1359_v1, %v1363_v42  ;;  %v1331_v32 = vld [vmem:[#allocation2 + $0x638] sm:$0xff] }
 0x47c   :  { %2965 = vmatprep.subr.bf16.mxu1 %v7183_v8  ;;  %v7255_v8 = vcombine.high %v1351_v4, %v1355_v51  ;;  %v7230_v44 = vcombine.low %v1327_v31, %v1331_v32 }
 0x47d   :  { %2925 = vmatpush1.bf16.msra.mxu0 %v7054_v17  ;;  %v7126_v17 = vcombine.low %v1223_v3, %v1227_v43 }
 0x47e   :  { %2926 = vmatprep.subr.bf16.mxu0 %v7047_v19  ;;  %v7119_v19 = vcombine.high %v1215_v9, %v1219_v10 }
 0x47f   :  { %2966 = vmatpush1.bf16.msra.mxu1 %v7182_v18  ;;  %v7254_v18 = vcombine.low %v1351_v4, %v1355_v51 }
 0x480   :  { %2967 = vmatprep.subr.bf16.mxu1 %v7175_v20  ;;  %v7247_v20 = vcombine.high %v1343_v11, %v1347_v13 }
 0x481   :  { %2927 = vmatpush1.bf16.msra.mxu0 %v7046_v25  ;;  %v7118_v25 = vcombine.low %v1215_v9, %v1219_v10 }
 0x482   :  { %2928 = vmatprep.subr.bf16.mxu0 %v7039_v27  ;;  %v7111_v27 = vcombine.high %v1207_v21, %v1211_v22 }
 0x483   :  { %2968 = vmatpush1.bf16.msra.mxu1 %v7174_v26  ;;  %v7246_v26 = vcombine.low %v1343_v11, %v1347_v13 }
 0x484   :  { %2969 = vmatprep.subr.bf16.mxu1 %v7167_v28  ;;  %v7239_v28 = vcombine.high %v1335_v23, %v1339_v24 }
 0x485   :  { %2929 = vmatpush1.bf16.msra.mxu0 %v7038_v33  ;;  %v7110_v33 = vcombine.low %v1207_v21, %v1211_v22 }
 0x486   :  { %2930 = vmatprep.subr.bf16.mxu0 %v7159_v37  ;;  %v7103_v37 = vcombine.high %v1199_v29, %v1203_v30 }
 0x487   :  { %2970 = vmatpush1.bf16.msra.mxu1 %v7166_v36  ;;  %v7238_v36 = vcombine.low %v1335_v23, %v1339_v24 }
 0x488   :  { %2971 = vmatprep.subr.bf16.mxu1 %v7287_v39  ;;  %v7231_v39 = vcombine.high %v1327_v31, %v1331_v32 }
 0x489   :  { %2931 = vmatpush2.bf16.msra.mxu0 %v7158_v49 }
 0x48a   :  { %2932 = vmatprep.subr.bf16.mxu0 %v7151_v53 }
 0x48b   :  { %2972 = vmatpush2.bf16.msra.mxu1 %v7286_v52 }
 0x48c   :  { %2973 = vmatprep.subr.bf16.mxu1 %v7279_v54 }
 0x48d   :  { %2933 = vmatpush2.bf16.msra.mxu0 %v7150_v59 }
 0x48e   :  { %2934 = vmatprep.subr.bf16.mxu0 %v7143_v61 }
 0x48f   :  { %2974 = vmatpush2.bf16.msra.mxu1 %v7278_v60 }
 0x490   :  { %2975 = vmatprep.subr.bf16.mxu1 %v7271_v62 }
 0x491   :  { %2935 = vmatpush2.bf16.msra.mxu0 %v7142_v2 }
 0x492   :  { %2936 = vmatprep.subr.bf16.mxu0 %v7135_v50 }
 0x493   :  { %2976 = vmatpush2.bf16.msra.mxu1 %v7270_v14 }
 0x494   :  { %2977 = vmatprep.subr.bf16.mxu1 %v7263_v16 }
 0x495   :  { %2937 = vmatpush2.bf16.msra.mxu0 %v7134_v5 }
 0x496   :  { %2938 = vmatprep.subr.bf16.mxu0 %v7127_v7 }
 0x497   :  { %2978 = vmatpush2.bf16.msra.mxu1 %v7262_v6 }
 0x498   :  { %2979 = vmatprep.subr.bf16.mxu1 %v7255_v8 }
 0x499   :  { %2939 = vmatpush2.bf16.msra.mxu0 %v7126_v17 }
 0x49a   :  { %2940 = vmatprep.subr.bf16.mxu0 %v7119_v19 }
 0x49b   :  { %2980 = vmatpush2.bf16.msra.mxu1 %v7254_v18 }
 0x49c   :  { %2981 = vmatprep.subr.bf16.mxu1 %v7247_v20 }
 0x49d   :  { %2941 = vmatpush2.bf16.msra.mxu0 %v7118_v25 }
 0x49e   :  { %2942 = vmatprep.subr.bf16.mxu0 %v7111_v27 }
 0x49f   :  { %2982 = vmatpush2.bf16.msra.mxu1 %v7246_v26 }
 0x4a0   :  { %2983 = vmatprep.subr.bf16.mxu1 %v7239_v28 }
 0x4a1   :  { %2943 = vmatpush2.bf16.msra.mxu0 %v7110_v33 }
 0x4a2   :  { %2944 = vmatprep.subr.bf16.mxu0 %v7103_v37 }
 0x4a3   :  { %2984 = vmatpush2.bf16.msra.mxu1 %v7238_v36 }
 0x4a4   :  { %2985 = vmatprep.subr.bf16.mxu1 %v7231_v39 }
 0x4a5   :  { %2945 = vmatpush2.bf16.msra.mxu0 %v7102_v41 }
 0x4a7   :  { %2986 = vmatpush2.bf16.msra.mxu1 %v7230_v44 }
 0x4a8   :  { %v2702_v45 = vpop.f32.mrf.mxu0  ;;  %2947 = vmatmul.mubr.bf16.vlgmr.msra.gmra.mxu0 %v9046_v12 }
 0x4aa   :  { %v2743_v48 = vpop.f32.mrf.mxu1  ;;  %2988 = vmatmul.mubr.bf16.vlgmr.msra.gmra.mxu1 %v9050_v15  ;;  %v2704_v52 = vpop.f32.mrf.mxu0 }
 0x4ab   :  { %v2744_v49 = vadd.f32 %v2743_v48, %v2702_v45 }
 0x4ac   :  { %v2745_v53 = vpop.f32.mrf.mxu1  ;;  %v2706_v56 = vpop.f32.mrf.mxu0 }
 0x4ad   :  { %v3004_v54 = vrot.slane %v2744_v49, 4  ;;  %v2746_v55 = vadd.f32 %v2745_v53, %v2704_v52 }
 0x4ae   :  { %v2747_v57 = vpop.f32.mrf.mxu1  ;;  %v2707_v60 = vpop.f32.mrf.mxu0 }
 0x4af   :  { %v3005_v58 = vadd.f32 %v3004_v54, %v2744_v49  ;;  %v3010_v59 = vrot.slane %v2746_v55, 4 }
 0x4b0   :  { %v2748_v61 = vpop.f32.mrf.mxu1 }
 0x4b1   :  { %v3006_v62 = vrot.slane %v3005_v58, 2  ;;  %v3011_v63 = vadd.f32 %v3010_v59, %v2746_v55 }
 0x4b3   :  { %v3007_v0 = vadd.f32 %v3006_v62, %v3005_v58  ;;  %v3012_v1 = vrot.slane %v3011_v63, 2 }
 0x4b5   :  { %v3008_v42 = vrot.slane %v3007_v0, 1  ;;  %v3013_v12 = vadd.f32 %v3012_v1, %v3011_v63 }
 0x4b7   :  { %v3009_v2 = vadd.f32 %v3008_v42, %v3007_v0  ;;  %v3014_v14 = vrot.slane %v3013_v12, 1 }
 0x4b9   :  { %v3052_v15 = vmul.f32 0.125, %v3009_v2  ;;  %v3015_v50 = vadd.f32 %v3014_v14, %v3013_v12 }
 0x4bb   :  { %v9070_v16 = vsub.f32 %v2744_v49, %v3052_v15  ;;  %v3053_v3 = vmul.f32 0.125, %v3015_v50 }
 0x4bd   :  { %v3068_v43 = vmul.f32 %v9070_v16, %v9070_v16  ;;  %v9074_v4 = vsub.f32 %v2746_v55, %v3053_v3 }
 0x4bf   :  { %v3076_v51 = vrot.slane %v3068_v43, 4  ;;  %v3069_v5 = vmul.f32 %v9074_v4, %v9074_v4 }
 0x4c1   :  { %v3077_v6 = vadd.f32 %v3076_v51, %v3068_v43  ;;  %v3082_v7 = vrot.slane %v3069_v5, 4 }
 0x4c3   :  { %v3078_v8 = vrot.slane %v3077_v6, 2  ;;  %v3083_v9 = vadd.f32 %v3082_v7, %v3069_v5 }
 0x4c5   :  { %v3079_v10 = vadd.f32 %v3078_v8, %v3077_v6  ;;  %v3084_v11 = vrot.slane %v3083_v9, 2 }
 0x4c7   :  { %v3080_v13 = vrot.slane %v3079_v10, 1  ;;  %v3085_v17 = vadd.f32 %v3084_v11, %v3083_v9 }
 0x4c9   :  { %v3081_v18 = vadd.f32 %v3080_v13, %v3079_v10  ;;  %v3086_v19 = vrot.slane %v3085_v17, 1 }
 0x4cb   :  { %v3124_v20 = vmul.f32 0.125, %v3081_v18  ;;  %v3087_v21 = vadd.f32 %v3086_v19, %v3085_v17 }
 0x4cd   :  { %v3132_v22 = vadd.f32 1e-05, %v3124_v20  ;;  %v3125_v23 = vmul.f32 0.125, %v3087_v21 }
 0x4cf   :  { %v3133_v24 = vadd.f32 1e-05, %v3125_v23  ;;  %8037 = vrsqrt.f32 %v3132_v22 }
 0x4d1   :  { %8039 = vrsqrt.f32 %v3133_v24 }
 0x4dc   :  { %v8038_v25 = vpop.eup %8037 }
 0x4de   :  { %v8040_v26 = vpop.eup %8039 }
 0x4df   :  { %v3156_v27 = vcombine.low %v8038_v25, %v8040_v26 }
 0x4e1   :  { %v9087_v19 = vrot.slane %v3156_v27, %v8989_v40 }
 0x4e8   :  { %v2784_v28 = vpop.f32.mrf.mxu0 }
 0x4ea   :  { %v2825_v29 = vpop.f32.mrf.mxu1  ;;  %v2786_v31 = vpop.f32.mrf.mxu0 }
 0x4eb   :  { %v2826_v30 = vadd.f32 %v2825_v29, %v2784_v28 }
 0x4ec   :  { %v2827_v32 = vpop.f32.mrf.mxu1  ;;  %v2788_v37 = vpop.f32.mrf.mxu0 }
 0x4ed   :  { %v3016_v33 = vrot.slane %v2826_v30, 4  ;;  %v2828_v36 = vadd.f32 %v2827_v32, %v2786_v31 }
 0x4ee   :  { %v2829_v39 = vpop.f32.mrf.mxu1  ;;  %v2789_v45 = vpop.f32.mrf.mxu0 }
 0x4ef   :  { %v3017_v41 = vadd.f32 %v3016_v33, %v2826_v30  ;;  %v3022_v44 = vrot.slane %v2828_v36, 4 }
 0x4f0   :  { %v2830_v48 = vpop.f32.mrf.mxu1 }
 0x4f1   :  { %v3018_v49 = vrot.slane %v3017_v41, 2  ;;  %v3023_v52 = vadd.f32 %v3022_v44, %v2828_v36 }
 0x4f3   :  { %v3019_v53 = vadd.f32 %v3018_v49, %v3017_v41  ;;  %v3024_v54 = vrot.slane %v3023_v52, 2 }
 0x4f5   :  { %v3020_v55 = vrot.slane %v3019_v53, 1  ;;  %v3025_v56 = vadd.f32 %v3024_v54, %v3023_v52 }
 0x4f7   :  { %v3021_v57 = vadd.f32 %v3020_v55, %v3019_v53  ;;  %v3026_v58 = vrot.slane %v3025_v56, 1 }
 0x4f9   :  { %v3054_v59 = vmul.f32 0.125, %v3021_v57  ;;  %v3027_v60 = vadd.f32 %v3026_v58, %v3025_v56 }
 0x4fb   :  { %v9078_v61 = vsub.f32 %v2826_v30, %v3054_v59  ;;  %v3055_v62 = vmul.f32 0.125, %v3027_v60 }
 0x4fd   :  { %v3070_v63 = vmul.f32 %v9078_v61, %v9078_v61  ;;  %v9082_v0 = vsub.f32 %v2828_v36, %v3055_v62 }
 0x4ff   :  { %v3088_v1 = vrot.slane %v3070_v63, 4  ;;  %v3071_v42 = vmul.f32 %v9082_v0, %v9082_v0 }
 0x501   :  { %v3089_v12 = vadd.f32 %v3088_v1, %v3070_v63  ;;  %v3094_v2 = vrot.slane %v3071_v42, 4 }
 0x503   :  { %v3090_v14 = vrot.slane %v3089_v12, 2  ;;  %v3095_v15 = vadd.f32 %v3094_v2, %v3071_v42 }
 0x505   :  { %v3091_v50 = vadd.f32 %v3090_v14, %v3089_v12  ;;  %v3096_v3 = vrot.slane %v3095_v15, 2 }
 0x507   :  { %v3092_v43 = vrot.slane %v3091_v50, 1  ;;  %v3097_v51 = vadd.f32 %v3096_v3, %v3095_v15 }
 0x509   :  { %v3093_v5 = vadd.f32 %v3092_v43, %v3091_v50  ;;  %v3098_v6 = vrot.slane %v3097_v51, 1 }
 0x50b   :  { %v3126_v7 = vmul.f32 0.125, %v3093_v5  ;;  %v3099_v8 = vadd.f32 %v3098_v6, %v3097_v51 }
 0x50d   :  { %v3134_v9 = vadd.f32 1e-05, %v3126_v7  ;;  %v3127_v10 = vmul.f32 0.125, %v3099_v8 }
 0x50f   :  { %v3135_v11 = vadd.f32 1e-05, %v3127_v10  ;;  %8041 = vrsqrt.f32 %v3134_v9 }
 0x511   :  { %8043 = vrsqrt.f32 %v3135_v11 }
 0x51c   :  { %v8042_v13 = vpop.eup %8041 }
 0x51e   :  { %v8044_v17 = vpop.eup %8043 }
 0x51f   :  { %v3157_v18 = vcombine.low %v8042_v13, %v8044_v17 }
 0x521   :  { %v9090_v20 = vrot.slane %v3157_v18, %v8989_v40 }
 0x523   :  { %v3188_v21 = vcombine.low %v9087_v19, %v9090_v20 }
 0x528   :  { %v2866_v22 = vpop.f32.mrf.mxu0 }
 0x52a   :  { %v2907_v23 = vpop.f32.mrf.mxu1  ;;  %v2868_v25 = vpop.f32.mrf.mxu0 }
 0x52b   :  { %v2908_v24 = vadd.f32 %v2907_v23, %v2866_v22 }
 0x52c   :  { %v2909_v26 = vpop.f32.mrf.mxu1  ;;  %v2870_v30 = vpop.f32.mrf.mxu0 }
 0x52d   :  { %v3028_v28 = vrot.slane %v2908_v24, 4  ;;  %v2910_v29 = vadd.f32 %v2909_v26, %v2868_v25 }
 0x52e   :  { %v2911_v31 = vpop.f32.mrf.mxu1  ;;  %v2871_v36 = vpop.f32.mrf.mxu0 }
 0x52f   :  { %v3029_v32 = vadd.f32 %v3028_v28, %v2908_v24  ;;  %v3034_v33 = vrot.slane %v2910_v29, 4 }
 0x530   :  { %v2912_v27 = vpop.f32.mrf.mxu1 }
 0x531   :  { %v3030_v37 = vrot.slane %v3029_v32, 2  ;;  %v3035_v39 = vadd.f32 %v3034_v33, %v2910_v29 }
 0x533   :  { %v3031_v41 = vadd.f32 %v3030_v37, %v3029_v32  ;;  %v3036_v44 = vrot.slane %v3035_v39, 2 }
 0x535   :  { %v3032_v45 = vrot.slane %v3031_v41, 1  ;;  %v3037_v48 = vadd.f32 %v3036_v44, %v3035_v39 }
 0x537   :  { %v3033_v49 = vadd.f32 %v3032_v45, %v3031_v41  ;;  %v3038_v52 = vrot.slane %v3037_v48, 1 }
 0x539   :  { %v3056_v53 = vmul.f32 0.125, %v3033_v49  ;;  %v3039_v54 = vadd.f32 %v3038_v52, %v3037_v48 }
 0x53b   :  { %v9094_v55 = vsub.f32 %v2908_v24, %v3056_v53  ;;  %v3057_v56 = vmul.f32 0.125, %v3039_v54 }
 0x53d   :  { %v3072_v57 = vmul.f32 %v9094_v55, %v9094_v55  ;;  %v9098_v58 = vsub.f32 %v2910_v29, %v3057_v56 }
 0x53f   :  { %v3100_v59 = vrot.slane %v3072_v57, 4  ;;  %v3073_v60 = vmul.f32 %v9098_v58, %v9098_v58 }
 0x541   :  { %v3101_v62 = vadd.f32 %v3100_v59, %v3072_v57  ;;  %v3106_v63 = vrot.slane %v3073_v60, 4 }
 0x543   :  { %v3102_v1 = vrot.slane %v3101_v62, 2  ;;  %v3107_v42 = vadd.f32 %v3106_v63, %v3073_v60 }
 0x545   :  { %v3103_v12 = vadd.f32 %v3102_v1, %v3101_v62  ;;  %v3108_v2 = vrot.slane %v3107_v42, 2 }
 0x547   :  { %v3104_v14 = vrot.slane %v3103_v12, 1  ;;  %v3109_v15 = vadd.f32 %v3108_v2, %v3107_v42 }
 0x549   :  { %v3105_v50 = vadd.f32 %v3104_v14, %v3103_v12  ;;  %v3110_v3 = vrot.slane %v3109_v15, 1 }
 0x54b   :  { %v3128_v43 = vmul.f32 0.125, %v3105_v50  ;;  %v3111_v51 = vadd.f32 %v3110_v3, %v3109_v15 }
 0x54d   :  { %v3136_v5 = vadd.f32 1e-05, %v3128_v43  ;;  %v3129_v6 = vmul.f32 0.125, %v3111_v51 }
 0x54f   :  { %v3137_v7 = vadd.f32 1e-05, %v3129_v6  ;;  %8045 = vrsqrt.f32 %v3136_v5 }
 0x551   :  { %8047 = vrsqrt.f32 %v3137_v7 }
 0x55c   :  { %v8046_v8 = vpop.eup %8045 }
 0x55e   :  { %v8048_v9 = vpop.eup %8047 }
 0x55f   :  { %v3158_v10 = vcombine.low %v8046_v8, %v8048_v9 }
 0x561   :  { %v3180_v9 = vrot.slane %v3158_v10, %v8989_v40  ;;  %v9121_v10 = vsub.s32 5, %v8986_v38 }
 0x568   :  { %v2948_v11 = vpop.f32.mrf.mxu0 }
 0x56a   :  { %v2989_v13 = vpop.f32.mrf.mxu1  ;;  %v2950_v18 = vpop.f32.mrf.mxu0 }
 0x56b   :  { %v2990_v17 = vadd.f32 %v2989_v13, %v2948_v11  ;;  %v2997_v11 = vld [vmem:[#allocation13 + $0x6] ss:$8 sm:$0xf] }
 0x56c   :  { %v2991_v22 = vpop.f32.mrf.mxu1  ;;  %v2952_v25 = vpop.f32.mrf.mxu0  ;;  %v2998_v13 = vld [vmem:[#allocation13 + $0x6] ss:$8 sm:$0xf0] }
 0x56d   :  { %v3040_v23 = vrot.slane %v2990_v17, 4  ;;  %v2992_v24 = vadd.f32 %v2991_v22, %v2950_v18  ;;  %v3001_v18 = vld [vmem:[#allocation13 + $0x7] ss:$8 sm:$0xf]  ;;  %v2999_v25 = vor.u32 %v2998_v13, %v2997_v11 }
 0x56e   :  { %v2993_v26 = vpop.f32.mrf.mxu1  ;;  %v2953_v30 = vpop.f32.mrf.mxu0  ;;  %v3002_v22 = vld [vmem:[#allocation13 + $0x7] ss:$8 sm:$0xf0] }
 0x56f   :  { %v3041_v28 = vadd.f32 %v3040_v23, %v2990_v17  ;;  %v3046_v29 = vrot.slane %v2992_v24, 4  ;;  %v3003_v26 = vor.u32 %v3002_v22, %v3001_v18  ;;  %v9118_v30 = vsub.s32 4, %v8986_v38 }
 0x570   :  { %v2994_v31 = vpop.f32.mrf.mxu1 }
 0x571   :  { %v3042_v32 = vrot.slane %v3041_v28, 2  ;;  %v3047_v33 = vadd.f32 %v3046_v29, %v2992_v24  ;;  %v9124_v31 = vsub.s32 6, %v8986_v38  ;;  %v3260_v19 = vrot.slane %v3003_v26, %v8994_v46 }
 0x572   :  { %v3264_v20 = vrot.slane %v3003_v26, %v8997_v47 }
 0x573   :  { %v3043_v36 = vadd.f32 %v3042_v32, %v3041_v28  ;;  %v3048_v27 = vrot.slane %v3047_v33, 2  ;;  %v3238_v32 = vsub.s32 7, %v8986_v38 }
 0x575   :  { %v3044_v37 = vrot.slane %v3043_v36, 1  ;;  %v3049_v39 = vadd.f32 %v3048_v27, %v3047_v33 }
 0x577   :  { %v3045_v41 = vadd.f32 %v3044_v37, %v3043_v36  ;;  %v3050_v44 = vrot.slane %v3049_v39, 1  ;;  %v3276_v36 = vrot.slane %v3003_v26, %v9118_v30 }
 0x579   :  { %v3058_v45 = vmul.f32 0.125, %v3045_v41  ;;  %v3051_v48 = vadd.f32 %v3050_v44, %v3049_v39 }
 0x57b   :  { %v9102_v49 = vsub.f32 %v2990_v17, %v3058_v45  ;;  %v3059_v52 = vmul.f32 0.125, %v3051_v48 }
 0x57d   :  { %v3074_v53 = vmul.f32 %v9102_v49, %v9102_v49  ;;  %v9106_v54 = vsub.f32 %v2992_v24, %v3059_v52  ;;  %v3196_v24 = vrot.slane %v3188_v21, %v8989_v40  ;;  %v3268_v21 = vrot.slane %v3003_v26, %v9029_v34 }
 0x57f   :  { %v3112_v56 = vrot.slane %v3074_v53, 4  ;;  %v3075_v57 = vmul.f32 %v9106_v54, %v9106_v54 }
 0x581   :  { %v3113_v59 = vadd.f32 %v3112_v56, %v3074_v53  ;;  %v3118_v60 = vrot.slane %v3075_v57, 4 }
 0x583   :  { %v3114_v62 = vrot.slane %v3113_v59, 2  ;;  %v3119_v63 = vadd.f32 %v3118_v60, %v3075_v57 }
 0x585   :  { %v3115_v1 = vadd.f32 %v3114_v62, %v3113_v59  ;;  %v3120_v42 = vrot.slane %v3119_v63, 2  ;;  %v3280_v62 = vrot.slane %v3003_v26, %v9121_v10 }
 0x587   :  { %v3116_v12 = vrot.slane %v3115_v1, 1  ;;  %v3121_v2 = vadd.f32 %v3120_v42, %v3119_v63  ;;  %v3284_v63 = vrot.slane %v3003_v26, %v9124_v31 }
 0x589   :  { %v3117_v14 = vadd.f32 %v3116_v12, %v3115_v1  ;;  %v3122_v15 = vrot.slane %v3121_v2, 1 }
 0x58b   :  { %v3130_v50 = vmul.f32 0.125, %v3117_v14  ;;  %v3123_v3 = vadd.f32 %v3122_v15, %v3121_v2 }
 0x58d   :  { %v3138_v43 = vadd.f32 1e-05, %v3130_v50  ;;  %v3131_v51 = vmul.f32 0.125, %v3123_v3 }
 0x58f   :  { %v3139_v5 = vadd.f32 1e-05, %v3131_v51  ;;  %8049 = vrsqrt.f32 %v3138_v43 }
 0x591   :  { %8051 = vrsqrt.f32 %v3139_v5 }
 0x59c   :  { %v8050_v6 = vpop.eup %8049 }
 0x59e   :  { %v8052_v7 = vpop.eup %8051 }
 0x59f   :  { %v3159_v8 = vcombine.low %v8050_v6, %v8052_v7 }
 0x5a1   :  { %v3187_v17 = vrot.slane %v3159_v8, %v8989_v40 }
 0x5a3   :  { %v3189_v23 = vcombine.low %v3180_v9, %v3187_v17 }
 0x5a5   :  { %v3203_v28 = vrot.slane %v3189_v23, %v8989_v40  ;;  %v3272_v40 = vrot.slane %v3003_v26, %v9032_v35 }
 0x5a7   :  { %v3204_v29 = vcombine.low %v3196_v24, %v3203_v28 }
 0x5a9   :  { %v3206_v33 = vmul.f32 %v3204_v29, %v2999_v25 }
 0x5ab   :  { %v3211_v27 = vrot.slane %v3206_v33, %v8994_v46  ;;  %v3215_v37 = vrot.slane %v3206_v33, %v8997_v47  ;;  %v3219_v39 = vrot.slane %v3206_v33, %v9029_v34  ;;  %v3223_v41 = vrot.slane %v3206_v33, %v9032_v35 }
 0x5ac   :  { %v3227_v38 = vrot.slane %v3206_v33, %v9118_v30  ;;  %v3231_v44 = vrot.slane %v3206_v33, %v9121_v10  ;;  %v3235_v45 = vrot.slane %v3206_v33, %v9124_v31  ;;  %v3239_v48 = vrot.slane %v3206_v33, %v3238_v32 }
 0x5ad   :  { %v3248_v52 = vmul.f32 %v3211_v27, %v9070_v16  ;;  %v3249_v53 = vmul.f32 %v3215_v37, %v9074_v4  ;;  %v3250_v56 = vmul.f32 %v3219_v39, %v9078_v61  ;;  %v3251_v57 = vmul.f32 %v3223_v41, %v9082_v0 }
 0x5ae   :  { %v3252_v59 = vmul.f32 %v3227_v38, %v9094_v55  ;;  %v3253_v60 = vmul.f32 %v3231_v44, %v9098_v58  ;;  %v3254_v1 = vmul.f32 %v3235_v45, %v9102_v49  ;;  %v3255_v16 = vmul.f32 %v3239_v48, %v9106_v54 }
 0x5af   :  { %v3297_v42 = vadd.f32 %v3260_v19, %v3248_v52  ;;  %v3298_v12 = vadd.f32 %v3264_v20, %v3249_v53  ;;  %v3299_v2 = vadd.f32 %v3268_v21, %v3250_v56  ;;  %v3288_v4 = vrot.slane %v3003_v26, %v3238_v32 }
 0x5b0   :  { %v3300_v14 = vadd.f32 %v3272_v40, %v3251_v57  ;;  %v3301_v61 = vadd.f32 %v3276_v36, %v3252_v59  ;;  %v3302_v15 = vadd.f32 %v3280_v62, %v3253_v60  ;;  %v3303_v0 = vadd.f32 %v3284_v63, %v3254_v1 }
 0x5b1   :  { %v3313_v50 = vmul.f32 0.70710677, %v3297_v42  ;;  %v3314_v55 = vmul.f32 0.70710677, %v3298_v12  ;;  %v3315_v3 = vmul.f32 0.70710677, %v3299_v2  ;;  %v3304_v58 = vadd.f32 %v3288_v4, %v3255_v16 }
 0x5b2   :  { %v3316_v43 = vmul.f32 0.70710677, %v3300_v14  ;;  %v3317_v51 = vmul.f32 0.70710677, %v3301_v61  ;;  %v3318_v5 = vmul.f32 0.70710677, %v3302_v15 }
 0x5b3   :  { %8053 = verf.f32 %v3313_v50  ;;  %v3319_v49 = vmul.f32 0.70710677, %v3303_v0  ;;  %v3320_v6 = vmul.f32 0.70710677, %v3304_v58  ;;  %v3305_v8 = vmul.f32 0.5, %v3297_v42 }
 0x5b4   :  { %8055 = verf.f32 %v3314_v55  ;;  %v3306_v13 = vmul.f32 0.5, %v3298_v12  ;;  %v3307_v22 = vmul.f32 0.5, %v3299_v2  ;;  %v3308_v26 = vmul.f32 0.5, %v3300_v14 }
 0x5b5   :  { %8057 = verf.f32 %v3315_v3  ;;  %v3309_v33 = vmul.f32 0.5, %v3301_v61  ;;  %v3310_v36 = vmul.f32 0.5, %v3302_v15  ;;  %v3311_v38 = vmul.f32 0.5, %v3303_v0 }
 0x5b6   :  { %8059 = verf.f32 %v3316_v43  ;;  %v3312_v52 = vmul.f32 0.5, %v3304_v58 }
 0x5b7   :  { %8061 = verf.f32 %v3317_v51 }
 0x5b8   :  { %8063 = verf.f32 %v3318_v5 }
 0x5b9   :  { %8065 = verf.f32 %v3319_v49 }
 0x5ba   :  { %8067 = verf.f32 %v3320_v6 }
 0x5c0   :  { %v8054_v54 = vpop.eup %8053 }
 0x5c1   :  { %v8056_v7 = vpop.eup %8055  ;;  %v3329_v9 = vadd.f32 1.0, %v8054_v54 }
 0x5c2   :  { %v8058_v11 = vpop.eup %8057  ;;  %v3330_v17 = vadd.f32 1.0, %v8056_v7 }
 0x5c3   :  { %v8060_v18 = vpop.eup %8059  ;;  %v3331_v23 = vadd.f32 1.0, %v8058_v11  ;;  %v3337_v24 = vmul.f32 %v3329_v9, %v3305_v8 }
 0x5c4   :  { %v8062_v25 = vpop.eup %8061  ;;  %v3332_v28 = vadd.f32 1.0, %v8060_v18  ;;  %v3338_v29 = vmul.f32 %v3330_v17, %v3306_v13 }
 0x5c5   :  { %v8064_v32 = vpop.eup %8063  ;;  %v3333_v19 = vadd.f32 1.0, %v8062_v25  ;;  %v3339_v20 = vmul.f32 %v3331_v23, %v3307_v22  ;;  %v9149_v21 = vpack.c.bf16 %v3337_v24, %v3337_v24 }
 0x5c6   :  { %v8066_v40 = vpop.eup %8065  ;;  %v3334_v27 = vadd.f32 1.0, %v8064_v32  ;;  %v3340_v37 = vmul.f32 %v3332_v28, %v3308_v26  ;;  %v9151_v39 = vpack.c.bf16 %v3338_v29, %v3338_v29 }
 0x5c7   :  { %v8068_v41 = vpop.eup %8067  ;;  %v3335_v44 = vadd.f32 1.0, %v8066_v40  ;;  %v3341_v45 = vmul.f32 %v3333_v19, %v3309_v33  ;;  %v9153_v48 = vpack.c.bf16 %v3339_v20, %v3339_v20 }
 0x5c8   :  { %v3336_v53 = vadd.f32 1.0, %v8068_v41  ;;  %v3342_v56 = vmul.f32 %v3334_v27, %v3310_v36  ;;  %v9155_v57 = vpack.c.bf16 %v3340_v37, %v3340_v37 }
 0x5c9   :  { %v3343_v59 = vmul.f32 %v3335_v44, %v3311_v38  ;;  %v9157_v60 = vpack.c.bf16 %v3341_v45, %v3341_v45 }
 0x5ca   :  { %v3344_v62 = vmul.f32 %v3336_v53, %v3312_v52  ;;  %v9159_v63 = vpack.c.bf16 %v3342_v56, %v3342_v56 }
 0x5cb   :  { %v9161_v1 = vpack.c.bf16 %v3343_v59, %v3343_v59 }
 0x5cc   :  { %v9163_v42 = vpack.c.bf16 %v3344_v62, %v3344_v62 }
 0x5cd   :  { %8905 = dma.done.wait [#allocation4 + $0x1], 57344 }
 0x5ce   :  { %8906 = vsyncadd [#allocation4 + $0x1], 4294909952  ;;  %6245 = vmatprep.mubr.bf16.mxu0 %v9151_v39  ;;  %6286 = vmatprep.mubr.bf16.mxu1 %v9155_v57  ;;  %v8069_v12 = vld [vmem:[#allocation3 + $0x18c] ss:$28 sps:$4 sm:$0xff]   ;;  %v8075_v14 = vld [vmem:[#allocation3 + $0x154] ss:$28 sps:$4 sm:$0xff]  }
 0x5cf   :  { %v8071_v2 = vld [vmem:[#allocation3 + $0x50c] ss:$28 sps:$4 sm:$0xff]   ;;  %6213 = vmatprep.subr.bf16.mxu0 %v8069_v12  ;;  %v8077_v61 = vld [vmem:[#allocation3 + $0x4d4] ss:$28 sps:$4 sm:$0xff]   ;;  %v8081_v50 = vld [vmem:[#allocation3 + $0x11c] ss:$28 sps:$4 sm:$0xff]  }
 0x5d0   :  { %v8073_v16 = vld [vmem:[#allocation3 + $0x188] ss:$28 sps:$4 sm:$0xff]   ;;  %6254 = vmatprep.subr.bf16.mxu1 %v8071_v2  ;;  %v8079_v15 = vld [vmem:[#allocation3 + $0x150] ss:$28 sps:$4 sm:$0xff]   ;;  %v8083_v55 = vld [vmem:[#allocation3 + $0x49c] ss:$28 sps:$4 sm:$0xff]  }
 0x5d1   :  { %v8074_v4 = vld [vmem:[#allocation3 + $0x508] ss:$28 sps:$4 sm:$0xff]   ;;  %6214 = vmatpush1.bf16.msra.mxu0 %v8073_v16  ;;  %v8080_v0 = vld [vmem:[#allocation3 + $0x4d0] ss:$28 sps:$4 sm:$0xff]   ;;  %v8085_v3 = vld [vmem:[#allocation3 + $0x118] ss:$28 sps:$4 sm:$0xff]  }
 0x5d2   :  { %6255 = vmatpush1.bf16.msra.mxu1 %v8074_v4  ;;  %6215 = vmatprep.subr.bf16.mxu0 %v8075_v14  ;;  %v8086_v58 = vld [vmem:[#allocation3 + $0x498] ss:$28 sps:$4 sm:$0xff]   ;;  %v8087_v43 = vld [vmem:[#allocation3 + $0xe4] ss:$28 sps:$4 sm:$0xff]   ;;  %v8093_v6 = vld [vmem:[#allocation3 + $0xac] ss:$28 sps:$4 sm:$0xff]  }
 0x5d3   :  { %6256 = vmatprep.subr.bf16.mxu1 %v8077_v61  ;;  %v8089_v51 = vld [vmem:[#allocation3 + $0x464] ss:$28 sps:$4 sm:$0xff]   ;;  %v8095_v54 = vld [vmem:[#allocation3 + $0x42c] ss:$28 sps:$4 sm:$0xff]   ;;  %v8099_v9 = vld [vmem:[#allocation3 + $0x74] ss:$28 sps:$4 sm:$0xff]  }
 0x5d4   :  { %v8091_v5 = vld [vmem:[#allocation3 + $0xe0] ss:$28 sps:$4 sm:$0xff]   ;;  %v8097_v7 = vld [vmem:[#allocation3 + $0xa8] ss:$28 sps:$4 sm:$0xff]   ;;  %v8101_v11 = vld [vmem:[#allocation3 + $0x3f4] ss:$28 sps:$4 sm:$0xff]  }
 0x5d5   :  { %6216 = vmatpush1.bf16.msra.mxu0 %v8079_v15  ;;  %v8092_v49 = vld [vmem:[#allocation3 + $0x460] ss:$28 sps:$4 sm:$0xff]   ;;  %v8098_v8 = vld [vmem:[#allocation3 + $0x428] ss:$28 sps:$4 sm:$0xff]   ;;  %v8103_v13 = vld [vmem:[#allocation3 + $0x70] ss:$28 sps:$4 sm:$0xff]  }
 0x5d6   :  { %6257 = vmatpush1.bf16.msra.mxu1 %v8080_v0  ;;  %6217 = vmatprep.subr.bf16.mxu0 %v8081_v50  ;;  %v8104_v17 = vld [vmem:[#allocation3 + $0x3f0] ss:$28 sps:$4 sm:$0xff]   ;;  %v8105_v18 = vld [vmem:[#allocation3 + $0x3c] ss:$28 sps:$4 sm:$0xff]   ;;  %v8111_v25 = vld [vmem:[#allocation3 + $0x4] ss:$28 sps:$4 sm:$0xff]  }
 0x5d7   :  { %6258 = vmatprep.subr.bf16.mxu1 %v8083_v55  ;;  %v8107_v22 = vld [vmem:[#allocation3 + $0x3bc] ss:$28 sps:$4 sm:$0xff]   ;;  %v8113_v26 = vld [vmem:[#allocation3 + $0x384] ss:$28 sps:$4 sm:$0xff]   ;;  %v8117_v32 = vld [vmem:[#allocation3 + $0x34c] ss:$28 sps:$4 sm:$0xff]  }
 0x5d8   :  { %v8109_v23 = vld [vmem:[#allocation3 + $0x38] ss:$28 sps:$4 sm:$0xff]   ;;  %v8115_v28 = vld [vmem:[#allocation3] ss:$28 sps:$4 sm:$0xff]   ;;  %v8119_v33 = vld [vmem:[#allocation3 + $0x6cc] ss:$28 sps:$4 sm:$0xff]  }
 0x5d9   :  { %6218 = vmatpush1.bf16.msra.mxu0 %v8085_v3  ;;  %v8110_v24 = vld [vmem:[#allocation3 + $0x3b8] ss:$28 sps:$4 sm:$0xff]   ;;  %v8116_v29 = vld [vmem:[#allocation3 + $0x380] ss:$28 sps:$4 sm:$0xff]   ;;  %v8121_v19 = vld [vmem:[#allocation3 + $0x348] ss:$28 sps:$4 sm:$0xff]  }
 0x5da   :  { %6259 = vmatpush1.bf16.msra.mxu1 %v8086_v58  ;;  %6219 = vmatprep.subr.bf16.mxu0 %v8087_v43  ;;  %v8122_v20 = vld [vmem:[#allocation3 + $0x6c8] ss:$28 sps:$4 sm:$0xff]   ;;  %v8123_v40 = vld [vmem:[#allocation3 + $0x314] ss:$28 sps:$4 sm:$0xff]   ;;  %v8129_v41 = vld [vmem:[#allocation3 + $0x2dc] ss:$28 sps:$4 sm:$0xff]  }
 0x5db   :  { %6260 = vmatprep.subr.bf16.mxu1 %v8089_v51  ;;  %v8125_v36 = vld [vmem:[#allocation3 + $0x694] ss:$28 sps:$4 sm:$0xff]   ;;  %v8131_v38 = vld [vmem:[#allocation3 + $0x65c] ss:$28 sps:$4 sm:$0xff]   ;;  %v8135_v52 = vld [vmem:[#allocation3 + $0x2a4] ss:$28 sps:$4 sm:$0xff]  }
 0x5dc   :  { %v8127_v27 = vld [vmem:[#allocation3 + $0x310] ss:$28 sps:$4 sm:$0xff]   ;;  %v8133_v44 = vld [vmem:[#allocation3 + $0x2d8] ss:$28 sps:$4 sm:$0xff]   ;;  %v8137_v53 = vld [vmem:[#allocation3 + $0x624] ss:$28 sps:$4 sm:$0xff]  }
 0x5dd   :  { %6220 = vmatpush1.bf16.msra.mxu0 %v8091_v5  ;;  %v8128_v37 = vld [vmem:[#allocation3 + $0x690] ss:$28 sps:$4 sm:$0xff]   ;;  %v8134_v45 = vld [vmem:[#allocation3 + $0x658] ss:$28 sps:$4 sm:$0xff]   ;;  %v8139_v56 = vld [vmem:[#allocation3 + $0x2a0] ss:$28 sps:$4 sm:$0xff]  }
 0x5de   :  { %6261 = vmatpush1.bf16.msra.mxu1 %v8092_v49  ;;  %6221 = vmatprep.subr.bf16.mxu0 %v8093_v6  ;;  %v8140_v59 = vld [vmem:[#allocation3 + $0x620] ss:$28 sps:$4 sm:$0xff]   ;;  %v8141_v62 = vld [vmem:[#allocation3 + $0x26c] ss:$28 sps:$4 sm:$0xff]   ;;  %v8147_v4 = vld [vmem:[#allocation3 + $0x234] ss:$28 sps:$4 sm:$0xff]  }
 0x5df   :  { %6262 = vmatprep.subr.bf16.mxu1 %v8095_v54  ;;  %v8143_v12 = vld [vmem:[#allocation3 + $0x5ec] ss:$28 sps:$4 sm:$0xff]   ;;  %v8149_v14 = vld [vmem:[#allocation3 + $0x5b4] ss:$28 sps:$4 sm:$0xff]   ;;  %v8153_v0 = vld [vmem:[#allocation3 + $0x1fc] ss:$28 sps:$4 sm:$0xff]  }
 0x5e0   :  { %v8145_v2 = vld [vmem:[#allocation3 + $0x268] ss:$28 sps:$4 sm:$0xff]   ;;  %v8151_v61 = vld [vmem:[#allocation3 + $0x230] ss:$28 sps:$4 sm:$0xff]   ;;  %v8155_v50 = vld [vmem:[#allocation3 + $0x57c] ss:$28 sps:$4 sm:$0xff]  }
 0x5e1   :  { %6222 = vmatpush1.bf16.msra.mxu0 %v8097_v7  ;;  %v8146_v16 = vld [vmem:[#allocation3 + $0x5e8] ss:$28 sps:$4 sm:$0xff]   ;;  %v8152_v15 = vld [vmem:[#allocation3 + $0x5b0] ss:$28 sps:$4 sm:$0xff]   ;;  %v8157_v55 = vld [vmem:[#allocation3 + $0x1f8] ss:$28 sps:$4 sm:$0xff]  }
 0x5e2   :  { %6263 = vmatpush1.bf16.msra.mxu1 %v8098_v8  ;;  %6223 = vmatprep.subr.bf16.mxu0 %v8099_v9  ;;  %v8158_v3 = vld [vmem:[#allocation3 + $0x578] ss:$28 sps:$4 sm:$0xff]   ;;  %v8159_v58 = vld [vmem:[#allocation3 + $0x1c4] ss:$28 sps:$4 sm:$0xff]   ;;  %v8167_v49 = vld [vmem:[#allocation3 + $0x88c] ss:$28 sps:$4 sm:$0xff]  }
 0x5e3   :  { %6264 = vmatprep.subr.bf16.mxu1 %v8101_v11  ;;  %v8161_v43 = vld [vmem:[#allocation3 + $0x544] ss:$28 sps:$4 sm:$0xff]   ;;  %v8170_v6 = vld [vmem:[#allocation3 + $0xc0c] ss:$28 sps:$4 sm:$0xff]   ;;  %v8173_v8 = vld [vmem:[#allocation3 + $0x854] ss:$28 sps:$4 sm:$0xff]  }
 0x5e4   :  { %v8163_v51 = vld [vmem:[#allocation3 + $0x1c0] ss:$28 sps:$4 sm:$0xff]   ;;  %v8165_v54 = vld [vmem:[#allocation3 + $0x888] ss:$28 sps:$4 sm:$0xff]   ;;  %v8176_v9 = vld [vmem:[#allocation3 + $0xbd4] ss:$28 sps:$4 sm:$0xff]  }
 0x5e5   :  { %6224 = vmatpush1.bf16.msra.mxu0 %v8103_v13  ;;  %v8164_v5 = vld [vmem:[#allocation3 + $0x540] ss:$28 sps:$4 sm:$0xff]   ;;  %v8168_v7 = vld [vmem:[#allocation3 + $0xc08] ss:$28 sps:$4 sm:$0xff]   ;;  %v8171_v11 = vld [vmem:[#allocation3 + $0x850] ss:$28 sps:$4 sm:$0xff]  }
 0x5e6   :  { %6265 = vmatpush1.bf16.msra.mxu1 %v8104_v17  ;;  %6225 = vmatprep.subr.bf16.mxu0 %v8105_v18  ;;  %v8174_v13 = vld [vmem:[#allocation3 + $0xbd0] ss:$28 sps:$4 sm:$0xff]   ;;  %v8179_v17 = vld [vmem:[#allocation3 + $0x81c] ss:$28 sps:$4 sm:$0xff]   ;;  %s8927_s4 = smov [#allocation14]  }
 0x5e7   :  { %6266 = vmatprep.subr.bf16.mxu1 %v8107_v22  ;;  %v8182_v18 = vld [vmem:[#allocation3 + $0xb9c] ss:$28 sps:$4 sm:$0xff]   ;;  %s6920_s5 = sshll.u32 %s8927_s4, 4  ;;  %s6921_s5 = int_to_ptr.vmem [resolvable:$true] %s6920_s5 }
 0x5e8   :  { %v8177_v22 = vld [vmem:[#allocation3 + $0x818] ss:$28 sps:$4 sm:$0xff]   ;;  %s8877_s15 = scalar_lea.vmem %s6921_s5, 896  ;;  %p8882_p8 = scmp.lt.s32.totalorder %s6921_s5, %s6921_s5 }
 0x5e9   :  { %6226 = vmatpush1.bf16.msra.mxu0 %v8109_v23  ;;  %v8180_v23 = vld [vmem:[#allocation3 + $0xb98] ss:$28 sps:$4 sm:$0xff]   ;;  %p8878_p7 = scmp.ne.s32.totalorder %s6921_s5, %s8877_s15  ;;  %p8883_p9 = scmp.lt.s32.totalorder %s8877_s15, %s8877_s15 }
 0x5ea   :  { %6267 = vmatpush1.bf16.msra.mxu1 %v8110_v24  ;;  %6227 = vmatprep.subr.bf16.mxu0 %v8111_v25  ;;  %v8185_v24 = vld [vmem:[#allocation3 + $0x7e4] ss:$28 sps:$4 sm:$0xff]  }
 0x5eb   :  { %6268 = vmatprep.subr.bf16.mxu1 %v8113_v26  ;;  %v8188_v25 = vld [vmem:[#allocation3 + $0xb64] ss:$28 sps:$4 sm:$0xff]   ;;  %p8884_p10 = por %p8883_p9, %p8882_p8 }
 0x5ec   :  { %v8183_v26 = vld [vmem:[#allocation3 + $0x7e0] ss:$28 sps:$4 sm:$0xff]  }
 0x5ed   :  { %6228 = vmatpush1.bf16.msra.mxu0 %v8115_v28  ;;  %v8186_v28 = vld [vmem:[#allocation3 + $0xb60] ss:$28 sps:$4 sm:$0xff]   ;;  %p8885_p11 = pnand %p8884_p10, %p8878_p7 }
 0x5ee   :  { %6269 = vmatpush1.bf16.msra.mxu1 %v8116_v29  ;;  %6229 = vmatprep.subr.bf16.mxu0 %v8117_v32  ;;  %v8191_v29 = vld [vmem:[#allocation3 + $0x7ac] ss:$28 sps:$4 sm:$0xff]  }
 0x5ef   :  { %6270 = vmatprep.subr.bf16.mxu1 %v8119_v33  ;;  %v8194_v32 = vld [vmem:[#allocation3 + $0xb2c] ss:$28 sps:$4 sm:$0xff]  }
 0x5f0   :  { %v8189_v33 = vld [vmem:[#allocation3 + $0x7a8] ss:$28 sps:$4 sm:$0xff]  }
 0x5f1   :  { %6230 = vmatpush2.bf16.msra.mxu0 %v8121_v19  ;;  %v8192_v19 = vld [vmem:[#allocation3 + $0xb28] ss:$28 sps:$4 sm:$0xff]  }
 0x5f2   :  { %6271 = vmatpush2.bf16.msra.mxu1 %v8122_v20  ;;  %6231 = vmatprep.subr.bf16.mxu0 %v8123_v40  ;;  %v8197_v20 = vld [vmem:[#allocation3 + $0x774] ss:$28 sps:$4 sm:$0xff]  }
 0x5f3   :  { %6272 = vmatprep.subr.bf16.mxu1 %v8125_v36  ;;  %v8200_v40 = vld [vmem:[#allocation3 + $0xaf4] ss:$28 sps:$4 sm:$0xff]  }
 0x5f4   :  { %v8195_v36 = vld [vmem:[#allocation3 + $0x770] ss:$28 sps:$4 sm:$0xff]  }
 0x5f5   :  { %6232 = vmatpush2.bf16.msra.mxu0 %v8127_v27  ;;  %v8198_v27 = vld [vmem:[#allocation3 + $0xaf0] ss:$28 sps:$4 sm:$0xff]  }
 0x5f6   :  { %6273 = vmatpush2.bf16.msra.mxu1 %v8128_v37  ;;  %6233 = vmatprep.subr.bf16.mxu0 %v8129_v41  ;;  %v8203_v37 = vld [vmem:[#allocation3 + $0x73c] ss:$28 sps:$4 sm:$0xff]  }
 0x5f7   :  { %6274 = vmatprep.subr.bf16.mxu1 %v8131_v38  ;;  %v8206_v41 = vld [vmem:[#allocation3 + $0xabc] ss:$28 sps:$4 sm:$0xff]  }
 0x5f8   :  { %v8201_v38 = vld [vmem:[#allocation3 + $0x738] ss:$28 sps:$4 sm:$0xff]  }
 0x5f9   :  { %6234 = vmatpush2.bf16.msra.mxu0 %v8133_v44  ;;  %v8204_v44 = vld [vmem:[#allocation3 + $0xab8] ss:$28 sps:$4 sm:$0xff]  }
 0x5fa   :  { %6275 = vmatpush2.bf16.msra.mxu1 %v8134_v45  ;;  %6235 = vmatprep.subr.bf16.mxu0 %v8135_v52  ;;  %v8209_v45 = vld [vmem:[#allocation3 + $0x704] ss:$28 sps:$4 sm:$0xff]  }
 0x5fb   :  { %6276 = vmatprep.subr.bf16.mxu1 %v8137_v53  ;;  %v8212_v52 = vld [vmem:[#allocation3 + $0xa84] ss:$28 sps:$4 sm:$0xff]  }
 0x5fc   :  { %v8207_v53 = vld [vmem:[#allocation3 + $0x700] ss:$28 sps:$4 sm:$0xff]  }
 0x5fd   :  { %6236 = vmatpush2.bf16.msra.mxu0 %v8139_v56  ;;  %v8210_v56 = vld [vmem:[#allocation3 + $0xa80] ss:$28 sps:$4 sm:$0xff]  }
 0x5fe   :  { %6277 = vmatpush2.bf16.msra.mxu1 %v8140_v59  ;;  %6237 = vmatprep.subr.bf16.mxu0 %v8141_v62  ;;  %v8215_v59 = vld [vmem:[#allocation3 + $0xa4c] ss:$28 sps:$4 sm:$0xff]  }
 0x5ff   :  { %6278 = vmatprep.subr.bf16.mxu1 %v8143_v12  ;;  %v8218_v62 = vld [vmem:[#allocation3 + $0xdcc] ss:$28 sps:$4 sm:$0xff]  }
 0x600   :  { %v8213_v12 = vld [vmem:[#allocation3 + $0xa48] ss:$28 sps:$4 sm:$0xff]  }
 0x601   :  { %6238 = vmatpush2.bf16.msra.mxu0 %v8145_v2  ;;  %v8216_v2 = vld [vmem:[#allocation3 + $0xdc8] ss:$28 sps:$4 sm:$0xff]  }
 0x602   :  { %6279 = vmatpush2.bf16.msra.mxu1 %v8146_v16  ;;  %6239 = vmatprep.subr.bf16.mxu0 %v8147_v4  ;;  %v8221_v16 = vld [vmem:[#allocation3 + $0xa14] ss:$28 sps:$4 sm:$0xff]  }
 0x603   :  { %6280 = vmatprep.subr.bf16.mxu1 %v8149_v14  ;;  %v8224_v4 = vld [vmem:[#allocation3 + $0xd94] ss:$28 sps:$4 sm:$0xff]  }
 0x604   :  { %v8219_v14 = vld [vmem:[#allocation3 + $0xa10] ss:$28 sps:$4 sm:$0xff]  }
 0x605   :  { %6240 = vmatpush2.bf16.msra.mxu0 %v8151_v61  ;;  %v8222_v61 = vld [vmem:[#allocation3 + $0xd90] ss:$28 sps:$4 sm:$0xff]  }
 0x606   :  { %6281 = vmatpush2.bf16.msra.mxu1 %v8152_v15  ;;  %6241 = vmatprep.subr.bf16.mxu0 %v8153_v0  ;;  %v8227_v15 = vld [vmem:[#allocation3 + $0x9dc] ss:$28 sps:$4 sm:$0xff]  }
 0x607   :  { %6282 = vmatprep.subr.bf16.mxu1 %v8155_v50  ;;  %v8230_v0 = vld [vmem:[#allocation3 + $0xd5c] ss:$28 sps:$4 sm:$0xff]  }
 0x608   :  { %v8225_v50 = vld [vmem:[#allocation3 + $0x9d8] ss:$28 sps:$4 sm:$0xff]  }
 0x609   :  { %6242 = vmatpush2.bf16.msra.mxu0 %v8157_v55  ;;  %v8228_v55 = vld [vmem:[#allocation3 + $0xd58] ss:$28 sps:$4 sm:$0xff]  }
 0x60a   :  { %6283 = vmatpush2.bf16.msra.mxu1 %v8158_v3  ;;  %6243 = vmatprep.subr.bf16.mxu0 %v8159_v58  ;;  %v8233_v3 = vld [vmem:[#allocation3 + $0x9a4] ss:$28 sps:$4 sm:$0xff]  }
 0x60b   :  { %6284 = vmatprep.subr.bf16.mxu1 %v8161_v43  ;;  %v8236_v58 = vld [vmem:[#allocation3 + $0xd24] ss:$28 sps:$4 sm:$0xff]  }
 0x60c   :  { %v8231_v43 = vld [vmem:[#allocation3 + $0x9a0] ss:$28 sps:$4 sm:$0xff]  }
 0x60d   :  { %6244 = vmatpush2.bf16.msra.mxu0 %v8163_v51  ;;  %v8234_v51 = vld [vmem:[#allocation3 + $0xd20] ss:$28 sps:$4 sm:$0xff]  }
 0x60e   :  { %6285 = vmatpush2.bf16.msra.mxu1 %v8164_v5  ;;  %6295 = vmatprep.subr.bf16.mxu0 %v8167_v49  ;;  %v8239_v5 = vld [vmem:[#allocation3 + $0x96c] ss:$28 sps:$4 sm:$0xff]  }
 0x60f   :  { %6336 = vmatprep.subr.bf16.mxu1 %v8170_v6  ;;  %v8242_v49 = vld [vmem:[#allocation3 + $0xcec] ss:$28 sps:$4 sm:$0xff]  }
 0x610   :  { %6246 = vmatmul.mubr.bf16.vlgmr.msra.gmra.mxu0 %v9149_v21  ;;  %v8237_v6 = vld [vmem:[#allocation3 + $0x968] ss:$28 sps:$4 sm:$0xff]  }
 0x611   :  { %6287 = vmatmul.mubr.bf16.vlgmr.msra.gmra.mxu1 %v9153_v48  ;;  %6296 = vmatpush1.bf16.msra.mxu0 %v8165_v54  ;;  %v8240_v54 = vld [vmem:[#allocation3 + $0xce8] ss:$28 sps:$4 sm:$0xff]  }
 0x612   :  { %6337 = vmatpush1.bf16.msra.mxu1 %v8168_v7  ;;  %6297 = vmatprep.subr.bf16.mxu0 %v8173_v8  ;;  %v8245_v7 = vld [vmem:[#allocation3 + $0x934] ss:$28 sps:$4 sm:$0xff]  }
 0x613   :  { %6338 = vmatprep.subr.bf16.mxu1 %v8176_v9  ;;  %6327 = vmatprep.mubr.bf16.mxu0 %v9159_v63  ;;  %v8248_v8 = vld [vmem:[#allocation3 + $0xcb4] ss:$28 sps:$4 sm:$0xff]  }
 0x614   :  { %6368 = vmatprep.mubr.bf16.mxu1 %v9163_v42  ;;  %v8243_v9 = vld [vmem:[#allocation3 + $0x930] ss:$28 sps:$4 sm:$0xff]  }
 0x615   :  { %6298 = vmatpush1.bf16.msra.mxu0 %v8171_v11  ;;  %v8246_v11 = vld [vmem:[#allocation3 + $0xcb0] ss:$28 sps:$4 sm:$0xff]  }
 0x616   :  { %6339 = vmatpush1.bf16.msra.mxu1 %v8174_v13  ;;  %6299 = vmatprep.subr.bf16.mxu0 %v8179_v17  ;;  %v8251_v13 = vld [vmem:[#allocation3 + $0x8fc] ss:$28 sps:$4 sm:$0xff]  }
 0x617   :  { %6340 = vmatprep.subr.bf16.mxu1 %v8182_v18  ;;  %v8254_v17 = vld [vmem:[#allocation3 + $0xc7c] ss:$28 sps:$4 sm:$0xff]  }
 0x618   :  { %v8249_v18 = vld [vmem:[#allocation3 + $0x8f8] ss:$28 sps:$4 sm:$0xff]  }
 0x619   :  { %6300 = vmatpush1.bf16.msra.mxu0 %v8177_v22  ;;  %v8252_v22 = vld [vmem:[#allocation3 + $0xc78] ss:$28 sps:$4 sm:$0xff]  }
 0x61a   :  { %6341 = vmatpush1.bf16.msra.mxu1 %v8180_v23  ;;  %6301 = vmatprep.subr.bf16.mxu0 %v8185_v24  ;;  %v8257_v23 = vld [vmem:[#allocation3 + $0x8c4] ss:$28 sps:$4 sm:$0xff]  }
 0x61b   :  { %6342 = vmatprep.subr.bf16.mxu1 %v8188_v25  ;;  %v8260_v24 = vld [vmem:[#allocation3 + $0xc44] ss:$28 sps:$4 sm:$0xff]  }
 0x61c   :  { %v8255_v25 = vld [vmem:[#allocation3 + $0x8c0] ss:$28 sps:$4 sm:$0xff]  }
 0x61d   :  { %6302 = vmatpush1.bf16.msra.mxu0 %v8183_v26  ;;  %v8258_v26 = vld [vmem:[#allocation3 + $0xc40] ss:$28 sps:$4 sm:$0xff]  }
 0x61e   :  { %6343 = vmatpush1.bf16.msra.mxu1 %v8186_v28  ;;  %6303 = vmatprep.subr.bf16.mxu0 %v8191_v29  ;;  %v8263_v28 = vld [vmem:[#allocation3 + $0x194] ss:$28 sps:$4 sm:$0xff]  }
 0x61f   :  { %6344 = vmatprep.subr.bf16.mxu1 %v8194_v32  ;;  %v8266_v29 = vld [vmem:[#allocation3 + $0x514] ss:$28 sps:$4 sm:$0xff]  }
 0x620   :  { %v8261_v32 = vld [vmem:[#allocation3 + $0x190] ss:$28 sps:$4 sm:$0xff]  }
 0x621   :  { %6304 = vmatpush1.bf16.msra.mxu0 %v8189_v33  ;;  %v8264_v33 = vld [vmem:[#allocation3 + $0x510] ss:$28 sps:$4 sm:$0xff]  }
 0x622   :  { %6345 = vmatpush1.bf16.msra.mxu1 %v8192_v19  ;;  %6305 = vmatprep.subr.bf16.mxu0 %v8197_v20  ;;  %v8269_v19 = vld [vmem:[#allocation3 + $0x15c] ss:$28 sps:$4 sm:$0xff]  }
 0x623   :  { %6346 = vmatprep.subr.bf16.mxu1 %v8200_v40  ;;  %v8272_v20 = vld [vmem:[#allocation3 + $0x4dc] ss:$28 sps:$4 sm:$0xff]  }
 0x624   :  { %v8267_v40 = vld [vmem:[#allocation3 + $0x158] ss:$28 sps:$4 sm:$0xff]  }
 0x625   :  { %6306 = vmatpush1.bf16.msra.mxu0 %v8195_v36  ;;  %v8270_v36 = vld [vmem:[#allocation3 + $0x4d8] ss:$28 sps:$4 sm:$0xff]  }
 0x626   :  { %6347 = vmatpush1.bf16.msra.mxu1 %v8198_v27  ;;  %6307 = vmatprep.subr.bf16.mxu0 %v8203_v37  ;;  %v8275_v27 = vld [vmem:[#allocation3 + $0x124] ss:$28 sps:$4 sm:$0xff]  }
 0x627   :  { %6348 = vmatprep.subr.bf16.mxu1 %v8206_v41  ;;  %v8278_v37 = vld [vmem:[#allocation3 + $0x4a4] ss:$28 sps:$4 sm:$0xff]  }
 0x628   :  { %v8273_v41 = vld [vmem:[#allocation3 + $0x120] ss:$28 sps:$4 sm:$0xff]  }
 0x629   :  { %6308 = vmatpush1.bf16.msra.mxu0 %v8201_v38  ;;  %v8276_v38 = vld [vmem:[#allocation3 + $0x4a0] ss:$28 sps:$4 sm:$0xff]  }
 0x62a   :  { %6349 = vmatpush1.bf16.msra.mxu1 %v8204_v44  ;;  %6309 = vmatprep.subr.bf16.mxu0 %v8209_v45  ;;  %v8281_v44 = vld [vmem:[#allocation3 + $0xec] ss:$28 sps:$4 sm:$0xff]  }
 0x62b   :  { %6350 = vmatprep.subr.bf16.mxu1 %v8212_v52  ;;  %v8284_v45 = vld [vmem:[#allocation3 + $0x46c] ss:$28 sps:$4 sm:$0xff]  }
 0x62c   :  { %v8279_v52 = vld [vmem:[#allocation3 + $0xe8] ss:$28 sps:$4 sm:$0xff]  }
 0x62d   :  { %6310 = vmatpush1.bf16.msra.mxu0 %v8207_v53  ;;  %v8282_v53 = vld [vmem:[#allocation3 + $0x468] ss:$28 sps:$4 sm:$0xff]  }
 0x62e   :  { %6351 = vmatpush1.bf16.msra.mxu1 %v8210_v56  ;;  %6311 = vmatprep.subr.bf16.mxu0 %v8215_v59  ;;  %v8287_v56 = vld [vmem:[#allocation3 + $0xb4] ss:$28 sps:$4 sm:$0xff]  }
 0x62f   :  { %6352 = vmatprep.subr.bf16.mxu1 %v8218_v62  ;;  %v8290_v59 = vld [vmem:[#allocation3 + $0x434] ss:$28 sps:$4 sm:$0xff]  }
 0x630   :  { %v8285_v62 = vld [vmem:[#allocation3 + $0xb0] ss:$28 sps:$4 sm:$0xff]  }
 0x631   :  { %6312 = vmatpush2.bf16.msra.mxu0 %v8213_v12  ;;  %v8288_v12 = vld [vmem:[#allocation3 + $0x430] ss:$28 sps:$4 sm:$0xff]  }
 0x632   :  { %6353 = vmatpush2.bf16.msra.mxu1 %v8216_v2  ;;  %6313 = vmatprep.subr.bf16.mxu0 %v8221_v16  ;;  %v8293_v2 = vld [vmem:[#allocation3 + $0x7c] ss:$28 sps:$4 sm:$0xff]  }
 0x633   :  { %6354 = vmatprep.subr.bf16.mxu1 %v8224_v4  ;;  %v8296_v16 = vld [vmem:[#allocation3 + $0x3fc] ss:$28 sps:$4 sm:$0xff]  }
 0x634   :  { %v8291_v4 = vld [vmem:[#allocation3 + $0x78] ss:$28 sps:$4 sm:$0xff]  }
 0x635   :  { %6314 = vmatpush2.bf16.msra.mxu0 %v8219_v14  ;;  %v8294_v14 = vld [vmem:[#allocation3 + $0x3f8] ss:$28 sps:$4 sm:$0xff]  }
 0x636   :  { %6355 = vmatpush2.bf16.msra.mxu1 %v8222_v61  ;;  %6315 = vmatprep.subr.bf16.mxu0 %v8227_v15  ;;  %v8299_v61 = vld [vmem:[#allocation3 + $0x44] ss:$28 sps:$4 sm:$0xff]  }
 0x637   :  { %6356 = vmatprep.subr.bf16.mxu1 %v8230_v0  ;;  %v8302_v15 = vld [vmem:[#allocation3 + $0x3c4] ss:$28 sps:$4 sm:$0xff]  }
 0x638   :  { %v8297_v0 = vld [vmem:[#allocation3 + $0x40] ss:$28 sps:$4 sm:$0xff]  }
 0x639   :  { %6316 = vmatpush2.bf16.msra.mxu0 %v8225_v50  ;;  %v8300_v50 = vld [vmem:[#allocation3 + $0x3c0] ss:$28 sps:$4 sm:$0xff]  }
 0x63a   :  { %6357 = vmatpush2.bf16.msra.mxu1 %v8228_v55  ;;  %6317 = vmatprep.subr.bf16.mxu0 %v8233_v3  ;;  %v8305_v55 = vld [vmem:[#allocation3 + $0xc] ss:$28 sps:$4 sm:$0xff]  }
 0x63b   :  { %6358 = vmatprep.subr.bf16.mxu1 %v8236_v58  ;;  %v8308_v3 = vld [vmem:[#allocation3 + $0x38c] ss:$28 sps:$4 sm:$0xff]  }
 0x63c   :  { %v8303_v58 = vld [vmem:[#allocation3 + $0x8] ss:$28 sps:$4 sm:$0xff]  }
 0x63d   :  { %6318 = vmatpush2.bf16.msra.mxu0 %v8231_v43  ;;  %v8306_v43 = vld [vmem:[#allocation3 + $0x388] ss:$28 sps:$4 sm:$0xff]  }
 0x63e   :  { %6359 = vmatpush2.bf16.msra.mxu1 %v8234_v51  ;;  %6319 = vmatprep.subr.bf16.mxu0 %v8239_v5  ;;  %v8311_v51 = vld [vmem:[#allocation3 + $0x354] ss:$28 sps:$4 sm:$0xff]  }
 0x63f   :  { %6360 = vmatprep.subr.bf16.mxu1 %v8242_v49  ;;  %v8314_v5 = vld [vmem:[#allocation3 + $0x6d4] ss:$28 sps:$4 sm:$0xff]  }
 0x640   :  { %v8309_v49 = vld [vmem:[#allocation3 + $0x350] ss:$28 sps:$4 sm:$0xff]  }
 0x641   :  { %6320 = vmatpush2.bf16.msra.mxu0 %v8237_v6  ;;  %v8312_v6 = vld [vmem:[#allocation3 + $0x6d0] ss:$28 sps:$4 sm:$0xff]  }
 0x642   :  { %6361 = vmatpush2.bf16.msra.mxu1 %v8240_v54  ;;  %6321 = vmatprep.subr.bf16.mxu0 %v8245_v7  ;;  %v8317_v54 = vld [vmem:[#allocation3 + $0x31c] ss:$28 sps:$4 sm:$0xff]  }
 0x643   :  { %6362 = vmatprep.subr.bf16.mxu1 %v8248_v8  ;;  %v8320_v7 = vld [vmem:[#allocation3 + $0x69c] ss:$28 sps:$4 sm:$0xff]  }
 0x644   :  { %v8315_v8 = vld [vmem:[#allocation3 + $0x318] ss:$28 sps:$4 sm:$0xff]  }
 0x645   :  { %6322 = vmatpush2.bf16.msra.mxu0 %v8243_v9  ;;  %v8318_v9 = vld [vmem:[#allocation3 + $0x698] ss:$28 sps:$4 sm:$0xff]  }
 0x646   :  { %6363 = vmatpush2.bf16.msra.mxu1 %v8246_v11  ;;  %6323 = vmatprep.subr.bf16.mxu0 %v8251_v13  ;;  %v8323_v11 = vld [vmem:[#allocation3 + $0x2e4] ss:$28 sps:$4 sm:$0xff]  }
 0x647   :  { %6364 = vmatprep.subr.bf16.mxu1 %v8254_v17  ;;  %v8326_v13 = vld [vmem:[#allocation3 + $0x664] ss:$28 sps:$4 sm:$0xff]  }
 0x648   :  { %v8321_v17 = vld [vmem:[#allocation3 + $0x2e0] ss:$28 sps:$4 sm:$0xff]  }
 0x649   :  { %6324 = vmatpush2.bf16.msra.mxu0 %v8249_v18  ;;  %v8324_v18 = vld [vmem:[#allocation3 + $0x660] ss:$28 sps:$4 sm:$0xff]  }
 0x64a   :  { %6365 = vmatpush2.bf16.msra.mxu1 %v8252_v22  ;;  %6325 = vmatprep.subr.bf16.mxu0 %v8257_v23  ;;  %v8329_v22 = vld [vmem:[#allocation3 + $0x2ac] ss:$28 sps:$4 sm:$0xff]  }
 0x64b   :  { %6366 = vmatprep.subr.bf16.mxu1 %v8260_v24  ;;  %v8332_v23 = vld [vmem:[#allocation3 + $0x62c] ss:$28 sps:$4 sm:$0xff]  }
 0x64c   :  { %v8327_v24 = vld [vmem:[#allocation3 + $0x2a8] ss:$28 sps:$4 sm:$0xff]  }
 0x64d   :  { %6326 = vmatpush2.bf16.msra.mxu0 %v8255_v25  ;;  %v8330_v25 = vld [vmem:[#allocation3 + $0x628] ss:$28 sps:$4 sm:$0xff]  }
 0x64e   :  { %6367 = vmatpush2.bf16.msra.mxu1 %v8258_v26  ;;  %6377 = vmatprep.subr.bf16.mxu0 %v8263_v28  ;;  %v8335_v26 = vld [vmem:[#allocation3 + $0x274] ss:$28 sps:$4 sm:$0xff]  }
 0x64f   :  { %6418 = vmatprep.subr.bf16.mxu1 %v8266_v29  ;;  %v8338_v28 = vld [vmem:[#allocation3 + $0x5f4] ss:$28 sps:$4 sm:$0xff]  }
 0x650   :  { %6328 = vmatmul.mubr.bf16.vlgmr.msra.gmra.mxu0 %v9157_v60  ;;  %v8333_v29 = vld [vmem:[#allocation3 + $0x270] ss:$28 sps:$4 sm:$0xff]  }
 0x651   :  { %6369 = vmatmul.mubr.bf16.vlgmr.msra.gmra.mxu1 %v9161_v1  ;;  %6378 = vmatpush1.bf16.msra.mxu0 %v8261_v32  ;;  %v8336_v32 = vld [vmem:[#allocation3 + $0x5f0] ss:$28 sps:$4 sm:$0xff]  }
 0x652   :  { %6419 = vmatpush1.bf16.msra.mxu1 %v8264_v33  ;;  %6379 = vmatprep.subr.bf16.mxu0 %v8269_v19  ;;  %v8341_v33 = vld [vmem:[#allocation3 + $0x23c] ss:$28 sps:$4 sm:$0xff]  }
 0x653   :  { %6420 = vmatprep.subr.bf16.mxu1 %v8272_v20  ;;  %6409 = vmatprep.mubr.bf16.mxu0 %v9151_v39  ;;  %v8344_v19 = vld [vmem:[#allocation3 + $0x5bc] ss:$28 sps:$4 sm:$0xff]  }
 0x654   :  { %6450 = vmatprep.mubr.bf16.mxu1 %v9155_v57  ;;  %v8339_v20 = vld [vmem:[#allocation3 + $0x238] ss:$28 sps:$4 sm:$0xff]  }
 0x655   :  { %6380 = vmatpush1.bf16.msra.mxu0 %v8267_v40  ;;  %v8342_v40 = vld [vmem:[#allocation3 + $0x5b8] ss:$28 sps:$4 sm:$0xff]  }
 0x656   :  { %6421 = vmatpush1.bf16.msra.mxu1 %v8270_v36  ;;  %6381 = vmatprep.subr.bf16.mxu0 %v8275_v27  ;;  %v8347_v36 = vld [vmem:[#allocation3 + $0x204] ss:$28 sps:$4 sm:$0xff]  }
 0x657   :  { %6422 = vmatprep.subr.bf16.mxu1 %v8278_v37  ;;  %v8350_v27 = vld [vmem:[#allocation3 + $0x584] ss:$28 sps:$4 sm:$0xff]  }
 0x658   :  { %v8345_v37 = vld [vmem:[#allocation3 + $0x200] ss:$28 sps:$4 sm:$0xff]  }
 0x659   :  { %6382 = vmatpush1.bf16.msra.mxu0 %v8273_v41  ;;  %v8348_v41 = vld [vmem:[#allocation3 + $0x580] ss:$28 sps:$4 sm:$0xff]  }
 0x65a   :  { %6423 = vmatpush1.bf16.msra.mxu1 %v8276_v38  ;;  %6383 = vmatprep.subr.bf16.mxu0 %v8281_v44  ;;  %v8353_v38 = vld [vmem:[#allocation3 + $0x1cc] ss:$28 sps:$4 sm:$0xff]  }
 0x65b   :  { %6424 = vmatprep.subr.bf16.mxu1 %v8284_v45  ;;  %v8356_v44 = vld [vmem:[#allocation3 + $0x54c] ss:$28 sps:$4 sm:$0xff]  }
 0x65c   :  { %v8351_v45 = vld [vmem:[#allocation3 + $0x1c8] ss:$28 sps:$4 sm:$0xff]  }
 0x65d   :  { %6384 = vmatpush1.bf16.msra.mxu0 %v8279_v52  ;;  %v8354_v52 = vld [vmem:[#allocation3 + $0x548] ss:$28 sps:$4 sm:$0xff]  }
 0x65e   :  { %6425 = vmatpush1.bf16.msra.mxu1 %v8282_v53  ;;  %6385 = vmatprep.subr.bf16.mxu0 %v8287_v56  ;;  %v8359_v53 = vld [vmem:[#allocation3 + $0x894] ss:$28 sps:$4 sm:$0xff]  }
 0x65f   :  { %6426 = vmatprep.subr.bf16.mxu1 %v8290_v59  ;;  %v8362_v56 = vld [vmem:[#allocation3 + $0xc14] ss:$28 sps:$4 sm:$0xff]  }
 0x660   :  { %v8357_v59 = vld [vmem:[#allocation3 + $0x890] ss:$28 sps:$4 sm:$0xff]  }
 0x661   :  { %6386 = vmatpush1.bf16.msra.mxu0 %v8285_v62  ;;  %v8360_v62 = vld [vmem:[#allocation3 + $0xc10] ss:$28 sps:$4 sm:$0xff]  }
 0x662   :  { %6427 = vmatpush1.bf16.msra.mxu1 %v8288_v12  ;;  %6387 = vmatprep.subr.bf16.mxu0 %v8293_v2  ;;  %v8365_v12 = vld [vmem:[#allocation3 + $0x85c] ss:$28 sps:$4 sm:$0xff]  }
 0x663   :  { %6428 = vmatprep.subr.bf16.mxu1 %v8296_v16  ;;  %v8368_v2 = vld [vmem:[#allocation3 + $0xbdc] ss:$28 sps:$4 sm:$0xff]  }
 0x664   :  { %v8363_v16 = vld [vmem:[#allocation3 + $0x858] ss:$28 sps:$4 sm:$0xff]  }
 0x665   :  { %6388 = vmatpush1.bf16.msra.mxu0 %v8291_v4  ;;  %v8366_v4 = vld [vmem:[#allocation3 + $0xbd8] ss:$28 sps:$4 sm:$0xff]  }
 0x666   :  { %6429 = vmatpush1.bf16.msra.mxu1 %v8294_v14  ;;  %6389 = vmatprep.subr.bf16.mxu0 %v8299_v61  ;;  %v8371_v14 = vld [vmem:[#allocation3 + $0x824] ss:$28 sps:$4 sm:$0xff]  }
 0x667   :  { %6430 = vmatprep.subr.bf16.mxu1 %v8302_v15  ;;  %v8374_v61 = vld [vmem:[#allocation3 + $0xba4] ss:$28 sps:$4 sm:$0xff]  }
 0x668   :  { %v8369_v15 = vld [vmem:[#allocation3 + $0x820] ss:$28 sps:$4 sm:$0xff]  }
 0x669   :  { %6390 = vmatpush1.bf16.msra.mxu0 %v8297_v0  ;;  %v8372_v0 = vld [vmem:[#allocation3 + $0xba0] ss:$28 sps:$4 sm:$0xff]  }
 0x66a   :  { %6431 = vmatpush1.bf16.msra.mxu1 %v8300_v50  ;;  %6391 = vmatprep.subr.bf16.mxu0 %v8305_v55  ;;  %v8377_v50 = vld [vmem:[#allocation3 + $0x7ec] ss:$28 sps:$4 sm:$0xff]  }
 0x66b   :  { %6432 = vmatprep.subr.bf16.mxu1 %v8308_v3  ;;  %v8380_v55 = vld [vmem:[#allocation3 + $0xb6c] ss:$28 sps:$4 sm:$0xff]  }
 0x66c   :  { %v8375_v3 = vld [vmem:[#allocation3 + $0x7e8] ss:$28 sps:$4 sm:$0xff]  }
 0x66d   :  { %6392 = vmatpush1.bf16.msra.mxu0 %v8303_v58  ;;  %v8378_v58 = vld [vmem:[#allocation3 + $0xb68] ss:$28 sps:$4 sm:$0xff]  }
 0x66e   :  { %6433 = vmatpush1.bf16.msra.mxu1 %v8306_v43  ;;  %6393 = vmatprep.subr.bf16.mxu0 %v8311_v51  ;;  %v8383_v43 = vld [vmem:[#allocation3 + $0x7b4] ss:$28 sps:$4 sm:$0xff]  }
 0x66f   :  { %6434 = vmatprep.subr.bf16.mxu1 %v8314_v5  ;;  %v8386_v51 = vld [vmem:[#allocation3 + $0xb34] ss:$28 sps:$4 sm:$0xff]  }
 0x670   :  { %v8381_v5 = vld [vmem:[#allocation3 + $0x7b0] ss:$28 sps:$4 sm:$0xff]  }
 0x671   :  { %6394 = vmatpush2.bf16.msra.mxu0 %v8309_v49  ;;  %v8384_v49 = vld [vmem:[#allocation3 + $0xb30] ss:$28 sps:$4 sm:$0xff]  }
 0x672   :  { %6435 = vmatpush2.bf16.msra.mxu1 %v8312_v6  ;;  %6395 = vmatprep.subr.bf16.mxu0 %v8317_v54  ;;  %v8389_v6 = vld [vmem:[#allocation3 + $0x77c] ss:$28 sps:$4 sm:$0xff]  }
 0x673   :  { %6436 = vmatprep.subr.bf16.mxu1 %v8320_v7  ;;  %v8392_v54 = vld [vmem:[#allocation3 + $0xafc] ss:$28 sps:$4 sm:$0xff]  }
 0x674   :  { %v8387_v7 = vld [vmem:[#allocation3 + $0x778] ss:$28 sps:$4 sm:$0xff]  }
 0x675   :  { %6396 = vmatpush2.bf16.msra.mxu0 %v8315_v8  ;;  %v8390_v8 = vld [vmem:[#allocation3 + $0xaf8] ss:$28 sps:$4 sm:$0xff]  }
 0x676   :  { %6437 = vmatpush2.bf16.msra.mxu1 %v8318_v9  ;;  %6397 = vmatprep.subr.bf16.mxu0 %v8323_v11  ;;  %v8395_v9 = vld [vmem:[#allocation3 + $0x744] ss:$28 sps:$4 sm:$0xff]  }
 0x677   :  { %6438 = vmatprep.subr.bf16.mxu1 %v8326_v13  ;;  %v8398_v11 = vld [vmem:[#allocation3 + $0xac4] ss:$28 sps:$4 sm:$0xff]  }
 0x678   :  { %v8393_v13 = vld [vmem:[#allocation3 + $0x740] ss:$28 sps:$4 sm:$0xff]  }
 0x679   :  { %6398 = vmatpush2.bf16.msra.mxu0 %v8321_v17  ;;  %v8396_v17 = vld [vmem:[#allocation3 + $0xac0] ss:$28 sps:$4 sm:$0xff]  }
 0x67a   :  { %6439 = vmatpush2.bf16.msra.mxu1 %v8324_v18  ;;  %6399 = vmatprep.subr.bf16.mxu0 %v8329_v22  ;;  %v8401_v18 = vld [vmem:[#allocation3 + $0x70c] ss:$28 sps:$4 sm:$0xff]  }
 0x67b   :  { %6440 = vmatprep.subr.bf16.mxu1 %v8332_v23  ;;  %v8404_v22 = vld [vmem:[#allocation3 + $0xa8c] ss:$28 sps:$4 sm:$0xff]  }
 0x67c   :  { %v8399_v23 = vld [vmem:[#allocation3 + $0x708] ss:$28 sps:$4 sm:$0xff]  }
 0x67d   :  { %6400 = vmatpush2.bf16.msra.mxu0 %v8327_v24  ;;  %v8402_v24 = vld [vmem:[#allocation3 + $0xa88] ss:$28 sps:$4 sm:$0xff]  }
 0x67e   :  { %6441 = vmatpush2.bf16.msra.mxu1 %v8330_v25  ;;  %6401 = vmatprep.subr.bf16.mxu0 %v8335_v26  ;;  %v8407_v25 = vld [vmem:[#allocation3 + $0xa54] ss:$28 sps:$4 sm:$0xff]  }
 0x67f   :  { %6442 = vmatprep.subr.bf16.mxu1 %v8338_v28  ;;  %v8410_v26 = vld [vmem:[#allocation3 + $0xdd4] ss:$28 sps:$4 sm:$0xff]  }
 0x680   :  { %v8405_v28 = vld [vmem:[#allocation3 + $0xa50] ss:$28 sps:$4 sm:$0xff]  }
 0x681   :  { %6402 = vmatpush2.bf16.msra.mxu0 %v8333_v29  ;;  %v8408_v29 = vld [vmem:[#allocation3 + $0xdd0] ss:$28 sps:$4 sm:$0xff]  }
 0x682   :  { %6443 = vmatpush2.bf16.msra.mxu1 %v8336_v32  ;;  %6403 = vmatprep.subr.bf16.mxu0 %v8341_v33  ;;  %v8413_v32 = vld [vmem:[#allocation3 + $0xa1c] ss:$28 sps:$4 sm:$0xff]  }
 0x683   :  { %6444 = vmatprep.subr.bf16.mxu1 %v8344_v19  ;;  %v8416_v33 = vld [vmem:[#allocation3 + $0xd9c] ss:$28 sps:$4 sm:$0xff]  }
 0x684   :  { %v8411_v19 = vld [vmem:[#allocation3 + $0xa18] ss:$28 sps:$4 sm:$0xff]  }
 0x685   :  { %6404 = vmatpush2.bf16.msra.mxu0 %v8339_v20  ;;  %v8414_v20 = vld [vmem:[#allocation3 + $0xd98] ss:$28 sps:$4 sm:$0xff]  }
 0x686   :  { %6445 = vmatpush2.bf16.msra.mxu1 %v8342_v40  ;;  %6405 = vmatprep.subr.bf16.mxu0 %v8347_v36  ;;  %v8419_v40 = vld [vmem:[#allocation3 + $0x9e4] ss:$28 sps:$4 sm:$0xff]  }
 0x687   :  { %6446 = vmatprep.subr.bf16.mxu1 %v8350_v27  ;;  %v8422_v36 = vld [vmem:[#allocation3 + $0xd64] ss:$28 sps:$4 sm:$0xff]  }
 0x688   :  { %v8417_v27 = vld [vmem:[#allocation3 + $0x9e0] ss:$28 sps:$4 sm:$0xff]  }
 0x689   :  { %6406 = vmatpush2.bf16.msra.mxu0 %v8345_v37  ;;  %v8420_v37 = vld [vmem:[#allocation3 + $0xd60] ss:$28 sps:$4 sm:$0xff]  }
 0x68a   :  { %6447 = vmatpush2.bf16.msra.mxu1 %v8348_v41  ;;  %6407 = vmatprep.subr.bf16.mxu0 %v8353_v38  ;;  %v8425_v41 = vld [vmem:[#allocation3 + $0x9ac] ss:$28 sps:$4 sm:$0xff]  }
 0x68b   :  { %6448 = vmatprep.subr.bf16.mxu1 %v8356_v44  ;;  %v8428_v38 = vld [vmem:[#allocation3 + $0xd2c] ss:$28 sps:$4 sm:$0xff]  }
 0x68c   :  { %v8423_v44 = vld [vmem:[#allocation3 + $0x9a8] ss:$28 sps:$4 sm:$0xff]  }
 0x68d   :  { %6408 = vmatpush2.bf16.msra.mxu0 %v8351_v45  ;;  %v8426_v45 = vld [vmem:[#allocation3 + $0xd28] ss:$28 sps:$4 sm:$0xff]  }
 0x68e   :  { %6449 = vmatpush2.bf16.msra.mxu1 %v8354_v52  ;;  %6459 = vmatprep.subr.bf16.mxu0 %v8359_v53  ;;  %v8431_v52 = vld [vmem:[#allocation3 + $0x974] ss:$28 sps:$4 sm:$0xff]  }
 0x68f   :  { %6500 = vmatprep.subr.bf16.mxu1 %v8362_v56  ;;  %v8434_v53 = vld [vmem:[#allocation3 + $0xcf4] ss:$28 sps:$4 sm:$0xff]  }
 0x690   :  { %6410 = vmatmul.mubr.bf16.vlgmr.msra.gmra.mxu0 %v9149_v21  ;;  %v8429_v56 = vld [vmem:[#allocation3 + $0x970] ss:$28 sps:$4 sm:$0xff]  }
 0x691   :  { %6451 = vmatmul.mubr.bf16.vlgmr.msra.gmra.mxu1 %v9153_v48  ;;  %6460 = vmatpush1.bf16.msra.mxu0 %v8357_v59  ;;  %v8432_v59 = vld [vmem:[#allocation3 + $0xcf0] ss:$28 sps:$4 sm:$0xff]  }
 0x692   :  { %6501 = vmatpush1.bf16.msra.mxu1 %v8360_v62  ;;  %6461 = vmatprep.subr.bf16.mxu0 %v8365_v12  ;;  %v8437_v62 = vld [vmem:[#allocation3 + $0x93c] ss:$28 sps:$4 sm:$0xff]  }
 0x693   :  { %6502 = vmatprep.subr.bf16.mxu1 %v8368_v2  ;;  %6491 = vmatprep.mubr.bf16.mxu0 %v9159_v63  ;;  %v8440_v12 = vld [vmem:[#allocation3 + $0xcbc] ss:$28 sps:$4 sm:$0xff]  }
 0x694   :  { %6532 = vmatprep.mubr.bf16.mxu1 %v9163_v42  ;;  %v8435_v2 = vld [vmem:[#allocation3 + $0x938] ss:$28 sps:$4 sm:$0xff]  }
 0x695   :  { %6462 = vmatpush1.bf16.msra.mxu0 %v8363_v16  ;;  %v8438_v16 = vld [vmem:[#allocation3 + $0xcb8] ss:$28 sps:$4 sm:$0xff]  }
 0x696   :  { %6503 = vmatpush1.bf16.msra.mxu1 %v8366_v4  ;;  %6463 = vmatprep.subr.bf16.mxu0 %v8371_v14  ;;  %v8443_v4 = vld [vmem:[#allocation3 + $0x904] ss:$28 sps:$4 sm:$0xff]  }
 0x697   :  { %6504 = vmatprep.subr.bf16.mxu1 %v8374_v61  ;;  %v8446_v14 = vld [vmem:[#allocation3 + $0xc84] ss:$28 sps:$4 sm:$0xff]  }
 0x698   :  { %v8441_v61 = vld [vmem:[#allocation3 + $0x900] ss:$28 sps:$4 sm:$0xff]  }
 0x699   :  { %6464 = vmatpush1.bf16.msra.mxu0 %v8369_v15  ;;  %v8444_v15 = vld [vmem:[#allocation3 + $0xc80] ss:$28 sps:$4 sm:$0xff]  }
 0x69a   :  { %6505 = vmatpush1.bf16.msra.mxu1 %v8372_v0  ;;  %6465 = vmatprep.subr.bf16.mxu0 %v8377_v50  ;;  %v8449_v0 = vld [vmem:[#allocation3 + $0x8cc] ss:$28 sps:$4 sm:$0xff]  }
 0x69b   :  { %6506 = vmatprep.subr.bf16.mxu1 %v8380_v55  ;;  %v8452_v50 = vld [vmem:[#allocation3 + $0xc4c] ss:$28 sps:$4 sm:$0xff]  }
 0x69c   :  { %v8447_v55 = vld [vmem:[#allocation3 + $0x8c8] ss:$28 sps:$4 sm:$0xff]  }
 0x69d   :  { %6466 = vmatpush1.bf16.msra.mxu0 %v8375_v3  ;;  %v8450_v3 = vld [vmem:[#allocation3 + $0xc48] ss:$28 sps:$4 sm:$0xff]  }
 0x69e   :  { %6507 = vmatpush1.bf16.msra.mxu1 %v8378_v58  ;;  %6467 = vmatprep.subr.bf16.mxu0 %v8383_v43  ;;  %v8455_v58 = vld [vmem:[#allocation3 + $0x19c] ss:$28 sps:$4 sm:$0xff]  }
 0x69f   :  { %6508 = vmatprep.subr.bf16.mxu1 %v8386_v51  ;;  %v8458_v43 = vld [vmem:[#allocation3 + $0x51c] ss:$28 sps:$4 sm:$0xff]  }
 0x6a0   :  { %v8453_v51 = vld [vmem:[#allocation3 + $0x198] ss:$28 sps:$4 sm:$0xff]  }
 0x6a1   :  { %6468 = vmatpush1.bf16.msra.mxu0 %v8381_v5  ;;  %v8456_v5 = vld [vmem:[#allocation3 + $0x518] ss:$28 sps:$4 sm:$0xff]  }
 0x6a2   :  { %6509 = vmatpush1.bf16.msra.mxu1 %v8384_v49  ;;  %6469 = vmatprep.subr.bf16.mxu0 %v8389_v6  ;;  %v8461_v49 = vld [vmem:[#allocation3 + $0x164] ss:$28 sps:$4 sm:$0xff]  }
 0x6a3   :  { %6510 = vmatprep.subr.bf16.mxu1 %v8392_v54  ;;  %v8464_v6 = vld [vmem:[#allocation3 + $0x4e4] ss:$28 sps:$4 sm:$0xff]  }
 0x6a4   :  { %v8459_v54 = vld [vmem:[#allocation3 + $0x160] ss:$28 sps:$4 sm:$0xff]  }
 0x6a5   :  { %6470 = vmatpush1.bf16.msra.mxu0 %v8387_v7 }
 0x6a6   :  { %6511 = vmatpush1.bf16.msra.mxu1 %v8390_v8  ;;  %6471 = vmatprep.subr.bf16.mxu0 %v8395_v9  ;;  %v8462_v9 = vld [vmem:[#allocation3 + $0x4e0] ss:$28 sps:$4 sm:$0xff]  }
 0x6a7   :  { %6512 = vmatprep.subr.bf16.mxu1 %v8398_v11  ;;  %v8467_v11 = vld [vmem:[#allocation3 + $0x12c] ss:$28 sps:$4 sm:$0xff]  }
 0x6a9   :  { %6472 = vmatpush1.bf16.msra.mxu0 %v8393_v13 }
 0x6aa   :  { %6513 = vmatpush1.bf16.msra.mxu1 %v8396_v17  ;;  %6473 = vmatprep.subr.bf16.mxu0 %v8401_v18  ;;  %v8470_v18 = vld [vmem:[#allocation3 + $0x4ac] ss:$28 sps:$4 sm:$0xff]  }
 0x6ab   :  { %6514 = vmatprep.subr.bf16.mxu1 %v8404_v22  ;;  %v8465_v22 = vld [vmem:[#allocation3 + $0x128] ss:$28 sps:$4 sm:$0xff]  }
 0x6ad   :  { %6474 = vmatpush1.bf16.msra.mxu0 %v8399_v23 }
 0x6ae   :  { %6515 = vmatpush1.bf16.msra.mxu1 %v8402_v24  ;;  %6475 = vmatprep.subr.bf16.mxu0 %v8407_v25  ;;  %v8468_v25 = vld [vmem:[#allocation3 + $0x4a8] ss:$28 sps:$4 sm:$0xff]  }
 0x6af   :  { %6516 = vmatprep.subr.bf16.mxu1 %v8410_v26  ;;  %v8473_v26 = vld [vmem:[#allocation3 + $0xf4] ss:$28 sps:$4 sm:$0xff]  }
 0x6b1   :  { %6476 = vmatpush2.bf16.msra.mxu0 %v8405_v28 }
 0x6b2   :  { %6517 = vmatpush2.bf16.msra.mxu1 %v8408_v29  ;;  %6477 = vmatprep.subr.bf16.mxu0 %v8413_v32  ;;  %v8476_v32 = vld [vmem:[#allocation3 + $0x474] ss:$28 sps:$4 sm:$0xff]  }
 0x6b3   :  { %6518 = vmatprep.subr.bf16.mxu1 %v8416_v33  ;;  %v8471_v33 = vld [vmem:[#allocation3 + $0xf0] ss:$28 sps:$4 sm:$0xff]  }
 0x6b5   :  { %6478 = vmatpush2.bf16.msra.mxu0 %v8411_v19  ;;  %v8474_v19 = vld [vmem:[#allocation3 + $0x470] ss:$28 sps:$4 sm:$0xff]  }
 0x6b6   :  { %6519 = vmatpush2.bf16.msra.mxu1 %v8414_v20  ;;  %6479 = vmatprep.subr.bf16.mxu0 %v8419_v40  ;;  %v8479_v20 = vld [vmem:[#allocation3 + $0xbc] ss:$28 sps:$4 sm:$0xff]  }
 0x6b7   :  { %6520 = vmatprep.subr.bf16.mxu1 %v8422_v36  ;;  %v8482_v40 = vld [vmem:[#allocation3 + $0x43c] ss:$28 sps:$4 sm:$0xff]  }
 0x6b8   :  { %v8477_v36 = vld [vmem:[#allocation3 + $0xb8] ss:$28 sps:$4 sm:$0xff]  }
 0x6b9   :  { %6480 = vmatpush2.bf16.msra.mxu0 %v8417_v27  ;;  %v8480_v27 = vld [vmem:[#allocation3 + $0x438] ss:$28 sps:$4 sm:$0xff]  }
 0x6ba   :  { %6521 = vmatpush2.bf16.msra.mxu1 %v8420_v37  ;;  %6481 = vmatprep.subr.bf16.mxu0 %v8425_v41  ;;  %v8485_v37 = vld [vmem:[#allocation3 + $0x84] ss:$28 sps:$4 sm:$0xff]  }
 0x6bb   :  { %6522 = vmatprep.subr.bf16.mxu1 %v8428_v38  ;;  %v8488_v41 = vld [vmem:[#allocation3 + $0x404] ss:$28 sps:$4 sm:$0xff]  }
 0x6bc   :  { %v8483_v38 = vld [vmem:[#allocation3 + $0x80] ss:$28 sps:$4 sm:$0xff]  }
 0x6bd   :  { %6482 = vmatpush2.bf16.msra.mxu0 %v8423_v44  ;;  %v8486_v44 = vld [vmem:[#allocation3 + $0x400] ss:$28 sps:$4 sm:$0xff]  }
 0x6be   :  { %6523 = vmatpush2.bf16.msra.mxu1 %v8426_v45  ;;  %6483 = vmatprep.subr.bf16.mxu0 %v8431_v52  ;;  %v8491_v45 = vld [vmem:[#allocation3 + $0x4c] ss:$28 sps:$4 sm:$0xff]  }
 0x6bf   :  { %6524 = vmatprep.subr.bf16.mxu1 %v8434_v53  ;;  %v8494_v52 = vld [vmem:[#allocation3 + $0x3cc] ss:$28 sps:$4 sm:$0xff]  }
 0x6c0   :  { %v8489_v53 = vld [vmem:[#allocation3 + $0x48] ss:$28 sps:$4 sm:$0xff]  }
 0x6c1   :  { %6484 = vmatpush2.bf16.msra.mxu0 %v8429_v56  ;;  %v8492_v56 = vld [vmem:[#allocation3 + $0x3c8] ss:$28 sps:$4 sm:$0xff]  }
 0x6c2   :  { %6525 = vmatpush2.bf16.msra.mxu1 %v8432_v59  ;;  %6485 = vmatprep.subr.bf16.mxu0 %v8437_v62  ;;  %v8497_v59 = vld [vmem:[#allocation3 + $0x14] ss:$28 sps:$4 sm:$0xff]  }
 0x6c3   :  { %6526 = vmatprep.subr.bf16.mxu1 %v8440_v12  ;;  %v8500_v62 = vld [vmem:[#allocation3 + $0x394] ss:$28 sps:$4 sm:$0xff]  }
 0x6c4   :  { %v8495_v12 = vld [vmem:[#allocation3 + $0x10] ss:$28 sps:$4 sm:$0xff]  }
 0x6c5   :  { %6486 = vmatpush2.bf16.msra.mxu0 %v8435_v2  ;;  %v8498_v2 = vld [vmem:[#allocation3 + $0x390] ss:$28 sps:$4 sm:$0xff]  }
 0x6c6   :  { %6527 = vmatpush2.bf16.msra.mxu1 %v8438_v16  ;;  %6487 = vmatprep.subr.bf16.mxu0 %v8443_v4  ;;  %v8503_v16 = vld [vmem:[#allocation3 + $0x35c] ss:$28 sps:$4 sm:$0xff]  }
 0x6c7   :  { %6528 = vmatprep.subr.bf16.mxu1 %v8446_v14  ;;  %v8506_v4 = vld [vmem:[#allocation3 + $0x6dc] ss:$28 sps:$4 sm:$0xff]  }
 0x6c8   :  { %v8501_v14 = vld [vmem:[#allocation3 + $0x358] ss:$28 sps:$4 sm:$0xff]  }
 0x6c9   :  { %6488 = vmatpush2.bf16.msra.mxu0 %v8441_v61  ;;  %v8504_v61 = vld [vmem:[#allocation3 + $0x6d8] ss:$28 sps:$4 sm:$0xff]  }
 0x6ca   :  { %6529 = vmatpush2.bf16.msra.mxu1 %v8444_v15  ;;  %6489 = vmatprep.subr.bf16.mxu0 %v8449_v0  ;;  %v8509_v15 = vld [vmem:[#allocation3 + $0x324] ss:$28 sps:$4 sm:$0xff]  }
 0x6cb   :  { %6530 = vmatprep.subr.bf16.mxu1 %v8452_v50  ;;  %v8512_v0 = vld [vmem:[#allocation3 + $0x6a4] ss:$28 sps:$4 sm:$0xff]  }
 0x6cc   :  { %v8507_v50 = vld [vmem:[#allocation3 + $0x320] ss:$28 sps:$4 sm:$0xff]  }
 0x6cd   :  { %6490 = vmatpush2.bf16.msra.mxu0 %v8447_v55  ;;  %v8510_v55 = vld [vmem:[#allocation3 + $0x6a0] ss:$28 sps:$4 sm:$0xff]  }
 0x6ce   :  { %6531 = vmatpush2.bf16.msra.mxu1 %v8450_v3  ;;  %6541 = vmatprep.subr.bf16.mxu0 %v8455_v58  ;;  %v8515_v3 = vld [vmem:[#allocation3 + $0x2ec] ss:$28 sps:$4 sm:$0xff]  }
 0x6cf   :  { %6582 = vmatprep.subr.bf16.mxu1 %v8458_v43  ;;  %v8518_v58 = vld [vmem:[#allocation3 + $0x66c] ss:$28 sps:$4 sm:$0xff]  }
 0x6d0   :  { %v9179_v7 = vpop.f32.mrf.mxu0  ;;  %6492 = vmatmul.mubr.bf16.vlgmr.msra.gmra.mxu0 %v9157_v60  ;;  %v8513_v43 = vld [vmem:[#allocation3 + $0x2e8] ss:$28 sps:$4 sm:$0xff]  }
 0x6d1   :  { %v9181_v8 = vpop.f32.mrf.mxu1  ;;  %6533 = vmatmul.mubr.bf16.vlgmr.msra.gmra.mxu1 %v9161_v1  ;;  %6542 = vmatpush1.bf16.msra.mxu0 %v8453_v51  ;;  %v8516_v51 = vld [vmem:[#allocation3 + $0x668] ss:$28 sps:$4 sm:$0xff]  }
 0x6d2   :  { %6583 = vmatpush1.bf16.msra.mxu1 %v8456_v5  ;;  %v9185_v13 = vpop.f32.mrf.mxu0  ;;  %6543 = vmatprep.subr.bf16.mxu0 %v8461_v49  ;;  %v8521_v5 = vld [vmem:[#allocation3 + $0x2b4] ss:$28 sps:$4 sm:$0xff]  }
 0x6d3   :  { %v9187_v17 = vpop.f32.mrf.mxu1  ;;  %6584 = vmatprep.subr.bf16.mxu1 %v8464_v6  ;;  %6573 = vmatprep.mubr.bf16.mxu0 %v9151_v39  ;;  %v8524_v49 = vld [vmem:[#allocation3 + $0x634] ss:$28 sps:$4 sm:$0xff]  }
 0x6d4   :  { %6614 = vmatprep.mubr.bf16.mxu1 %v9155_v57  ;;  %v6251_v23 = vpop.f32.mrf.mxu0  ;;  %v8519_v6 = vld [vmem:[#allocation3 + $0x2b0] ss:$28 sps:$4 sm:$0xff]  }
 0x6d5   :  { %v6292_v24 = vpop.f32.mrf.mxu1  ;;  %6544 = vmatpush1.bf16.msra.mxu0 %v8459_v54  ;;  %v8522_v54 = vld [vmem:[#allocation3 + $0x630] ss:$28 sps:$4 sm:$0xff]   ;;  %v8533_v23 = vld [vmem:[#allocation3 + $0x244] ss:$28 sps:$4 sm:$0xff]  }
 0x6d6   :  { %6585 = vmatpush1.bf16.msra.mxu1 %v8462_v9  ;;  %v6252_v28 = vpop.f32.mrf.mxu0  ;;  %6545 = vmatprep.subr.bf16.mxu0 %v8467_v11  ;;  %v8527_v9 = vld [vmem:[#allocation3 + $0x27c] ss:$28 sps:$4 sm:$0xff]  }
 0x6d7   :  { %v6293_v29 = vpop.f32.mrf.mxu1  ;;  %6586 = vmatprep.subr.bf16.mxu1 %v8470_v18  ;;  %v8530_v11 = vld [vmem:[#allocation3 + $0x5fc] ss:$28 sps:$4 sm:$0xff]  }
 0x6d8   :  { %v8525_v18 = vld [vmem:[#allocation3 + $0x278] ss:$28 sps:$4 sm:$0xff]   ;;  %v8531_v28 = vld [vmem:[#allocation3 + $0x240] ss:$28 sps:$4 sm:$0xff]  }
 0x6d9   :  { %6546 = vmatpush1.bf16.msra.mxu0 %v8465_v22  ;;  %v8528_v22 = vld [vmem:[#allocation3 + $0x5f8] ss:$28 sps:$4 sm:$0xff]   ;;  %v8534_v29 = vld [vmem:[#allocation3 + $0x5c0] ss:$28 sps:$4 sm:$0xff]  }
 0x6da   :  { %6587 = vmatpush1.bf16.msra.mxu1 %v8468_v25  ;;  %6547 = vmatprep.subr.bf16.mxu0 %v8473_v26  ;;  %v3870_v24 = vld [vmem:[#allocation13 + $0x40] ss:$8 sm:$0xf] }
 0x6db   :  { %6588 = vmatprep.subr.bf16.mxu1 %v8476_v32  ;;  %v3871_v25 = vld [vmem:[#allocation13 + $0x40] ss:$8 sm:$0xf0] }
 0x6dc   :  { %v8536_v26 = vld [vmem:[#allocation3 + $0x5c4] ss:$28 sps:$4 sm:$0xff]   ;;  %v8539_v32 = vld [vmem:[#allocation3 + $0x20c] ss:$28 sps:$4 sm:$0xff]  }
 0x6dd   :  { %6548 = vmatpush1.bf16.msra.mxu0 %v8471_v33  ;;  %v8542_v33 = vld [vmem:[#allocation3 + $0x58c] ss:$28 sps:$4 sm:$0xff]  }
 0x6de   :  { %6589 = vmatpush1.bf16.msra.mxu1 %v8474_v19  ;;  %6549 = vmatprep.subr.bf16.mxu0 %v8479_v20  ;;  %v9191_v19 = vor.u32 %v3871_v25, %v3870_v24  ;;  %v8537_v20 = vld [vmem:[#allocation3 + $0x208] ss:$28 sps:$4 sm:$0xff]   ;;  %v8578_v24 = vld [vmem:[#allocation3 + $0xb3c] ss:$28 sps:$4 sm:$0xff]  }
 0x6df   :  { %6590 = vmatprep.subr.bf16.mxu1 %v8482_v40  ;;  %v8540_v40 = vld [vmem:[#allocation3 + $0x588] ss:$28 sps:$4 sm:$0xff]   ;;  %v8573_v25 = vld [vmem:[#allocation3 + $0x7b8] ss:$28 sps:$4 sm:$0xff]  }
 0x6e1   :  { %6550 = vmatpush1.bf16.msra.mxu0 %v8477_v36  ;;  %v8545_v36 = vld [vmem:[#allocation3 + $0x1d4] ss:$28 sps:$4 sm:$0xff]  }
 0x6e2   :  { %6591 = vmatpush1.bf16.msra.mxu1 %v8480_v27  ;;  %6551 = vmatprep.subr.bf16.mxu0 %v8485_v37  ;;  %v8548_v27 = vld [vmem:[#allocation3 + $0x554] ss:$28 sps:$4 sm:$0xff]   ;;  %v3877_v37 = vrot.slane %v9191_v19, %v8994_v46  ;;  %v8557_v46 = vld [vmem:[#allocation3 + $0x864] ss:$28 sps:$4 sm:$0xff]  }
 0x6e3   :  { %6592 = vmatprep.subr.bf16.mxu1 %v8488_v41  ;;  %v8543_v41 = vld [vmem:[#allocation3 + $0x1d0] ss:$28 sps:$4 sm:$0xff]  }
 0x6e5   :  { %6552 = vmatpush1.bf16.msra.mxu0 %v8483_v38  ;;  %v8546_v38 = vld [vmem:[#allocation3 + $0x550] ss:$28 sps:$4 sm:$0xff]  }
 0x6e6   :  { %6593 = vmatpush1.bf16.msra.mxu1 %v8486_v44  ;;  %6553 = vmatprep.subr.bf16.mxu0 %v8491_v45  ;;  %v3881_v44 = vrot.slane %v9191_v19, %v8997_v47  ;;  %v8551_v45 = vld [vmem:[#allocation3 + $0x89c] ss:$28 sps:$4 sm:$0xff]  }
 0x6e7   :  { %6594 = vmatprep.subr.bf16.mxu1 %v8494_v52  ;;  %v8554_v52 = vld [vmem:[#allocation3 + $0xc1c] ss:$28 sps:$4 sm:$0xff]  }
 0x6e9   :  { %6554 = vmatpush1.bf16.msra.mxu0 %v8489_v53  ;;  %v6248_v53 = vadd.f32 %v9179_v7, %v3877_v37  ;;  %v8585_v37 = vld [vmem:[#allocation3 + $0x748] ss:$28 sps:$4 sm:$0xff]  }
 0x6ea   :  { %6595 = vmatpush1.bf16.msra.mxu1 %v8492_v56  ;;  %6555 = vmatprep.subr.bf16.mxu0 %v8497_v59  ;;  %v8549_v56 = vld [vmem:[#allocation3 + $0x898] ss:$28 sps:$4 sm:$0xff]   ;;  %v6250_v59 = vadd.f32 %v9185_v13, %v3881_v44  ;;  %v8555_v13 = vld [vmem:[#allocation3 + $0x860] ss:$28 sps:$4 sm:$0xff]  }
 0x6eb   :  { %6596 = vmatprep.subr.bf16.mxu1 %v8500_v62  ;;  %v8552_v62 = vld [vmem:[#allocation3 + $0xc18] ss:$28 sps:$4 sm:$0xff]   ;;  %v6289_v47 = vadd.f32 %v9181_v8, %v6248_v53  ;;  %v8591_v53 = vld [vmem:[#allocation3 + $0x710] ss:$28 sps:$4 sm:$0xff]  }
 0x6ec   :  { %v6291_v7 = vadd.f32 %v9187_v17, %v6250_v59  ;;  %v8593_v44 = vld [vmem:[#allocation3 + $0x714] ss:$28 sps:$4 sm:$0xff]   ;;  %v8599_v59 = vld [vmem:[#allocation3 + $0xa5c] ss:$28 sps:$4 sm:$0xff]  }
 0x6ed   :  { %6556 = vmatpush1.bf16.msra.mxu0 %v8495_v12  ;;  %v8560_v12 = vld [vmem:[#allocation3 + $0xbe4] ss:$28 sps:$4 sm:$0xff]  }
 0x6ee   :  { %6597 = vmatpush1.bf16.msra.mxu1 %v8498_v2  ;;  %6557 = vmatprep.subr.bf16.mxu0 %v8503_v16 }
 0x6ef   :  { %6598 = vmatprep.subr.bf16.mxu1 %v8506_v4 }
 0x6f1   :  { %6558 = vmatpush2.bf16.msra.mxu0 %v8501_v14  ;;  %v8558_v14 = vld [vmem:[#allocation3 + $0xbe0] ss:$28 sps:$4 sm:$0xff]  }
 0x6f2   :  { %6599 = vmatpush2.bf16.msra.mxu1 %v8504_v61  ;;  %6559 = vmatprep.subr.bf16.mxu0 %v8509_v15 }
 0x6f3   :  { %6600 = vmatprep.subr.bf16.mxu1 %v8512_v0  ;;  %v8563_v0 = vld [vmem:[#allocation3 + $0x82c] ss:$28 sps:$4 sm:$0xff]  }
 0x6f5   :  { %6560 = vmatpush2.bf16.msra.mxu0 %v8507_v50  ;;  %v8566_v50 = vld [vmem:[#allocation3 + $0xbac] ss:$28 sps:$4 sm:$0xff]  }
 0x6f6   :  { %6601 = vmatpush2.bf16.msra.mxu1 %v8510_v55  ;;  %6561 = vmatprep.subr.bf16.mxu0 %v8515_v3 }
 0x6f7   :  { %6602 = vmatprep.subr.bf16.mxu1 %v8518_v58 }
 0x6f9   :  { %6562 = vmatpush2.bf16.msra.mxu0 %v8513_v43 }
 0x6fa   :  { %6603 = vmatpush2.bf16.msra.mxu1 %v8516_v51  ;;  %6563 = vmatprep.subr.bf16.mxu0 %v8521_v5  ;;  %v8561_v51 = vld [vmem:[#allocation3 + $0x828] ss:$28 sps:$4 sm:$0xff]  }
 0x6fb   :  { %6604 = vmatprep.subr.bf16.mxu1 %v8524_v49  ;;  %v8564_v5 = vld [vmem:[#allocation3 + $0xba8] ss:$28 sps:$4 sm:$0xff]  }
 0x6fd   :  { %6564 = vmatpush2.bf16.msra.mxu0 %v8519_v6 }
 0x6fe   :  { %6605 = vmatpush2.bf16.msra.mxu1 %v8522_v54  ;;  %6565 = vmatprep.subr.bf16.mxu0 %v8527_v9  ;;  %v8569_v54 = vld [vmem:[#allocation3 + $0x7f4] ss:$28 sps:$4 sm:$0xff]  }
 0x6ff   :  { %6606 = vmatprep.subr.bf16.mxu1 %v8530_v11  ;;  %v8572_v9 = vld [vmem:[#allocation3 + $0xb74] ss:$28 sps:$4 sm:$0xff]  }
 0x701   :  { %6566 = vmatpush2.bf16.msra.mxu0 %v8525_v18  ;;  %v8567_v18 = vld [vmem:[#allocation3 + $0x7f0] ss:$28 sps:$4 sm:$0xff]  }
 0x702   :  { %6607 = vmatpush2.bf16.msra.mxu1 %v8528_v22  ;;  %6567 = vmatprep.subr.bf16.mxu0 %v8533_v23  ;;  %v8570_v22 = vld [vmem:[#allocation3 + $0xb70] ss:$28 sps:$4 sm:$0xff]   ;;  %v8575_v23 = vld [vmem:[#allocation3 + $0x7bc] ss:$28 sps:$4 sm:$0xff]  }
 0x703   :  { %6608 = vmatprep.subr.bf16.mxu1 %v8536_v26  ;;  %v8576_v26 = vld [vmem:[#allocation3 + $0xb38] ss:$28 sps:$4 sm:$0xff]  }
 0x705   :  { %6568 = vmatpush2.bf16.msra.mxu0 %v8531_v28  ;;  %v8581_v28 = vld [vmem:[#allocation3 + $0x784] ss:$28 sps:$4 sm:$0xff]  }
 0x706   :  { %6609 = vmatpush2.bf16.msra.mxu1 %v8534_v29  ;;  %6569 = vmatprep.subr.bf16.mxu0 %v8539_v32  ;;  %v8584_v29 = vld [vmem:[#allocation3 + $0xb04] ss:$28 sps:$4 sm:$0xff]  }
 0x707   :  { %6610 = vmatprep.subr.bf16.mxu1 %v8542_v33  ;;  %v8579_v32 = vld [vmem:[#allocation3 + $0x780] ss:$28 sps:$4 sm:$0xff]  }
 0x708   :  { %v8582_v33 = vld [vmem:[#allocation3 + $0xb00] ss:$28 sps:$4 sm:$0xff]  }
 0x709   :  { %6570 = vmatpush2.bf16.msra.mxu0 %v8537_v20  ;;  %v8587_v20 = vld [vmem:[#allocation3 + $0x74c] ss:$28 sps:$4 sm:$0xff]  }
 0x70a   :  { %6611 = vmatpush2.bf16.msra.mxu1 %v8540_v40  ;;  %6571 = vmatprep.subr.bf16.mxu0 %v8545_v36  ;;  %v8590_v40 = vld [vmem:[#allocation3 + $0xacc] ss:$28 sps:$4 sm:$0xff]  }
 0x70b   :  { %6612 = vmatprep.subr.bf16.mxu1 %v8548_v27 }
 0x70d   :  { %6572 = vmatpush2.bf16.msra.mxu0 %v8543_v41  ;;  %v8588_v41 = vld [vmem:[#allocation3 + $0xac8] ss:$28 sps:$4 sm:$0xff]  }
 0x70e   :  { %6613 = vmatpush2.bf16.msra.mxu1 %v8546_v38  ;;  %6623 = vmatprep.subr.bf16.mxu0 %v8551_v45  ;;  %v8596_v45 = vld [vmem:[#allocation3 + $0xa94] ss:$28 sps:$4 sm:$0xff]  }
 0x70f   :  { %6664 = vmatprep.subr.bf16.mxu1 %v8554_v52 }
 0x710   :  { %v6329_v2 = vpop.f32.mrf.mxu0  ;;  %6574 = vmatmul.mubr.bf16.vlgmr.msra.gmra.mxu0 %v9149_v21 }
 0x711   :  { %v6370_v16 = vpop.f32.mrf.mxu1  ;;  %6615 = vmatmul.mubr.bf16.vlgmr.msra.gmra.mxu1 %v9153_v48  ;;  %v6330_v4 = vadd.f32 %v6329_v2, %v6289_v47  ;;  %6624 = vmatpush1.bf16.msra.mxu0 %v8549_v56  ;;  %v8594_v56 = vld [vmem:[#allocation3 + $0xa90] ss:$28 sps:$4 sm:$0xff]   ;;  %v8605_v47 = vld [vmem:[#allocation3 + $0xa24] ss:$28 sps:$4 sm:$0xff]  }
 0x712   :  { %6665 = vmatpush1.bf16.msra.mxu1 %v8552_v62  ;;  %v6331_v61 = vpop.f32.mrf.mxu0  ;;  %6625 = vmatprep.subr.bf16.mxu0 %v8557_v46  ;;  %v8602_v62 = vld [vmem:[#allocation3 + $0xddc] ss:$28 sps:$4 sm:$0xff]   ;;  %v8608_v2 = vld [vmem:[#allocation3 + $0xda4] ss:$28 sps:$4 sm:$0xff]  }
 0x713   :  { %v6372_v15 = vpop.f32.mrf.mxu1  ;;  %6666 = vmatprep.subr.bf16.mxu1 %v8560_v12  ;;  %v6371_v8 = vadd.f32 %v6370_v16, %v6330_v4  ;;  %v6332_v55 = vadd.f32 %v6331_v61, %v6291_v7  ;;  %6655 = vmatprep.mubr.bf16.mxu0 %v9159_v63  ;;  %v8597_v46 = vld [vmem:[#allocation3 + $0xa58] ss:$28 sps:$4 sm:$0xff]   ;;  %v8603_v16 = vld [vmem:[#allocation3 + $0xa20] ss:$28 sps:$4 sm:$0xff]   ;;  %v8611_v4 = vld [vmem:[#allocation3 + $0x9ec] ss:$28 sps:$4 sm:$0xff]  }
 0x714   :  { %6696 = vmatprep.mubr.bf16.mxu1 %v9163_v42  ;;  %v6333_v3 = vpop.f32.mrf.mxu0  ;;  %v8600_v12 = vld [vmem:[#allocation3 + $0xdd8] ss:$28 sps:$4 sm:$0xff]   ;;  %v8606_v7 = vld [vmem:[#allocation3 + $0xda0] ss:$28 sps:$4 sm:$0xff]   ;;  %v8609_v61 = vld [vmem:[#allocation3 + $0x9e8] ss:$28 sps:$4 sm:$0xff]  }
 0x715   :  { %v6374_v58 = vpop.f32.mrf.mxu1  ;;  %v7736_v17 = vmul.f32 -1.442695, %v6371_v8  ;;  %v6373_v43 = vadd.f32 %v6372_v15, %v6332_v55  ;;  %6626 = vmatpush1.bf16.msra.mxu0 %v8555_v13  ;;  %v8614_v13 = vld [vmem:[#allocation3 + $0xd6c] ss:$28 sps:$4 sm:$0xff]   ;;  %v8620_v8 = vld [vmem:[#allocation3 + $0xd34] ss:$28 sps:$4 sm:$0xff]  }
 0x716   :  { %6667 = vmatpush1.bf16.msra.mxu1 %v8558_v14  ;;  %v6334_v49 = vpop.f32.mrf.mxu0  ;;  %6627 = vmatprep.subr.bf16.mxu0 %v8563_v0  ;;  %v8612_v15 = vld [vmem:[#allocation3 + $0xd68] ss:$28 sps:$4 sm:$0xff]   ;;  %v8615_v55 = vld [vmem:[#allocation3 + $0x9b0] ss:$28 sps:$4 sm:$0xff]   ;;  %v8623_v58 = vld [vmem:[#allocation3 + $0x97c] ss:$28 sps:$4 sm:$0xff]  }
 0x717   :  { %v6375_v6 = vpop.f32.mrf.mxu1  ;;  %6668 = vmatprep.subr.bf16.mxu1 %v8566_v50  ;;  %8709 = vpow2.f32 %v7736_v17  ;;  %v7737_v11 = vmul.f32 -1.442695, %v6373_v43  ;;  %v8617_v50 = vld [vmem:[#allocation3 + $0x9b4] ss:$28 sps:$4 sm:$0xff]   ;;  %v8626_v17 = vld [vmem:[#allocation3 + $0xcfc] ss:$28 sps:$4 sm:$0xff]  }
 0x718   :  { %v8618_v3 = vld [vmem:[#allocation3 + $0xd30] ss:$28 sps:$4 sm:$0xff]   ;;  %v8621_v43 = vld [vmem:[#allocation3 + $0x978] ss:$28 sps:$4 sm:$0xff]   ;;  %v8632_v49 = vld [vmem:[#allocation3 + $0xcc4] ss:$28 sps:$4 sm:$0xff]  }
 0x719   :  { %8711 = vpow2.f32 %v7737_v11  ;;  %6628 = vmatpush1.bf16.msra.mxu0 %v8561_v51  ;;  %v8624_v51 = vld [vmem:[#allocation3 + $0xcf8] ss:$28 sps:$4 sm:$0xff]   ;;  %v8627_v6 = vld [vmem:[#allocation3 + $0x940] ss:$28 sps:$4 sm:$0xff]   ;;  %v8638_v11 = vld [vmem:[#allocation3 + $0xc8c] ss:$28 sps:$4 sm:$0xff]  }
 0x71a   :  { %6669 = vmatpush1.bf16.msra.mxu1 %v8564_v5  ;;  %6629 = vmatprep.subr.bf16.mxu0 %v8569_v54  ;;  %v8629_v5 = vld [vmem:[#allocation3 + $0x944] ss:$28 sps:$4 sm:$0xff]  }
 0x71b   :  { %6670 = vmatprep.subr.bf16.mxu1 %v8572_v9  ;;  %v8630_v54 = vld [vmem:[#allocation3 + $0xcc0] ss:$28 sps:$4 sm:$0xff]   ;;  %v8635_v9 = vld [vmem:[#allocation3 + $0x90c] ss:$28 sps:$4 sm:$0xff]  }
 0x71d   :  { %6630 = vmatpush1.bf16.msra.mxu0 %v8567_v18  ;;  %v8633_v18 = vld [vmem:[#allocation3 + $0x908] ss:$28 sps:$4 sm:$0xff]  }
 0x71e   :  { %6671 = vmatpush1.bf16.msra.mxu1 %v8570_v22  ;;  %6631 = vmatprep.subr.bf16.mxu0 %v8575_v23  ;;  %v8636_v22 = vld [vmem:[#allocation3 + $0xc88] ss:$28 sps:$4 sm:$0xff]   ;;  %v8641_v23 = vld [vmem:[#allocation3 + $0x8d4] ss:$28 sps:$4 sm:$0xff]  }
 0x71f   :  { %6672 = vmatprep.subr.bf16.mxu1 %v8578_v24  ;;  %v8644_v24 = vld [vmem:[#allocation3 + $0xc54] ss:$28 sps:$4 sm:$0xff]  }
 0x721   :  { %6632 = vmatpush1.bf16.msra.mxu0 %v8573_v25  ;;  %v8639_v25 = vld [vmem:[#allocation3 + $0x8d0] ss:$28 sps:$4 sm:$0xff]  }
 0x722   :  { %6673 = vmatpush1.bf16.msra.mxu1 %v8576_v26  ;;  %6633 = vmatprep.subr.bf16.mxu0 %v8581_v28  ;;  %v8642_v26 = vld [vmem:[#allocation3 + $0xc50] ss:$28 sps:$4 sm:$0xff]   ;;  %v8645_v28 = vld [vmem:[#allocation3 + $0x360] ss:$28 sps:$4 sm:$0xff]  }
 0x723   :  { %6674 = vmatprep.subr.bf16.mxu1 %v8584_v29  ;;  %v8646_v29 = vld [vmem:[#allocation3 + $0x6e0] ss:$28 sps:$4 sm:$0xff]  }
 0x724   :  { %v8710_v36 = vpop.eup %8709 }
 0x725   :  { %v6886_v27 = vadd.f32 1.0, %v8710_v36  ;;  %6634 = vmatpush1.bf16.msra.mxu0 %v8579_v32  ;;  %v8647_v32 = vld [vmem:[#allocation3 + $0x1a0] ss:$28 sps:$4 sm:$0xff]  }
 0x726   :  { %6675 = vmatpush1.bf16.msra.mxu1 %v8582_v33  ;;  %v8712_v38 = vpop.eup %8711  ;;  %6635 = vmatprep.subr.bf16.mxu0 %v8587_v20  ;;  %v8648_v33 = vld [vmem:[#allocation3 + $0x520] ss:$28 sps:$4 sm:$0xff]   ;;  %v8649_v20 = vld [vmem:[#allocation3 + $0x328] ss:$28 sps:$4 sm:$0xff]  }
 0x727   :  { %6676 = vmatprep.subr.bf16.mxu1 %v8590_v40  ;;  %8713 = vrcp.f32 %v6886_v27  ;;  %v6887_v52 = vadd.f32 1.0, %v8712_v38  ;;  %v8650_v40 = vld [vmem:[#allocation3 + $0x6a8] ss:$28 sps:$4 sm:$0xff]  }
 0x729   :  { %8715 = vrcp.f32 %v6887_v52  ;;  %6636 = vmatpush1.bf16.msra.mxu0 %v8585_v37  ;;  %v8651_v37 = vld [vmem:[#allocation3 + $0x168] ss:$28 sps:$4 sm:$0xff]   ;;  %v8654_v52 = vld [vmem:[#allocation3 + $0x670] ss:$28 sps:$4 sm:$0xff]  }
 0x72a   :  { %6677 = vmatpush1.bf16.msra.mxu1 %v8588_v41  ;;  %6637 = vmatprep.subr.bf16.mxu0 %v8593_v44  ;;  %v8652_v41 = vld [vmem:[#allocation3 + $0x4e8] ss:$28 sps:$4 sm:$0xff]  }
 0x72b   :  { %6678 = vmatprep.subr.bf16.mxu1 %v8596_v45  ;;  %v8653_v45 = vld [vmem:[#allocation3 + $0x2f0] ss:$28 sps:$4 sm:$0xff]  }
 0x72d   :  { %6638 = vmatpush1.bf16.msra.mxu0 %v8591_v53 }
 0x72e   :  { %6679 = vmatpush1.bf16.msra.mxu1 %v8594_v56  ;;  %6639 = vmatprep.subr.bf16.mxu0 %v8599_v59  ;;  %v8655_v59 = vld [vmem:[#allocation3 + $0x130] ss:$28 sps:$4 sm:$0xff]  }
 0x72f   :  { %6680 = vmatprep.subr.bf16.mxu1 %v8602_v62  ;;  %v8656_v62 = vld [vmem:[#allocation3 + $0x4b0] ss:$28 sps:$4 sm:$0xff]  }
 0x731   :  { %6640 = vmatpush2.bf16.msra.mxu0 %v8597_v46 }
 0x732   :  { %6681 = vmatpush2.bf16.msra.mxu1 %v8600_v12  ;;  %6641 = vmatprep.subr.bf16.mxu0 %v8605_v47  ;;  %v8657_v47 = vld [vmem:[#allocation3 + $0x2b8] ss:$28 sps:$4 sm:$0xff]  }
 0x733   :  { %6682 = vmatprep.subr.bf16.mxu1 %v8608_v2  ;;  %v8658_v2 = vld [vmem:[#allocation3 + $0x638] ss:$28 sps:$4 sm:$0xff]  }
 0x734   :  { %v8714_v14 = vpop.eup %8713 }
 0x735   :  { %6907 = vst [vmem:[#allocation14] sm:$0xff] %v8714_v14  ;;  %6642 = vmatpush2.bf16.msra.mxu0 %v8603_v16  ;;  %v8659_v16 = vld [vmem:[#allocation3 + $0xf8] ss:$28 sps:$4 sm:$0xff]   ;;  %v8665_v14 = vld [vmem:[#allocation3 + $0x248] ss:$28 sps:$4 sm:$0xff]  }
 0x736   :  { %6683 = vmatpush2.bf16.msra.mxu1 %v8606_v7  ;;  %v8716_v0 = vpop.eup %8715  ;;  %6643 = vmatprep.subr.bf16.mxu0 %v8611_v4  ;;  %v8660_v7 = vld [vmem:[#allocation3 + $0x478] ss:$28 sps:$4 sm:$0xff]   ;;  %v8663_v4 = vld [vmem:[#allocation3 + $0xc0] ss:$28 sps:$4 sm:$0xff]  }
 0x737   :  { %6684 = vmatprep.subr.bf16.mxu1 %v8614_v13  ;;  %6908 = vst [vmem:[#allocation14 + $0x8] sm:$0xff] %v8716_v0  ;;  %v8664_v13 = vld [vmem:[#allocation3 + $0x440] ss:$28 sps:$4 sm:$0xff]   ;;  %v8668_v0 = vld [vmem:[#allocation3 + $0x408] ss:$28 sps:$4 sm:$0xff]  }
 0x739   :  { %6644 = vmatpush2.bf16.msra.mxu0 %v8609_v61  ;;  %v8666_v61 = vld [vmem:[#allocation3 + $0x5c8] ss:$28 sps:$4 sm:$0xff]  }
 0x73a   :  { %6685 = vmatpush2.bf16.msra.mxu1 %v8612_v15  ;;  %6645 = vmatprep.subr.bf16.mxu0 %v8617_v50  ;;  %v8667_v15 = vld [vmem:[#allocation3 + $0x88] ss:$28 sps:$4 sm:$0xff]   ;;  %v8669_v50 = vld [vmem:[#allocation3 + $0x210] ss:$28 sps:$4 sm:$0xff]  }
 0x73b   :  { %6686 = vmatprep.subr.bf16.mxu1 %v8620_v8  ;;  %v8670_v8 = vld [vmem:[#allocation3 + $0x590] ss:$28 sps:$4 sm:$0xff]  }
 0x73d   :  { %6646 = vmatpush2.bf16.msra.mxu0 %v8615_v55  ;;  %v8671_v55 = vld [vmem:[#allocation3 + $0x50] ss:$28 sps:$4 sm:$0xff]  }
 0x73e   :  { %6687 = vmatpush2.bf16.msra.mxu1 %v8618_v3  ;;  %6647 = vmatprep.subr.bf16.mxu0 %v8623_v58  ;;  %v8672_v3 = vld [vmem:[#allocation3 + $0x3d0] ss:$28 sps:$4 sm:$0xff]   ;;  %v8673_v58 = vld [vmem:[#allocation3 + $0x1d8] ss:$28 sps:$4 sm:$0xff]  }
 0x73f   :  { %6688 = vmatprep.subr.bf16.mxu1 %v8626_v17  ;;  %v8674_v17 = vld [vmem:[#allocation3 + $0x558] ss:$28 sps:$4 sm:$0xff]  }
 0x741   :  { %6648 = vmatpush2.bf16.msra.mxu0 %v8621_v43  ;;  %v8675_v43 = vld [vmem:[#allocation3 + $0x18] ss:$28 sps:$4 sm:$0xff]  }
 0x742   :  { %6689 = vmatpush2.bf16.msra.mxu1 %v8624_v51  ;;  %6649 = vmatprep.subr.bf16.mxu0 %v8629_v5  ;;  %v8676_v51 = vld [vmem:[#allocation3 + $0x398] ss:$28 sps:$4 sm:$0xff]   ;;  %v8677_v5 = vld [vmem:[#allocation3 + $0xa60] ss:$28 sps:$4 sm:$0xff]  }
 0x743   :  { %6690 = vmatprep.subr.bf16.mxu1 %v8632_v49  ;;  %v8678_v49 = vld [vmem:[#allocation3 + $0xde0] ss:$28 sps:$4 sm:$0xff]  }
 0x745   :  { %6650 = vmatpush2.bf16.msra.mxu0 %v8627_v6  ;;  %v8679_v6 = vld [vmem:[#allocation3 + $0x8a0] ss:$28 sps:$4 sm:$0xff]  }
 0x746   :  { %6691 = vmatpush2.bf16.msra.mxu1 %v8630_v54  ;;  %6651 = vmatprep.subr.bf16.mxu0 %v8635_v9  ;;  %v8680_v54 = vld [vmem:[#allocation3 + $0xc20] ss:$28 sps:$4 sm:$0xff]   ;;  %v8681_v9 = vld [vmem:[#allocation3 + $0xa28] ss:$28 sps:$4 sm:$0xff]  }
 0x747   :  { %6692 = vmatprep.subr.bf16.mxu1 %v8638_v11  ;;  %v8682_v11 = vld [vmem:[#allocation3 + $0xda8] ss:$28 sps:$4 sm:$0xff]  }
 0x749   :  { %6652 = vmatpush2.bf16.msra.mxu0 %v8633_v18  ;;  %v8683_v18 = vld [vmem:[#allocation3 + $0x868] ss:$28 sps:$4 sm:$0xff]  }
 0x74a   :  { %6693 = vmatpush2.bf16.msra.mxu1 %v8636_v22  ;;  %6653 = vmatprep.subr.bf16.mxu0 %v8641_v23  ;;  %v8684_v22 = vld [vmem:[#allocation3 + $0xbe8] ss:$28 sps:$4 sm:$0xff]   ;;  %v8685_v23 = vld [vmem:[#allocation3 + $0x9f0] ss:$28 sps:$4 sm:$0xff]  }
 0x74b   :  { %6694 = vmatprep.subr.bf16.mxu1 %v8644_v24  ;;  %v8686_v24 = vld [vmem:[#allocation3 + $0xd70] ss:$28 sps:$4 sm:$0xff]  }
 0x74d   :  { %6654 = vmatpush2.bf16.msra.mxu0 %v8639_v25  ;;  %v8687_v25 = vld [vmem:[#allocation3 + $0x830] ss:$28 sps:$4 sm:$0xff]  }
 0x74e   :  { %6695 = vmatpush2.bf16.msra.mxu1 %v8642_v26  ;;  %7754 = vmatprep.subr.bf16.mxu0 %v8645_v28  ;;  %v8688_v26 = vld [vmem:[#allocation3 + $0xbb0] ss:$28 sps:$4 sm:$0xff]   ;;  %v8691_v28 = vld [vmem:[#allocation3 + $0x7f8] ss:$28 sps:$4 sm:$0xff]  }
 0x74f   :  { %7776 = vmatprep.subr.bf16.mxu1 %v8646_v29  ;;  %v8692_v29 = vld [vmem:[#allocation3 + $0xb78] ss:$28 sps:$4 sm:$0xff]  }
 0x750   :  { %v9205_v36 = vpop.f32.mrf.mxu0  ;;  %6656 = vmatmul.mubr.bf16.vlgmr.msra.gmra.mxu0 %v9157_v60 }
 0x751   :  { %v9207_v27 = vpop.f32.mrf.mxu1  ;;  %6697 = vmatmul.mubr.bf16.vlgmr.msra.gmra.mxu1 %v9161_v1  ;;  %7755 = vmatpush3.bf16.msra.mxu0 %v8647_v32  ;;  %v8693_v32 = vld [vmem:[#allocation3 + $0x980] ss:$28 sps:$4 sm:$0xff]  }
 0x752   :  { %7777 = vmatpush3.bf16.msra.mxu1 %v8648_v33  ;;  %v9211_v38 = vpop.f32.mrf.mxu0  ;;  %7756 = vmatprep.subr.bf16.mxu0 %v8649_v20  ;;  %v8694_v33 = vld [vmem:[#allocation3 + $0xd00] ss:$28 sps:$4 sm:$0xff]   ;;  %v8697_v20 = vld [vmem:[#allocation3 + $0x948] ss:$28 sps:$4 sm:$0xff]  }
 0x753   :  { %v9213_v44 = vpop.f32.mrf.mxu1  ;;  %7778 = vmatprep.subr.bf16.mxu1 %v8650_v40  ;;  %6737 = vmatprep.mubr.bf16.mxu0 %v9151_v39  ;;  %v8661_v39 = vld [vmem:[#allocation3 + $0x280] ss:$28 sps:$4 sm:$0xff]   ;;  %v8698_v40 = vld [vmem:[#allocation3 + $0xcc8] ss:$28 sps:$4 sm:$0xff]  }
 0x754   :  { %6777 = vmatprep.mubr.bf16.mxu1 %v9155_v57  ;;  %v6415_v53 = vpop.f32.mrf.mxu0  ;;  %v8662_v57 = vld [vmem:[#allocation3 + $0x600] ss:$28 sps:$4 sm:$0xff]  }
 0x755   :  { %v6456_v56 = vpop.f32.mrf.mxu1  ;;  %7757 = vmatpush3.bf16.msra.mxu0 %v8651_v37  ;;  %v8699_v37 = vld [vmem:[#allocation3 + $0x788] ss:$28 sps:$4 sm:$0xff]   ;;  %v8703_v53 = vld [vmem:[#allocation3 + $0x750] ss:$28 sps:$4 sm:$0xff]  }
 0x756   :  { %7779 = vmatpush3.bf16.msra.mxu1 %v8652_v41  ;;  %v6416_v46 = vpop.f32.mrf.mxu0  ;;  %7758 = vmatprep.subr.bf16.mxu0 %v8653_v45  ;;  %v8700_v41 = vld [vmem:[#allocation3 + $0xb08] ss:$28 sps:$4 sm:$0xff]   ;;  %v8701_v45 = vld [vmem:[#allocation3 + $0x910] ss:$28 sps:$4 sm:$0xff]  }
 0x757   :  { %v6457_v12 = vpop.f32.mrf.mxu1  ;;  %7780 = vmatprep.subr.bf16.mxu1 %v8654_v52  ;;  %v8702_v52 = vld [vmem:[#allocation3 + $0xc90] ss:$28 sps:$4 sm:$0xff]   ;;  %v3885_v46 = vrot.slane %v9191_v19, %v9029_v34 }
 0x758   :  { %v8704_v56 = vld [vmem:[#allocation3 + $0xad0] ss:$28 sps:$4 sm:$0xff]   ;;  %v3889_v12 = vrot.slane %v9191_v19, %v9032_v35 }
 0x759   :  { %7759 = vmatpush3.bf16.msra.mxu0 %v8655_v59  ;;  %v8705_v59 = vld [vmem:[#allocation3 + $0x8d8] ss:$28 sps:$4 sm:$0xff]  }
 0x75a   :  { %7781 = vmatpush3.bf16.msra.mxu1 %v8656_v62  ;;  %7760 = vmatprep.subr.bf16.mxu0 %v8657_v47  ;;  %v8706_v62 = vld [vmem:[#allocation3 + $0xc58] ss:$28 sps:$4 sm:$0xff]  }
 0x75b   :  { %7782 = vmatprep.subr.bf16.mxu1 %v8658_v2  ;;  %v8707_v47 = vld [vmem:[#allocation3 + $0x718] ss:$28 sps:$4 sm:$0xff]  }
 0x75c   :  { %v8708_v2 = vld [vmem:[#allocation3 + $0xa98] ss:$28 sps:$4 sm:$0xff]  }
 0x75d   :  { %7761 = vmatpush3.bf16.msra.mxu0 %v8659_v16  ;;  %v6412_v16 = vadd.f32 %v9205_v36, %v3885_v46 }
 0x75e   :  { %7783 = vmatpush3.bf16.msra.mxu1 %v8660_v7  ;;  %7762 = vmatprep.subr.bf16.mxu0 %v8661_v39  ;;  %v6414_v7 = vadd.f32 %v9211_v38, %v3889_v12 }
 0x75f   :  { %7784 = vmatprep.subr.bf16.mxu1 %v8662_v57  ;;  %v6453_v39 = vadd.f32 %v9207_v27, %v6412_v16 }
 0x760   :  { %v6455_v34 = vadd.f32 %v9213_v44, %v6414_v7 }
 0x761   :  { %7763 = vmatpush3.bf16.msra.mxu0 %v8663_v4 }
 0x762   :  { %7785 = vmatpush3.bf16.msra.mxu1 %v8664_v13  ;;  %7764 = vmatprep.subr.bf16.mxu0 %v8665_v14 }
 0x763   :  { %7786 = vmatprep.subr.bf16.mxu1 %v8666_v61 }
 0x765   :  { %7765 = vmatpush3.bf16.msra.mxu0 %v8667_v15 }
 0x766   :  { %7787 = vmatpush3.bf16.msra.mxu1 %v8668_v0  ;;  %7766 = vmatprep.subr.bf16.mxu0 %v8669_v50 }
 0x767   :  { %7788 = vmatprep.subr.bf16.mxu1 %v8670_v8 }
 0x769   :  { %7767 = vmatpush3.bf16.msra.mxu0 %v8671_v55 }
 0x76a   :  { %7789 = vmatpush3.bf16.msra.mxu1 %v8672_v3  ;;  %7768 = vmatprep.subr.bf16.mxu0 %v8673_v58 }
 0x76b   :  { %7790 = vmatprep.subr.bf16.mxu1 %v8674_v17 }
 0x76d   :  { %7769 = vmatpush3.bf16.msra.mxu0 %v8675_v43 }
 0x76e   :  { %7791 = vmatpush3.bf16.msra.mxu1 %v8676_v51  ;;  %7798 = vmatprep.subr.bf16.mxu0 %v8677_v5 }
 0x76f   :  { %7820 = vmatprep.subr.bf16.mxu1 %v8678_v49 }
 0x770   :  { %6738 = vmatmul.mubr.bf16.vlgmr.msra.gmra.mxu0 %v9149_v21  ;;  %v8689_v21 = vld [vmem:[#allocation3 + $0x9b8] ss:$28 sps:$4 sm:$0xff]  }
 0x771   :  { %6778 = vmatmul.mubr.bf16.vlgmr.msra.gmra.mxu1 %v9153_v48  ;;  %7799 = vmatpush3.bf16.msra.mxu0 %v8679_v6  ;;  %v8690_v48 = vld [vmem:[#allocation3 + $0xd38] ss:$28 sps:$4 sm:$0xff]  }
 0x772   :  { %7821 = vmatpush3.bf16.msra.mxu1 %v8680_v54  ;;  %7800 = vmatprep.subr.bf16.mxu0 %v8681_v9 }
 0x773   :  { %7822 = vmatprep.subr.bf16.mxu1 %v8682_v11  ;;  %6817 = vmatprep.mubr.bf16.mxu0 %v9159_v63  ;;  %v8695_v63 = vld [vmem:[#allocation3 + $0x7c0] ss:$28 sps:$4 sm:$0xff]  }
 0x774   :  { %6857 = vmatprep.mubr.bf16.mxu1 %v9163_v42  ;;  %v8696_v42 = vld [vmem:[#allocation3 + $0xb40] ss:$28 sps:$4 sm:$0xff]  }
 0x775   :  { %7801 = vmatpush3.bf16.msra.mxu0 %v8683_v18  ;;  %v3893_v18 = vrot.slane %v9191_v19, %v9118_v30 }
 0x776   :  { %7823 = vmatpush3.bf16.msra.mxu1 %v8684_v22  ;;  %7802 = vmatprep.subr.bf16.mxu0 %v8685_v23  ;;  %v3897_v22 = vrot.slane %v9191_v19, %v9121_v10 }
 0x777   :  { %7824 = vmatprep.subr.bf16.mxu1 %v8686_v24 }
 0x779   :  { %7803 = vmatpush3.bf16.msra.mxu0 %v8687_v25 }
 0x77a   :  { %7825 = vmatpush3.bf16.msra.mxu1 %v8688_v26  ;;  %7804 = vmatprep.subr.bf16.mxu0 %v8689_v21 }
 0x77b   :  { %7826 = vmatprep.subr.bf16.mxu1 %v8690_v48 }
 0x77d   :  { %7805 = vmatpush3.bf16.msra.mxu0 %v8691_v28 }
 0x77e   :  { %7827 = vmatpush3.bf16.msra.mxu1 %v8692_v29  ;;  %7806 = vmatprep.subr.bf16.mxu0 %v8693_v32 }
 0x77f   :  { %7828 = vmatprep.subr.bf16.mxu1 %v8694_v33 }
 0x781   :  { %7807 = vmatpush3.bf16.msra.mxu0 %v8695_v63 }
 0x782   :  { %7829 = vmatpush3.bf16.msra.mxu1 %v8696_v42  ;;  %7808 = vmatprep.subr.bf16.mxu0 %v8697_v20 }
 0x783   :  { %7830 = vmatprep.subr.bf16.mxu1 %v8698_v40 }
 0x785   :  { %7809 = vmatpush3.bf16.msra.mxu0 %v8699_v37 }
 0x786   :  { %7831 = vmatpush3.bf16.msra.mxu1 %v8700_v41  ;;  %7810 = vmatprep.subr.bf16.mxu0 %v8701_v45 }
 0x787   :  { %7832 = vmatprep.subr.bf16.mxu1 %v8702_v52 }
 0x789   :  { %7811 = vmatpush3.bf16.msra.mxu0 %v8703_v53 }
 0x78a   :  { %7833 = vmatpush3.bf16.msra.mxu1 %v8704_v56  ;;  %7812 = vmatprep.subr.bf16.mxu0 %v8705_v59 }
 0x78b   :  { %7834 = vmatprep.subr.bf16.mxu1 %v8706_v62 }
 0x78d   :  { %7813 = vmatpush3.bf16.msra.mxu0 %v8707_v47 }
 0x78e   :  { %7835 = vmatpush3.bf16.msra.mxu1 %v8708_v2 }
 0x790   :  { %v6493_v57 = vpop.f32.mrf.mxu0  ;;  %6818 = vmatmul.mubr.bf16.vlgmr.msra.gmra.mxu0 %v9157_v60 }
 0x791   :  { %v6534_v4 = vpop.f32.mrf.mxu1  ;;  %6858 = vmatmul.mubr.bf16.vlgmr.msra.gmra.mxu1 %v9161_v1  ;;  %v6494_v35 = vadd.f32 %v6493_v57, %v6453_v39 }
 0x792   :  { %v6495_v13 = vpop.f32.mrf.mxu0 }
 0x793   :  { %v6536_v14 = vpop.f32.mrf.mxu1  ;;  %v6535_v61 = vadd.f32 %v6534_v4, %v6494_v35  ;;  %v6496_v15 = vadd.f32 %v6495_v13, %v6455_v34  ;;  %v3901_v4 = vrot.slane %v9191_v19, %v9124_v31 }
 0x794   :  { %v6497_v36 = vpop.f32.mrf.mxu0 }
 0x795   :  { %v6538_v0 = vpop.f32.mrf.mxu1  ;;  %v7738_v38 = vmul.f32 -1.442695, %v6535_v61  ;;  %v6537_v50 = vadd.f32 %v6536_v14, %v6496_v15 }
 0x796   :  { %v6498_v8 = vpop.f32.mrf.mxu0 }
 0x797   :  { %v6539_v55 = vpop.f32.mrf.mxu1  ;;  %8717 = vpow2.f32 %v7738_v38  ;;  %v7739_v27 = vmul.f32 -1.442695, %v6537_v50 }
 0x799   :  { %8719 = vpow2.f32 %v7739_v27 }
 0x7a4   :  { %v8718_v3 = vpop.eup %8717 }
 0x7a5   :  { %v6888_v60 = vadd.f32 1.0, %v8718_v3 }
 0x7a6   :  { %v8720_v58 = vpop.eup %8719 }
 0x7a7   :  { %8721 = vrcp.f32 %v6888_v60  ;;  %v6889_v1 = vadd.f32 1.0, %v8720_v58 }
 0x7a9   :  { %8723 = vrcp.f32 %v6889_v1 }
 0x7b4   :  { %v8722_v44 = vpop.eup %8721 }
 0x7b5   :  { %6909 = vst [vmem:[#allocation14 + $0x10] sm:$0xff] %v8722_v44 }
 0x7b6   :  { %v8724_v17 = vpop.eup %8723 }
 0x7b7   :  { %6910 = vst [vmem:[#allocation14 + $0x18] sm:$0xff] %v8724_v17 }
 0x7d0   :  { %v6575_v43 = vpop.f32.mrf.mxu0 }
 0x7d1   :  { %v6616_v51 = vpop.f32.mrf.mxu1  ;;  %v6576_v23 = vadd.f32 %v6575_v43, %v3893_v18 }
 0x7d2   :  { %v6577_v5 = vpop.f32.mrf.mxu0 }
 0x7d3   :  { %v6618_v49 = vpop.f32.mrf.mxu1  ;;  %v6578_v24 = vadd.f32 %v6577_v5, %v3897_v22  ;;  %v6617_v25 = vadd.f32 %v6616_v51, %v6576_v23 }
 0x7d4   :  { %v6579_v6 = vpop.f32.mrf.mxu0 }
 0x7d5   :  { %v6620_v54 = vpop.f32.mrf.mxu1  ;;  %v6619_v48 = vadd.f32 %v6618_v49, %v6578_v24 }
 0x7d6   :  { %v6580_v9 = vpop.f32.mrf.mxu0 }
 0x7d7   :  { %v6621_v11 = vpop.f32.mrf.mxu1 }
 0x810   :  { %v6657_v26 = vpop.f32.mrf.mxu0 }
 0x811   :  { %v6698_v21 = vpop.f32.mrf.mxu1  ;;  %v6658_v28 = vadd.f32 %v6657_v26, %v6617_v25 }
 0x812   :  { %v6659_v29 = vpop.f32.mrf.mxu0 }
 0x813   :  { %v6700_v32 = vpop.f32.mrf.mxu1  ;;  %v6699_v33 = vadd.f32 %v6698_v21, %v6658_v28  ;;  %v6660_v63 = vadd.f32 %v6659_v29, %v6619_v48 }
 0x814   :  { %v6661_v42 = vpop.f32.mrf.mxu0 }
 0x815   :  { %v6702_v20 = vpop.f32.mrf.mxu1  ;;  %v7740_v40 = vmul.f32 -1.442695, %v6699_v33  ;;  %v6701_v37 = vadd.f32 %v6700_v32, %v6660_v63 }
 0x816   :  { %v6662_v41 = vpop.f32.mrf.mxu0 }
 0x817   :  { %v6703_v30 = vpop.f32.mrf.mxu1  ;;  %8725 = vpow2.f32 %v7740_v40  ;;  %v7741_v45 = vmul.f32 -1.442695, %v6701_v37 }
 0x819   :  { %8727 = vpow2.f32 %v7741_v45 }
 0x824   :  { %v8726_v10 = vpop.eup %8725 }
 0x825   :  { %v6890_v52 = vadd.f32 1.0, %v8726_v10 }
 0x826   :  { %v8728_v53 = vpop.eup %8727 }
 0x827   :  { %8729 = vrcp.f32 %v6890_v52  ;;  %v6891_v56 = vadd.f32 1.0, %v8728_v53 }
 0x829   :  { %8731 = vrcp.f32 %v6891_v56 }
 0x830   :  { %v7770_v59 = vpop.f32.mrf.mxu0 }
 0x831   :  { %v7792_v62 = vpop.f32.mrf.mxu1 }
 0x832   :  { %v7771_v46 = vpop.f32.mrf.mxu0 }
 0x833   :  { %v7793_v12 = vpop.f32.mrf.mxu1  ;;  %v7772_v34 = vadd.f32 %v7771_v46, %v7770_v59 }
 0x834   :  { %v8730_v47 = vpop.eup %8729  ;;  %v7773_v2 = vpop.f32.mrf.mxu0  ;;  %v7794_v13 = vadd.f32 %v7793_v12, %v7792_v62 }
 0x835   :  { %v7795_v16 = vpop.f32.mrf.mxu1  ;;  %6911 = vst [vmem:[#allocation14 + $0x20] sm:$0xff] %v8730_v47  ;;  %v6740_v35 = vadd.f32 %v7772_v34, %v3901_v4 }
 0x836   :  { %v8732_v7 = vpop.eup %8731  ;;  %v7774_v39 = vpop.f32.mrf.mxu0 }
 0x837   :  { %v7796_v57 = vpop.f32.mrf.mxu1  ;;  %6912 = vst [vmem:[#allocation14 + $0x28] sm:$0xff] %v8732_v7  ;;  %v6780_v0 = vadd.f32 %v7794_v13, %v6740_v35 }
 0x850   :  { %v7814_v14 = vpop.f32.mrf.mxu0 }
 0x851   :  { %v7836_v61 = vpop.f32.mrf.mxu1 }
 0x852   :  { %v7815_v15 = vpop.f32.mrf.mxu0 }
 0x853   :  { %v7837_v36 = vpop.f32.mrf.mxu1  ;;  %v7816_v38 = vadd.f32 %v7815_v15, %v7814_v14 }
 0x854   :  { %v7817_v50 = vpop.f32.mrf.mxu0  ;;  %v7838_v27 = vadd.f32 %v7837_v36, %v7836_v61 }
 0x855   :  { %v7839_v8 = vpop.f32.mrf.mxu1  ;;  %v6820_v55 = vadd.f32 %v7816_v38, %v6780_v0 }
 0x856   :  { %v7818_v3 = vpop.f32.mrf.mxu0 }
 0x857   :  { %v7840_v60 = vpop.f32.mrf.mxu1  ;;  %v6860_v58 = vadd.f32 %v7838_v27, %v6820_v55 }
 0x859   :  { %v7742_v1 = vmul.f32 -1.442695, %v6860_v58 }
 0x85b   :  { %8733 = vpow2.f32 %v7742_v1 }
 0x868   :  { %v8734_v44 = vpop.eup %8733 }
 0x869   :  { %v6892_v31 = vadd.f32 1.0, %v8734_v44 }
 0x86b   :  { %8735 = vrcp.f32 %v6892_v31 }
 0x878   :  { %v8736_v19 = vpop.eup %8735 }
 0x879   :  { %6913 = vst [vmem:[#allocation14 + $0x30] sm:$0xff] %v8736_v19 }
 0x87a   :  { %8888 = shalt.err (!%p8885_p11)
}
 0x87b   :  { %6923 = dma.vmem_to_hbm [thread:$0]  %s6921_s5, 896, %s9247_s7, [#allocation7]  }
 0x87c   :  { %8907 = dma.done.wait [#allocation7], 896  }
 0x87d   :  { %8908 = vsyncadd [#allocation7], 4294966400 }
 0x87e   :  { %6927 = vsyncpa [#allocation6], 1 }
 0x87f   :  { %6928 = vsyncpa [#allocation9], 1 }
 0x880   :  { %6929 = vsyncpa [#allocation12], 1 }
 0x881   :  { %6930 = vsyncpa [#allocation7], 1 }
 0x882   :  { %6931 = vsyncmov [#allocation4] }
 0x885   :  { %s6932_s1 = vpop.sfrf %6931 }
 0x886   :  { %p7743_p12 = scmp.ne.s32.totalorder %s6932_s1, 0 }
 0x888   :  { %6936 = shalt.err (%p7743_p12)  }
 0x889   :  { %6938 = vsyncmov [#allocation4 + $0x1] }
 0x88c   :  { %s6939_s18 = vpop.sfrf %6938 }
 0x88d   :  { %p7744_p13 = scmp.ne.s32.totalorder %s6939_s18, 0 }
 0x88f   :  { %6943 = shalt.err (%p7744_p13)  }

</bundles_post_ra>
